<compile_context>
chip_gen: v7x
topology: tpu7x:2x2x1
jax: 0.10.0
libtpu: 0.0.40
codegen_flags: <defaults>
</compile_context>

<pallas_src>
import functools
import math

import jax
import jax.numpy as jnp
from jax.experimental import pallas as pl
from jax.experimental.pallas import tpu as pltpu


ACT_DTYPE = jnp.bfloat16            # inter-kernel activation dtype
_VMEM_LIMIT = 64 * 1024 * 1024      # explicit scoped-VMEM cap


def _cparams(n_parallel=1):
    return pltpu.CompilerParams(
        dimension_semantics=("parallel",) * n_parallel,
        vmem_limit_bytes=_VMEM_LIMIT)


def _token_tile(M, target=512):
    """Token-axis tile: full array when small, else a 512-row tile (8-aligned)."""
    return M if M <= target else target


# ------------------------ fused linear (+ GELU) --------------------------

def _linear_kernel(x_ref, w_ref, b_ref, o_ref, *, activation):
    """o = act(x @ w + b); bf16 MXU matmul, f32 accumulate/epilogue, bf16 store."""
    y = jnp.dot(x_ref[...], w_ref[...], preferred_element_type=jnp.float32)
    y = y + b_ref[...]
    if activation == "gelu":
        # TODO(synk): HF BERT uses exact erf-GELU; tanh approximation kept for
        # robust Mosaic lowering.
        y = jax.nn.gelu(y, approximate=True)
    o_ref[...] = y.astype(o_ref.dtype)


def pallas_linear(x, w, b, activation=None, tm=512):
    M, K = x.shape
    Kw, N = w.shape
    assert K == Kw
    TM = _token_tile(M, tm)
    return pl.pallas_call(
        functools.partial(_linear_kernel, activation=activation),
        out_shape=jax.ShapeDtypeStruct((M, N), ACT_DTYPE),
        grid=(pl.cdiv(M, TM),),
        in_specs=[
            pl.BlockSpec((TM, K), lambda i: (i, 0)),
            pl.BlockSpec((K, N), lambda i: (0, 0)),   # weight resident
            pl.BlockSpec((1, N), lambda i: (0, 0)),
        ],
        out_specs=pl.BlockSpec((TM, N), lambda i: (i, 0)),
        compiler_params=_cparams(),
    )(x.astype(ACT_DTYPE), w.astype(ACT_DTYPE),
      b.reshape(1, N).astype(jnp.float32))


# ---------------- fused linear + residual add + LayerNorm ----------------

def _linear_add_ln_kernel(x_ref, w_ref, b_ref, r_ref, g_ref, beta_ref, o_ref,
                          *, eps):
    y = jnp.dot(x_ref[...], w_ref[...], preferred_element_type=jnp.float32)
    y = y + b_ref[...]
    h = y + r_ref[...].astype(jnp.float32)
    mu = jnp.mean(h, axis=-1, keepdims=True)
    d = h - mu
    var = jnp.mean(d * d, axis=-1, keepdims=True)
    inv = jax.lax.rsqrt(var + eps)
    o_ref[...] = (d * inv * g_ref[...] + beta_ref[...]).astype(o_ref.dtype)


def pallas_linear_add_ln(x, w, b, residual, gamma, beta, eps=1e-12, tm=512):
    M, K = x.shape
    Kw, N = w.shape
    assert K == Kw and residual.shape == (M, N)
    TM = _token_tile(M, tm)
    return pl.pallas_call(
        functools.partial(_linear_add_ln_kernel, eps=eps),
        out_shape=jax.ShapeDtypeStruct((M, N), ACT_DTYPE),
        grid=(pl.cdiv(M, TM),),
        in_specs=[
            pl.BlockSpec((TM, K), lambda i: (i, 0)),
            pl.BlockSpec((K, N), lambda i: (0, 0)),
            pl.BlockSpec((1, N), lambda i: (0, 0)),
            pl.BlockSpec((TM, N), lambda i: (i, 0)),
            pl.BlockSpec((1, N), lambda i: (0, 0)),
            pl.BlockSpec((1, N), lambda i: (0, 0)),
        ],
        out_specs=pl.BlockSpec((TM, N), lambda i: (i, 0)),
        compiler_params=_cparams(),
    )(x.astype(ACT_DTYPE), w.astype(ACT_DTYPE),
      b.reshape(1, N).astype(jnp.float32),
      residual.astype(ACT_DTYPE), gamma, beta)


# ---------------------------- plain LayerNorm -----------------------------

def _ln_kernel(x_ref, g_ref, b_ref, o_ref, *, eps):
    h = x_ref[...].astype(jnp.float32)
    mu = jnp.mean(h, axis=-1, keepdims=True)
    d = h - mu
    var = jnp.mean(d * d, axis=-1, keepdims=True)
    inv = jax.lax.rsqrt(var + eps)
    o_ref[...] = (d * inv * g_ref[...] + b_ref[...]).astype(o_ref.dtype)


def pallas_layernorm(x, gamma, beta, eps=1e-12, tm=512):
    M, H = x.shape
    TM = _token_tile(M, tm)
    return pl.pallas_call(
        functools.partial(_ln_kernel, eps=eps),
        out_shape=jax.ShapeDtypeStruct((M, H), ACT_DTYPE),
        grid=(pl.cdiv(M, TM),),
        in_specs=[
            pl.BlockSpec((TM, H), lambda i: (i, 0)),
            pl.BlockSpec((1, H), lambda i: (0, 0)),
            pl.BlockSpec((1, H), lambda i: (0, 0)),
        ],
        out_specs=pl.BlockSpec((TM, H), lambda i: (i, 0)),
        compiler_params=_cparams(),
    )(x, gamma, beta)


# ------------------------------- attention --------------------------------

def _attention_kernel(qkv_ref, o_ref, *, nh, dh):
    """One batch per grid step; reads fused (L, 3H) qkv, writes (L, H) with
    heads contiguous on lanes. 1/sqrt(dh) scale is pre-folded into Wq."""
    qkv = qkv_ref[...]                                   # (L, 3H) bf16
    H = nh * dh
    heads = []
    for h in range(nh):                                  # static unroll over heads
        q = qkv[:, h * dh:(h + 1) * dh]                  # (L, dh)
        k = qkv[:, H + h * dh:H + (h + 1) * dh]          # (L, dh)
        v = qkv[:, 2 * H + h * dh:2 * H + (h + 1) * dh]  # (L, dh)
        # Contract over dh directly (no explicit k.T transpose).
        s = jax.lax.dot_general(q, k, (((1,), (1,)), ((), ())),
                                preferred_element_type=jnp.float32)   # (L, L)
        s = s - jnp.max(s, axis=-1, keepdims=True)
        p = jnp.exp(s)
        inv = pl.reciprocal(jnp.sum(p, axis=-1, keepdims=True), approx=True)
        p = (p * inv).astype(qkv.dtype)
        # TODO(synk): no attention_mask applied (reference runs unpadded windows).
        heads.append(jnp.dot(p, v, preferred_element_type=jnp.float32))  # (L, dh)
    o = jnp.concatenate(heads, axis=-1)                  # (L, H), heads on lanes
    o_ref[...] = o.astype(o_ref.dtype)


def pallas_attention(qkv, nh):
    """qkv: (B, L, 3H) bf16 -> (B, L, H) bf16 (head-concatenated on lanes)."""
    B, L, H3 = qkv.shape
    H = H3 // 3
    dh = H // nh
    return pl.pallas_call(
        functools.partial(_attention_kernel, nh=nh, dh=dh),
        out_shape=jax.ShapeDtypeStruct((B, L, H), ACT_DTYPE),
        grid=(B,),
        in_specs=[pl.BlockSpec((None, L, H3), lambda b: (b, 0, 0))],
        out_specs=pl.BlockSpec((None, L, H), lambda b: (b, 0, 0)),
        compiler_params=_cparams(),
    )(qkv)


# ------------- classification head: (C, L-2*pad), pad slice fused ----------

def _cls_head_kernel(x_ref, wt_ref, b_ref, o_ref, *, pad):
    """Writes logits already transposed and pad-stripped: (C, L-2*pad)."""
    L = x_ref.shape[0]
    x = x_ref[pad:L - pad, :]                            # (L-2*pad, H) bf16
    y = jax.lax.dot_general(wt_ref[...], x, (((1,), (1,)), ((), ())),
                            preferred_element_type=jnp.float32)  # (C, L-2*pad)
    o_ref[...] = (y + b_ref[...]).astype(o_ref.dtype)


def pallas_cls_head(x_bld, w, b, pad):
    """x_bld: (B, L, H); w: (H, C); b: (C,) -> (B, C, L-2*pad) f32."""
    B, L, H = x_bld.shape
    Hw, C = w.shape
    assert H == Hw and L > 2 * pad
    Lp = L - 2 * pad
    wt = w.astype(ACT_DTYPE).T                           # (C, H), tiny one-off
    return pl.pallas_call(
        functools.partial(_cls_head_kernel, pad=pad),
        out_shape=jax.ShapeDtypeStruct((B, C, Lp), jnp.float32),
        grid=(B,),
        in_specs=[
            pl.BlockSpec((None, L, H), lambda b_: (b_, 0, 0)),
            pl.BlockSpec((C, H), lambda b_: (0, 0)),
            pl.BlockSpec((C, 1), lambda b_: (0, 0)),
        ],
        out_specs=pl.BlockSpec((None, C, Lp), lambda b_: (b_, 0, 0)),
        compiler_params=_cparams(),
    )(x_bld.astype(ACT_DTYPE), wt, b.reshape(C, 1).astype(jnp.float32))


# ----------------------------- Model params --------------------------------

def init_params(key, *, vocab, H, nh, inter, n_layers, num_labels, max_pos):
    std = 0.02
    dh = H // nh
    q_scale = 1.0 / math.sqrt(dh)
    keys = jax.random.split(key, 3 + n_layers)
    bf16 = jnp.bfloat16

    def nrm(k, shape):
        return jax.random.normal(k, shape, jnp.float32) * std

    params = {
        "tok_emb": nrm(keys[0], (vocab, H)),
        "pos_emb": nrm(keys[1], (max_pos, H)),
        "emb_ln_g": jnp.ones((1, H), jnp.float32),
        "emb_ln_b": jnp.zeros((1, H), jnp.float32),
        # matmul weights stored in bf16 (MXU inputs); accumulation stays f32.
        "w_cls": nrm(keys[2], (H, num_labels)).astype(bf16),
        "b_cls": jnp.zeros((num_labels,), jnp.float32),
        "layers": [],
    }
    for i in range(n_layers):
        lk = jax.random.split(keys[3 + i], 6)
        # fused Q/K/V projection weight (H, 3H) = [wq | wk | wv];
        # the attention 1/sqrt(dh) scale is folded into the Q block so the
        # kernel computes softmax((x Wq')(x Wk)^T) == softmax((x Wq)(x Wk)^T / sqrt(dh)).
        w_q = nrm(lk[0], (H, H)) * q_scale
        w_qkv = jnp.concatenate([w_q, nrm(lk[1], (H, H)), nrm(lk[2], (H, H))],
                                axis=1)
        params["layers"].append({
            "w_qkv": w_qkv.astype(bf16),
            "b_qkv": jnp.zeros((3 * H,), jnp.float32),   # q-bias scale fold is a no-op (zeros)
            "wo": nrm(lk[3], (H, H)).astype(bf16), "bo": jnp.zeros((H,), jnp.float32),
            "ln1_g": jnp.ones((1, H), jnp.float32),
            "ln1_b": jnp.zeros((1, H), jnp.float32),
            "w1": nrm(lk[4], (H, inter)).astype(bf16), "b1": jnp.zeros((inter,), jnp.float32),
            "w2": nrm(lk[5], (inter, H)).astype(bf16), "b2": jnp.zeros((H,), jnp.float32),
            "ln2_g": jnp.ones((1, H), jnp.float32),
            "ln2_b": jnp.zeros((1, H), jnp.float32),
        })
    return params


# ------------------------------- forward -----------------------------------

def splicebert_for_token_cls_forward(params, input_ids, *, nh, pad=6):
    # --- wrapper: drop the first (CLS-like) token ---
    ids = input_ids[:, 1:]
    B, L = ids.shape
    H = params["tok_emb"].shape[1]

    # --- embeddings (gather kept in plain JAX glue) ---
    x = params["tok_emb"][ids] + params["pos_emb"][:L][None, :, :]    # (B, L, H) f32
    x2 = pallas_layernorm(x.reshape(B * L, H),
                          params["emb_ln_g"], params["emb_ln_b"])     # bf16

    # --- transformer encoder layers (all activations stay bf16 in HBM) ---
    for lyr in params["layers"]:
        # fused QKV projection: one matmul, x read once
        qkv = pallas_linear(x2, lyr["w_qkv"], lyr["b_qkv"])           # (B*L, 3H)
        # attention reads (B, L, 3H) directly, writes (B, L, H) with heads on lanes
        attn = pallas_attention(qkv.reshape(B, L, 3 * H), nh)         # (B, L, H)
        # output projection fused with residual add + LayerNorm
        x2 = pallas_linear_add_ln(attn.reshape(B * L, H), lyr["wo"], lyr["bo"],
                                  x2, lyr["ln1_g"], lyr["ln1_b"])
        # FFN: GELU fused into first matmul; add+LN fused into second
        h_mid = pallas_linear(x2, lyr["w1"], lyr["b1"], activation="gelu")
        x2 = pallas_linear_add_ln(h_mid, lyr["w2"], lyr["b2"], x2,
                                  lyr["ln2_g"], lyr["ln2_b"])

    # --- token classification head: emits (B, C, L-2*pad) directly
    #     (the module's [:, pad:-pad, :].transpose(1, 2) is fused in) ---
    return pallas_cls_head(x2.reshape(B, L, H),
                           params["w_cls"], params["b_cls"], pad)


# ---------------------------------- main -----------------------------------

if __name__ == "__main__":
    B, S = 2, 24            # batch, raw sequence length (before dropping token 0)
    vocab, H, nh, inter = 16, 32, 4, 64
    n_layers, num_labels, max_pos = 2, 4, 64
    pad = 6

    key = jax.random.PRNGKey(0)
    k_param, k_data = jax.random.split(key)
    params = init_params(k_param, vocab=vocab, H=H, nh=nh, inter=inter,
                         n_layers=n_layers, num_labels=num_labels,
                         max_pos=max_pos)
    input_ids = jax.random.randint(k_data, (B, S), 0, vocab, dtype=jnp.int32)

    fwd = jax.jit(functools.partial(splicebert_for_token_cls_forward,
                                    params, nh=nh, pad=pad))
    logits = fwd(input_ids)
    jax.block_until_ready(logits)

    expected = (B, num_labels, (S - 1) - 2 * pad)
    assert logits.shape == expected, (logits.shape, expected)
    assert logits.dtype == jnp.float32
    print("KERNEL_OK")
</pallas_src>

<mosaic_0001>
module attributes {stable_mosaic.version = 11 : i64} {
  func.func @_linear_kernel(%arg0: i32, %arg1: memref<46x32xbf16, #tpu.memory_space<vmem>>, %arg2: memref<32x96xbf16, #tpu.memory_space<vmem>>, %arg3: memref<1x96xf32, #tpu.memory_space<vmem>>, %arg4: memref<46x96xbf16, #tpu.memory_space<vmem>>) attributes {dimension_semantics = [#tpu.dimension_semantics<parallel>], iteration_bounds = array<i64: 1>, scalar_prefetch = 0 : i64, scratch_operands = 0 : i64, tpu.core_type = #tpu.core_type<tc>, window_params = [{transform_indices = @transform_0, window_bounds = array<i64: 46, 32>}, {pipeline_mode = #tpu.pipeline_mode<synchronous>, transform_indices = @transform_1, window_bounds = array<i64: 32, 96>}, {pipeline_mode = #tpu.pipeline_mode<synchronous>, transform_indices = @transform_2, window_bounds = array<i64: 1, 96>}, {transform_indices = @transform_3, window_bounds = array<i64: 46, 96>}]} {
    %c0 = arith.constant 0 : index
    %c0_0 = arith.constant 0 : index
    %0 = vector.load %arg1[%c0, %c0_0] : memref<46x32xbf16, #tpu.memory_space<vmem>>, vector<46x32xbf16>
    %c0_1 = arith.constant 0 : index
    %c0_2 = arith.constant 0 : index
    %1 = vector.load %arg2[%c0_1, %c0_2] : memref<32x96xbf16, #tpu.memory_space<vmem>>, vector<32x96xbf16>
    %cst = arith.constant dense<0.000000e+00> : vector<46x96xf32>
    %2 = tpu.matmul %0, %1, %cst {dimension_numbers = #tpu.dot_dimension_numbers<[1], [0], [0], [1], [0, 0, 1, 1], [], []>} : vector<46x32xbf16>, vector<32x96xbf16>, vector<46x96xf32> -> vector<46x96xf32>
    %c0_3 = arith.constant 0 : index
    %c0_4 = arith.constant 0 : index
    %3 = vector.load %arg3[%c0_3, %c0_4] : memref<1x96xf32, #tpu.memory_space<vmem>>, vector<1x96xf32>
    %4 = vector.broadcast %3 : vector<1x96xf32> to vector<46x96xf32>
    %5 = arith.addf %2, %4 : vector<46x96xf32>
    %6 = arith.truncf %5 : vector<46x96xf32> to vector<46x96xbf16>
    %c0_5 = arith.constant 0 : index
    %c0_6 = arith.constant 0 : index
    %7 = vector.load %arg4[%c0_5, %c0_6] : memref<46x96xbf16, #tpu.memory_space<vmem>>, vector<46x96xbf16>
    tpu.vector_store %arg4[%c0_5, %c0_6], %6 {strides = array<i32>} : memref<46x96xbf16, #tpu.memory_space<vmem>>, vector<46x96xbf16>,
    return
  }
  func.func @transform_0(%arg0: i32) -> (i32, i32) {
    %c0_i32 = arith.constant 0 : i32
    %c0_i32_0 = arith.constant 0 : i32
    return %arg0, %c0_i32 : i32, i32
  }
  func.func @transform_1(%arg0: i32) -> (i32, i32) {
    %c0_i32 = arith.constant 0 : i32
    %c0_i32_0 = arith.constant 0 : i32
    %c0_i32_1 = arith.constant 0 : i32
    return %c0_i32, %c0_i32_0 : i32, i32
  }
  func.func @transform_2(%arg0: i32) -> (i32, i32) {
    %c0_i32 = arith.constant 0 : i32
    %c0_i32_0 = arith.constant 0 : i32
    %c0_i32_1 = arith.constant 0 : i32
    return %c0_i32, %c0_i32_0 : i32, i32
  }
  func.func @transform_3(%arg0: i32) -> (i32, i32) {
    %c0_i32 = arith.constant 0 : i32
    %c0_i32_0 = arith.constant 0 : i32
    return %arg0, %c0_i32 : i32, i32
  }
}

module attributes {stable_mosaic.version = 11 : i64} {
  func.func @_ln_kernel(%arg0: i32, %arg1: memref<46x32xf32, #tpu.memory_space<vmem>>, %arg2: memref<1x32xf32, #tpu.memory_space<vmem>>, %arg3: memref<1x32xf32, #tpu.memory_space<vmem>>, %arg4: memref<46x32xbf16, #tpu.memory_space<vmem>>) attributes {dimension_semantics = [#tpu.dimension_semantics<parallel>], iteration_bounds = array<i64: 1>, scalar_prefetch = 0 : i64, scratch_operands = 0 : i64, tpu.core_type = #tpu.core_type<tc>, window_params = [{transform_indices = @transform_0, window_bounds = array<i64: 46, 32>}, {pipeline_mode = #tpu.pipeline_mode<synchronous>, transform_indices = @transform_1, window_bounds = array<i64: 1, 32>}, {pipeline_mode = #tpu.pipeline_mode<synchronous>, transform_indices = @transform_2, window_bounds = array<i64: 1, 32>}, {transform_indices = @transform_3, window_bounds = array<i64: 46, 32>}]} {
    %c0 = arith.constant 0 : index
    %c0_0 = arith.constant 0 : index
    %0 = vector.load %arg1[%c0, %c0_0] : memref<46x32xf32, #tpu.memory_space<vmem>>, vector<46x32xf32>
    %cst = arith.constant dense<0.000000e+00> : vector<46xf32>
    %1 = vector.multi_reduction <add>, %0, %cst [1] : vector<46x32xf32> to vector<46xf32>
    %2 = vector.shape_cast %1 : vector<46xf32> to vector<46x1xf32>
    %cst_1 = arith.constant 3.200000e+01 : f32
    %3 = vector.broadcast %cst_1 : f32 to vector<46x1xf32>
    %4 = arith.divf %2, %3 : vector<46x1xf32>
    %5 = vector.broadcast %4 : vector<46x1xf32> to vector<46x32xf32>
    %6 = arith.subf %0, %5 : vector<46x32xf32>
    %7 = arith.mulf %6, %6 : vector<46x32xf32>
    %cst_2 = arith.constant dense<0.000000e+00> : vector<46xf32>
    %8 = vector.multi_reduction <add>, %7, %cst_2 [1] : vector<46x32xf32> to vector<46xf32>
    %9 = vector.shape_cast %8 : vector<46xf32> to vector<46x1xf32>
    %cst_3 = arith.constant 3.200000e+01 : f32
    %10 = vector.broadcast %cst_3 : f32 to vector<46x1xf32>
    %11 = arith.divf %9, %10 : vector<46x1xf32>
    %cst_4 = arith.constant 9.99999996E-13 : f32
    %12 = vector.broadcast %cst_4 : f32 to vector<46x1xf32>
    %13 = arith.addf %11, %12 : vector<46x1xf32>
    %14 = math.rsqrt %13 : vector<46x1xf32>
    %15 = vector.broadcast %14 : vector<46x1xf32> to vector<46x32xf32>
    %16 = arith.mulf %6, %15 : vector<46x32xf32>
    %c0_5 = arith.constant 0 : index
    %c0_6 = arith.constant 0 : index
    %17 = vector.load %arg2[%c0_5, %c0_6] : memref<1x32xf32, #tpu.memory_space<vmem>>, vector<1x32xf32>
    %18 = vector.broadcast %17 : vector<1x32xf32> to vector<46x32xf32>
    %19 = arith.mulf %16, %18 : vector<46x32xf32>
    %c0_7 = arith.constant 0 : index
    %c0_8 = arith.constant 0 : index
    %20 = vector.load %arg3[%c0_7, %c0_8] : memref<1x32xf32, #tpu.memory_space<vmem>>, vector<1x32xf32>
    %21 = vector.broadcast %20 : vector<1x32xf32> to vector<46x32xf32>
    %22 = arith.addf %19, %21 : vector<46x32xf32>
    %23 = arith.truncf %22 : vector<46x32xf32> to vector<46x32xbf16>
    %c0_9 = arith.constant 0 : index
    %c0_10 = arith.constant 0 : index
    %24 = vector.load %arg4[%c0_9, %c0_10] : memref<46x32xbf16, #tpu.memory_space<vmem>>, vector<46x32xbf16>
    tpu.vector_store %arg4[%c0_9, %c0_10], %23 {strides = array<i32>} : memref<46x32xbf16, #tpu.memory_space<vmem>>, vector<46x32xbf16>,
    return
  }
  func.func @transform_0(%arg0: i32) -> (i32, i32) {
    %c0_i32 = arith.constant 0 : i32
    %c0_i32_0 = arith.constant 0 : i32
    return %arg0, %c0_i32 : i32, i32
  }
  func.func @transform_1(%arg0: i32) -> (i32, i32) {
    %c0_i32 = arith.constant 0 : i32
    %c0_i32_0 = arith.constant 0 : i32
    %c0_i32_1 = arith.constant 0 : i32
    return %c0_i32, %c0_i32_0 : i32, i32
  }
  func.func @transform_2(%arg0: i32) -> (i32, i32) {
    %c0_i32 = arith.constant 0 : i32
    %c0_i32_0 = arith.constant 0 : i32
    %c0_i32_1 = arith.constant 0 : i32
    return %c0_i32, %c0_i32_0 : i32, i32
  }
  func.func @transform_3(%arg0: i32) -> (i32, i32) {
    %c0_i32 = arith.constant 0 : i32
    %c0_i32_0 = arith.constant 0 : i32
    return %arg0, %c0_i32 : i32, i32
  }
}

module attributes {stable_mosaic.version = 11 : i64} {
  func.func @_attention_kernel(%arg0: i32, %arg1: memref<1x23x96xbf16, #tpu.memory_space<vmem>>, %arg2: memref<1x23x32xbf16, #tpu.memory_space<vmem>>) attributes {dimension_semantics = [#tpu.dimension_semantics<parallel>], iteration_bounds = array<i64: 2>, scalar_prefetch = 0 : i64, scratch_operands = 0 : i64, tpu.core_type = #tpu.core_type<tc>, window_params = [{transform_indices = @transform_0, window_bounds = array<i64: 1, 23, 96>}, {transform_indices = @transform_1, window_bounds = array<i64: 1, 23, 32>}]} {
    %c0 = arith.constant 0 : index
    %c0_0 = arith.constant 0 : index
    %c0_1 = arith.constant 0 : index
    %0 = vector.load %arg1[%c0, %c0_0, %c0_1] : memref<1x23x96xbf16, #tpu.memory_space<vmem>>, vector<1x23x96xbf16>
    %1 = vector.shape_cast %0 : vector<1x23x96xbf16> to vector<23x96xbf16>
    %2 = vector.extract_strided_slice %1 {offsets = [0, 0], sizes = [23, 8], strides = [1, 1]} : vector<23x96xbf16> to vector<23x8xbf16>
    %3 = vector.extract_strided_slice %1 {offsets = [0, 32], sizes = [23, 8], strides = [1, 1]} : vector<23x96xbf16> to vector<23x8xbf16>
    %4 = vector.extract_strided_slice %1 {offsets = [0, 64], sizes = [23, 8], strides = [1, 1]} : vector<23x96xbf16> to vector<23x8xbf16>
    %cst = arith.constant dense<0.000000e+00> : vector<23x23xf32>
    %5 = tpu.matmul %2, %3, %cst {dimension_numbers = #tpu.dot_dimension_numbers<[1], [1], [0], [0], [0, 0, 1, 0], [], []>} : vector<23x8xbf16>, vector<23x8xbf16>, vector<23x23xf32> -> vector<23x23xf32>
    %cst_2 = arith.constant dense<0xFF800000> : vector<23xf32>
    %6 = vector.multi_reduction <maximumf>, %5, %cst_2 [1] : vector<23x23xf32> to vector<23xf32>
    %7 = vector.shape_cast %6 : vector<23xf32> to vector<23x1xf32>
    %8 = vector.broadcast %7 : vector<23x1xf32> to vector<23x23xf32>
    %9 = arith.subf %5, %8 : vector<23x23xf32>
    %10 = math.exp %9 : vector<23x23xf32>
    %cst_3 = arith.constant dense<0.000000e+00> : vector<23xf32>
    %11 = vector.multi_reduction <add>, %10, %cst_3 [1] : vector<23x23xf32> to vector<23xf32>
    %12 = vector.shape_cast %11 : vector<23xf32> to vector<23x1xf32>
    %13 = tpu.reciprocal %12 {approx = true} : vector<23x1xf32> -> vector<23x1xf32>
    %14 = vector.broadcast %13 : vector<23x1xf32> to vector<23x23xf32>
    %15 = arith.mulf %10, %14 : vector<23x23xf32>
    %16 = arith.truncf %15 : vector<23x23xf32> to vector<23x23xbf16>
    %cst_4 = arith.constant dense<0.000000e+00> : vector<23x8xf32>
    %17 = tpu.matmul %16, %4, %cst_4 {dimension_numbers = #tpu.dot_dimension_numbers<[1], [0], [0], [1], [0, 0, 1, 1], [], []>} : vector<23x23xbf16>, vector<23x8xbf16>, vector<23x8xf32> -> vector<23x8xf32>
    %18 = vector.extract_strided_slice %1 {offsets = [0, 8], sizes = [23, 8], strides = [1, 1]} : vector<23x96xbf16> to vector<23x8xbf16>
    %19 = vector.extract_strided_slice %1 {offsets = [0, 40], sizes = [23, 8], strides = [1, 1]} : vector<23x96xbf16> to vector<23x8xbf16>
    %20 = vector.extract_strided_slice %1 {offsets = [0, 72], sizes = [23, 8], strides = [1, 1]} : vector<23x96xbf16> to vector<23x8xbf16>
    %cst_5 = arith.constant dense<0.000000e+00> : vector<23x23xf32>
    %21 = tpu.matmul %18, %19, %cst_5 {dimension_numbers = #tpu.dot_dimension_numbers<[1], [1], [0], [0], [0, 0, 1, 0], [], []>} : vector<23x8xbf16>, vector<23x8xbf16>, vector<23x23xf32> -> vector<23x23xf32>
    %cst_6 = arith.constant dense<0xFF800000> : vector<23xf32>
    %22 = vector.multi_reduction <maximumf>, %21, %cst_6 [1] : vector<23x23xf32> to vector<23xf32>
    %23 = vector.shape_cast %22 : vector<23xf32> to vector<23x1xf32>
    %24 = vector.broadcast %23 : vector<23x1xf32> to vector<23x23xf32>
    %25 = arith.subf %21, %24 : vector<23x23xf32>
    %26 = math.exp %25 : vector<23x23xf32>
    %cst_7 = arith.constant dense<0.000000e+00> : vector<23xf32>
    %27 = vector.multi_reduction <add>, %26, %cst_7 [1] : vector<23x23xf32> to vector<23xf32>
    %28 = vector.shape_cast %27 : vector<23xf32> to vector<23x1xf32>
    %29 = tpu.reciprocal %28 {approx = true} : vector<23x1xf32> -> vector<23x1xf32>
    %30 = vector.broadcast %29 : vector<23x1xf32> to vector<23x23xf32>
    %31 = arith.mulf %26, %30 : vector<23x23xf32>
    %32 = arith.truncf %31 : vector<23x23xf32> to vector<23x23xbf16>
    %cst_8 = arith.constant dense<0.000000e+00> : vector<23x8xf32>
    %33 = tpu.matmul %32, %20, %cst_8 {dimension_numbers = #tpu.dot_dimension_numbers<[1], [0], [0], [1], [0, 0, 1, 1], [], []>} : vector<23x23xbf16>, vector<23x8xbf16>, vector<23x8xf32> -> vector<23x8xf32>
    %34 = vector.extract_strided_slice %1 {offsets = [0, 16], sizes = [23, 8], strides = [1, 1]} : vector<23x96xbf16> to vector<23x8xbf16>
    %35 = vector.extract_strided_slice %1 {offsets = [0, 48], sizes = [23, 8], strides = [1, 1]} : vector<23x96xbf16> to vector<23x8xbf16>
    %36 = vector.extract_strided_slice %1 {offsets = [0, 80], sizes = [23, 8], strides = [1, 1]} : vector<23x96xbf16> to vector<23x8xbf16>
    %cst_9 = arith.constant dense<0.000000e+00> : vector<23x23xf32>
    %37 = tpu.matmul %34, %35, %cst_9 {dimension_numbers = #tpu.dot_dimension_numbers<[1], [1], [0], [0], [0, 0, 1, 0], [], []>} : vector<23x8xbf16>, vector<23x8xbf16>, vector<23x23xf32> -> vector<23x23xf32>
    %cst_10 = arith.constant dense<0xFF800000> : vector<23xf32>
    %38 = vector.multi_reduction <maximumf>, %37, %cst_10 [1] : vector<23x23xf32> to vector<23xf32>
    %39 = vector.shape_cast %38 : vector<23xf32> to vector<23x1xf32>
    %40 = vector.broadcast %39 : vector<23x1xf32> to vector<23x23xf32>
    %41 = arith.subf %37, %40 : vector<23x23xf32>
    %42 = math.exp %41 : vector<23x23xf32>
    %cst_11 = arith.constant dense<0.000000e+00> : vector<23xf32>
    %43 = vector.multi_reduction <add>, %42, %cst_11 [1] : vector<23x23xf32> to vector<23xf32>
    %44 = vector.shape_cast %43 : vector<23xf32> to vector<23x1xf32>
    %45 = tpu.reciprocal %44 {approx = true} : vector<23x1xf32> -> vector<23x1xf32>
    %46 = vector.broadcast %45 : vector<23x1xf32> to vector<23x23xf32>
    %47 = arith.mulf %42, %46 : vector<23x23xf32>
    %48 = arith.truncf %47 : vector<23x23xf32> to vector<23x23xbf16>
    %cst_12 = arith.constant dense<0.000000e+00> : vector<23x8xf32>
    %49 = tpu.matmul %48, %36, %cst_12 {dimension_numbers = #tpu.dot_dimension_numbers<[1], [0], [0], [1], [0, 0, 1, 1], [], []>} : vector<23x23xbf16>, vector<23x8xbf16>, vector<23x8xf32> -> vector<23x8xf32>
    %50 = vector.extract_strided_slice %1 {offsets = [0, 24], sizes = [23, 8], strides = [1, 1]} : vector<23x96xbf16> to vector<23x8xbf16>
    %51 = vector.extract_strided_slice %1 {offsets = [0, 56], sizes = [23, 8], strides = [1, 1]} : vector<23x96xbf16> to vector<23x8xbf16>
    %52 = vector.extract_strided_slice %1 {offsets = [0, 88], sizes = [23, 8], strides = [1, 1]} : vector<23x96xbf16> to vector<23x8xbf16>
    %cst_13 = arith.constant dense<0.000000e+00> : vector<23x23xf32>
    %53 = tpu.matmul %50, %51, %cst_13 {dimension_numbers = #tpu.dot_dimension_numbers<[1], [1], [0], [0], [0, 0, 1, 0], [], []>} : vector<23x8xbf16>, vector<23x8xbf16>, vector<23x23xf32> -> vector<23x23xf32>
    %cst_14 = arith.constant dense<0xFF800000> : vector<23xf32>
    %54 = vector.multi_reduction <maximumf>, %53, %cst_14 [1] : vector<23x23xf32> to vector<23xf32>
    %55 = vector.shape_cast %54 : vector<23xf32> to vector<23x1xf32>
    %56 = vector.broadcast %55 : vector<23x1xf32> to vector<23x23xf32>
    %57 = arith.subf %53, %56 : vector<23x23xf32>
    %58 = math.exp %57 : vector<23x23xf32>
    %cst_15 = arith.constant dense<0.000000e+00> : vector<23xf32>
    %59 = vector.multi_reduction <add>, %58, %cst_15 [1] : vector<23x23xf32> to vector<23xf32>
    %60 = vector.shape_cast %59 : vector<23xf32> to vector<23x1xf32>
    %61 = tpu.reciprocal %60 {approx = true} : vector<23x1xf32> -> vector<23x1xf32>
    %62 = vector.broadcast %61 : vector<23x1xf32> to vector<23x23xf32>
    %63 = arith.mulf %58, %62 : vector<23x23xf32>
    %64 = arith.truncf %63 : vector<23x23xf32> to vector<23x23xbf16>
    %cst_16 = arith.constant dense<0.000000e+00> : vector<23x8xf32>
    %65 = tpu.matmul %64, %52, %cst_16 {dimension_numbers = #tpu.dot_dimension_numbers<[1], [0], [0], [1], [0, 0, 1, 1], [], []>} : vector<23x23xbf16>, vector<23x8xbf16>, vector<23x8xf32> -> vector<23x8xf32>
    %66 = tpu.concatenate %17, %33, %49, %65 in 1 : vector<23x8xf32>, vector<23x8xf32>, vector<23x8xf32>, vector<23x8xf32> -> vector<23x32xf32>
    %67 = arith.truncf %66 : vector<23x32xf32> to vector<23x32xbf16>
    %c0_17 = arith.constant 0 : index
    %c0_18 = arith.constant 0 : index
    %c0_19 = arith.constant 0 : index
    %68 = vector.load %arg2[%c0_17, %c0_18, %c0_19] : memref<1x23x32xbf16, #tpu.memory_space<vmem>>, vector<1x23x32xbf16>
    %69 = vector.shape_cast %68 : vector<1x23x32xbf16> to vector<23x32xbf16>
    %70 = vector.shape_cast %67 : vector<23x32xbf16> to vector<1x23x32xbf16>
    tpu.vector_store %arg2[%c0_17, %c0_18, %c0_19], %70 {strides = array<i32>} : memref<1x23x32xbf16, #tpu.memory_space<vmem>>, vector<1x23x32xbf16>,
    return
  }
  func.func @transform_0(%arg0: i32) -> (i32, i32, i32) {
    %c0_i32 = arith.constant 0 : i32
    %c0_i32_0 = arith.constant 0 : i32
    %c0_i32_1 = arith.constant 0 : i32
    return %arg0, %c0_i32, %c0_i32_0 : i32, i32, i32
  }
  func.func @transform_1(%arg0: i32) -> (i32, i32, i32) {
    %c0_i32 = arith.constant 0 : i32
    %c0_i32_0 = arith.constant 0 : i32
    %c0_i32_1 = arith.constant 0 : i32
    return %arg0, %c0_i32, %c0_i32_0 : i32, i32, i32
  }
}

module attributes {stable_mosaic.version = 11 : i64} {
  func.func @_linear_add_ln_kernel(%arg0: i32, %arg1: memref<46x32xbf16, #tpu.memory_space<vmem>>, %arg2: memref<32x32xbf16, #tpu.memory_space<vmem>>, %arg3: memref<1x32xf32, #tpu.memory_space<vmem>>, %arg4: memref<46x32xbf16, #tpu.memory_space<vmem>>, %arg5: memref<1x32xf32, #tpu.memory_space<vmem>>, %arg6: memref<1x32xf32, #tpu.memory_space<vmem>>, %arg7: memref<46x32xbf16, #tpu.memory_space<vmem>>) attributes {dimension_semantics = [#tpu.dimension_semantics<parallel>], iteration_bounds = array<i64: 1>, scalar_prefetch = 0 : i64, scratch_operands = 0 : i64, tpu.core_type = #tpu.core_type<tc>, window_params = [{transform_indices = @transform_0, window_bounds = array<i64: 46, 32>}, {pipeline_mode = #tpu.pipeline_mode<synchronous>, transform_indices = @transform_1, window_bounds = array<i64: 32, 32>}, {pipeline_mode = #tpu.pipeline_mode<synchronous>, transform_indices = @transform_2, window_bounds = array<i64: 1, 32>}, {transform_indices = @transform_3, window_bounds = array<i64: 46, 32>}, {pipeline_mode = #tpu.pipeline_mode<synchronous>, transform_indices = @transform_4, window_bounds = array<i64: 1, 32>}, {pipeline_mode = #tpu.pipeline_mode<synchronous>, transform_indices = @transform_5, window_bounds = array<i64: 1, 32>}, {transform_indices = @transform_6, window_bounds = array<i64: 46, 32>}]} {
    %c0 = arith.constant 0 : index
    %c0_0 = arith.constant 0 : index
    %0 = vector.load %arg1[%c0, %c0_0] : memref<46x32xbf16, #tpu.memory_space<vmem>>, vector<46x32xbf16>
    %c0_1 = arith.constant 0 : index
    %c0_2 = arith.constant 0 : index
    %1 = vector.load %arg2[%c0_1, %c0_2] : memref<32x32xbf16, #tpu.memory_space<vmem>>, vector<32x32xbf16>
    %cst = arith.constant dense<0.000000e+00> : vector<46x32xf32>
    %2 = tpu.matmul %0, %1, %cst {dimension_numbers = #tpu.dot_dimension_numbers<[1], [0], [0], [1], [0, 0, 1, 1], [], []>} : vector<46x32xbf16>, vector<32x32xbf16>, vector<46x32xf32> -> vector<46x32xf32>
    %c0_3 = arith.constant 0 : index
    %c0_4 = arith.constant 0 : index
    %3 = vector.load %arg3[%c0_3, %c0_4] : memref<1x32xf32, #tpu.memory_space<vmem>>, vector<1x32xf32>
    %4 = vector.broadcast %3 : vector<1x32xf32> to vector<46x32xf32>
    %5 = arith.addf %2, %4 : vector<46x32xf32>
    %c0_5 = arith.constant 0 : index
    %c0_6 = arith.constant 0 : index
    %6 = vector.load %arg4[%c0_5, %c0_6] : memref<46x32xbf16, #tpu.memory_space<vmem>>, vector<46x32xbf16>
    %7 = arith.extf %6 : vector<46x32xbf16> to vector<46x32xf32>
    %8 = arith.addf %5, %7 : vector<46x32xf32>
    %cst_7 = arith.constant dense<0.000000e+00> : vector<46xf32>
    %9 = vector.multi_reduction <add>, %8, %cst_7 [1] : vector<46x32xf32> to vector<46xf32>
    %10 = vector.shape_cast %9 : vector<46xf32> to vector<46x1xf32>
    %cst_8 = arith.constant 3.200000e+01 : f32
    %11 = vector.broadcast %cst_8 : f32 to vector<46x1xf32>
    %12 = arith.divf %10, %11 : vector<46x1xf32>
    %13 = vector.broadcast %12 : vector<46x1xf32> to vector<46x32xf32>
    %14 = arith.subf %8, %13 : vector<46x32xf32>
    %15 = arith.mulf %14, %14 : vector<46x32xf32>
    %cst_9 = arith.constant dense<0.000000e+00> : vector<46xf32>
    %16 = vector.multi_reduction <add>, %15, %cst_9 [1] : vector<46x32xf32> to vector<46xf32>
    %17 = vector.shape_cast %16 : vector<46xf32> to vector<46x1xf32>
    %cst_10 = arith.constant 3.200000e+01 : f32
    %18 = vector.broadcast %cst_10 : f32 to vector<46x1xf32>
    %19 = arith.divf %17, %18 : vector<46x1xf32>
    %cst_11 = arith.constant 9.99999996E-13 : f32
    %20 = vector.broadcast %cst_11 : f32 to vector<46x1xf32>
    %21 = arith.addf %19, %20 : vector<46x1xf32>
    %22 = math.rsqrt %21 : vector<46x1xf32>
    %23 = vector.broadcast %22 : vector<46x1xf32> to vector<46x32xf32>
    %24 = arith.mulf %14, %23 : vector<46x32xf32>
    %c0_12 = arith.constant 0 : index
    %c0_13 = arith.constant 0 : index
    %25 = vector.load %arg5[%c0_12, %c0_13] : memref<1x32xf32, #tpu.memory_space<vmem>>, vector<1x32xf32>
    %26 = vector.broadcast %25 : vector<1x32xf32> to vector<46x32xf32>
    %27 = arith.mulf %24, %26 : vector<46x32xf32>
    %c0_14 = arith.constant 0 : index
    %c0_15 = arith.constant 0 : index
    %28 = vector.load %arg6[%c0_14, %c0_15] : memref<1x32xf32, #tpu.memory_space<vmem>>, vector<1x32xf32>
    %29 = vector.broadcast %28 : vector<1x32xf32> to vector<46x32xf32>
    %30 = arith.addf %27, %29 : vector<46x32xf32>
    %31 = arith.truncf %30 : vector<46x32xf32> to vector<46x32xbf16>
    %c0_16 = arith.constant 0 : index
    %c0_17 = arith.constant 0 : index
    %32 = vector.load %arg7[%c0_16, %c0_17] : memref<46x32xbf16, #tpu.memory_space<vmem>>, vector<46x32xbf16>
    tpu.vector_store %arg7[%c0_16, %c0_17], %31 {strides = array<i32>} : memref<46x32xbf16, #tpu.memory_space<vmem>>, vector<46x32xbf16>,
    return
  }
  func.func @transform_0(%arg0: i32) -> (i32, i32) {
    %c0_i32 = arith.constant 0 : i32
    %c0_i32_0 = arith.constant 0 : i32
    return %arg0, %c0_i32 : i32, i32
  }
  func.func @transform_1(%arg0: i32) -> (i32, i32) {
    %c0_i32 = arith.constant 0 : i32
    %c0_i32_0 = arith.constant 0 : i32
    %c0_i32_1 = arith.constant 0 : i32
    return %c0_i32, %c0_i32_0 : i32, i32
  }
  func.func @transform_2(%arg0: i32) -> (i32, i32) {
    %c0_i32 = arith.constant 0 : i32
    %c0_i32_0 = arith.constant 0 : i32
    %c0_i32_1 = arith.constant 0 : i32
    return %c0_i32, %c0_i32_0 : i32, i32
  }
  func.func @transform_3(%arg0: i32) -> (i32, i32) {
    %c0_i32 = arith.constant 0 : i32
    %c0_i32_0 = arith.constant 0 : i32
    return %arg0, %c0_i32 : i32, i32
  }
  func.func @transform_4(%arg0: i32) -> (i32, i32) {
    %c0_i32 = arith.constant 0 : i32
    %c0_i32_0 = arith.constant 0 : i32
    %c0_i32_1 = arith.constant 0 : i32
    return %c0_i32, %c0_i32_0 : i32, i32
  }
  func.func @transform_5(%arg0: i32) -> (i32, i32) {
    %c0_i32 = arith.constant 0 : i32
    %c0_i32_0 = arith.constant 0 : i32
    %c0_i32_1 = arith.constant 0 : i32
    return %c0_i32, %c0_i32_0 : i32, i32
  }
  func.func @transform_6(%arg0: i32) -> (i32, i32) {
    %c0_i32 = arith.constant 0 : i32
    %c0_i32_0 = arith.constant 0 : i32
    return %arg0, %c0_i32 : i32, i32
  }
}

module attributes {stable_mosaic.version = 11 : i64} {
  func.func @_linear_kernel(%arg0: i32, %arg1: memref<46x32xbf16, #tpu.memory_space<vmem>>, %arg2: memref<32x64xbf16, #tpu.memory_space<vmem>>, %arg3: memref<1x64xf32, #tpu.memory_space<vmem>>, %arg4: memref<46x64xbf16, #tpu.memory_space<vmem>>) attributes {dimension_semantics = [#tpu.dimension_semantics<parallel>], iteration_bounds = array<i64: 1>, scalar_prefetch = 0 : i64, scratch_operands = 0 : i64, tpu.core_type = #tpu.core_type<tc>, window_params = [{transform_indices = @transform_0, window_bounds = array<i64: 46, 32>}, {pipeline_mode = #tpu.pipeline_mode<synchronous>, transform_indices = @transform_1, window_bounds = array<i64: 32, 64>}, {pipeline_mode = #tpu.pipeline_mode<synchronous>, transform_indices = @transform_2, window_bounds = array<i64: 1, 64>}, {transform_indices = @transform_3, window_bounds = array<i64: 46, 64>}]} {
    %c0 = arith.constant 0 : index
    %c0_0 = arith.constant 0 : index
    %0 = vector.load %arg1[%c0, %c0_0] : memref<46x32xbf16, #tpu.memory_space<vmem>>, vector<46x32xbf16>
    %c0_1 = arith.constant 0 : index
    %c0_2 = arith.constant 0 : index
    %1 = vector.load %arg2[%c0_1, %c0_2] : memref<32x64xbf16, #tpu.memory_space<vmem>>, vector<32x64xbf16>
    %cst = arith.constant dense<0.000000e+00> : vector<46x64xf32>
    %2 = tpu.matmul %0, %1, %cst {dimension_numbers = #tpu.dot_dimension_numbers<[1], [0], [0], [1], [0, 0, 1, 1], [], []>} : vector<46x32xbf16>, vector<32x64xbf16>, vector<46x64xf32> -> vector<46x64xf32>
    %c0_3 = arith.constant 0 : index
    %c0_4 = arith.constant 0 : index
    %3 = vector.load %arg3[%c0_3, %c0_4] : memref<1x64xf32, #tpu.memory_space<vmem>>, vector<1x64xf32>
    %4 = vector.broadcast %3 : vector<1x64xf32> to vector<46x64xf32>
    %5 = arith.addf %2, %4 : vector<46x64xf32>
    %6 = arith.mulf %5, %5 : vector<46x64xf32>
    %7 = arith.mulf %5, %6 : vector<46x64xf32>
    %cst_5 = arith.constant 4.471500e-02 : f32
    %8 = vector.broadcast %cst_5 : f32 to vector<46x64xf32>
    %9 = arith.mulf %8, %7 : vector<46x64xf32>
    %10 = arith.addf %5, %9 : vector<46x64xf32>
    %cst_6 = arith.constant 0.797884583 : f32
    %11 = vector.broadcast %cst_6 : f32 to vector<46x64xf32>
    %12 = arith.mulf %11, %10 : vector<46x64xf32>
    %13 = math.tanh %12 : vector<46x64xf32>
    %cst_7 = arith.constant 1.000000e+00 : f32
    %14 = vector.broadcast %cst_7 : f32 to vector<46x64xf32>
    %15 = arith.addf %14, %13 : vector<46x64xf32>
    %cst_8 = arith.constant 5.000000e-01 : f32
    %16 = vector.broadcast %cst_8 : f32 to vector<46x64xf32>
    %17 = arith.mulf %16, %15 : vector<46x64xf32>
    %18 = arith.mulf %5, %17 : vector<46x64xf32>
    %19 = arith.truncf %18 : vector<46x64xf32> to vector<46x64xbf16>
    %c0_9 = arith.constant 0 : index
    %c0_10 = arith.constant 0 : index
    %20 = vector.load %arg4[%c0_9, %c0_10] : memref<46x64xbf16, #tpu.memory_space<vmem>>, vector<46x64xbf16>
    tpu.vector_store %arg4[%c0_9, %c0_10], %19 {strides = array<i32>} : memref<46x64xbf16, #tpu.memory_space<vmem>>, vector<46x64xbf16>,
    return
  }
  func.func @transform_0(%arg0: i32) -> (i32, i32) {
    %c0_i32 = arith.constant 0 : i32
    %c0_i32_0 = arith.constant 0 : i32
    return %arg0, %c0_i32 : i32, i32
  }
  func.func @transform_1(%arg0: i32) -> (i32, i32) {
    %c0_i32 = arith.constant 0 : i32
    %c0_i32_0 = arith.constant 0 : i32
    %c0_i32_1 = arith.constant 0 : i32
    return %c0_i32, %c0_i32_0 : i32, i32
  }
  func.func @transform_2(%arg0: i32) -> (i32, i32) {
    %c0_i32 = arith.constant 0 : i32
    %c0_i32_0 = arith.constant 0 : i32
    %c0_i32_1 = arith.constant 0 : i32
    return %c0_i32, %c0_i32_0 : i32, i32
  }
  func.func @transform_3(%arg0: i32) -> (i32, i32) {
    %c0_i32 = arith.constant 0 : i32
    %c0_i32_0 = arith.constant 0 : i32
    return %arg0, %c0_i32 : i32, i32
  }
}

module attributes {stable_mosaic.version = 11 : i64} {
  func.func @_linear_add_ln_kernel(%arg0: i32, %arg1: memref<46x64xbf16, #tpu.memory_space<vmem>>, %arg2: memref<64x32xbf16, #tpu.memory_space<vmem>>, %arg3: memref<1x32xf32, #tpu.memory_space<vmem>>, %arg4: memref<46x32xbf16, #tpu.memory_space<vmem>>, %arg5: memref<1x32xf32, #tpu.memory_space<vmem>>, %arg6: memref<1x32xf32, #tpu.memory_space<vmem>>, %arg7: memref<46x32xbf16, #tpu.memory_space<vmem>>) attributes {dimension_semantics = [#tpu.dimension_semantics<parallel>], iteration_bounds = array<i64: 1>, scalar_prefetch = 0 : i64, scratch_operands = 0 : i64, tpu.core_type = #tpu.core_type<tc>, window_params = [{transform_indices = @transform_0, window_bounds = array<i64: 46, 64>}, {pipeline_mode = #tpu.pipeline_mode<synchronous>, transform_indices = @transform_1, window_bounds = array<i64: 64, 32>}, {pipeline_mode = #tpu.pipeline_mode<synchronous>, transform_indices = @transform_2, window_bounds = array<i64: 1, 32>}, {transform_indices = @transform_3, window_bounds = array<i64: 46, 32>}, {pipeline_mode = #tpu.pipeline_mode<synchronous>, transform_indices = @transform_4, window_bounds = array<i64: 1, 32>}, {pipeline_mode = #tpu.pipeline_mode<synchronous>, transform_indices = @transform_5, window_bounds = array<i64: 1, 32>}, {transform_indices = @transform_6, window_bounds = array<i64: 46, 32>}]} {
    %c0 = arith.constant 0 : index
    %c0_0 = arith.constant 0 : index
    %0 = vector.load %arg1[%c0, %c0_0] : memref<46x64xbf16, #tpu.memory_space<vmem>>, vector<46x64xbf16>
    %c0_1 = arith.constant 0 : index
    %c0_2 = arith.constant 0 : index
    %1 = vector.load %arg2[%c0_1, %c0_2] : memref<64x32xbf16, #tpu.memory_space<vmem>>, vector<64x32xbf16>
    %cst = arith.constant dense<0.000000e+00> : vector<46x32xf32>
    %2 = tpu.matmul %0, %1, %cst {dimension_numbers = #tpu.dot_dimension_numbers<[1], [0], [0], [1], [0, 0, 1, 1], [], []>} : vector<46x64xbf16>, vector<64x32xbf16>, vector<46x32xf32> -> vector<46x32xf32>
    %c0_3 = arith.constant 0 : index
    %c0_4 = arith.constant 0 : index
    %3 = vector.load %arg3[%c0_3, %c0_4] : memref<1x32xf32, #tpu.memory_space<vmem>>, vector<1x32xf32>
    %4 = vector.broadcast %3 : vector<1x32xf32> to vector<46x32xf32>
    %5 = arith.addf %2, %4 : vector<46x32xf32>
    %c0_5 = arith.constant 0 : index
    %c0_6 = arith.constant 0 : index
    %6 = vector.load %arg4[%c0_5, %c0_6] : memref<46x32xbf16, #tpu.memory_space<vmem>>, vector<46x32xbf16>
    %7 = arith.extf %6 : vector<46x32xbf16> to vector<46x32xf32>
    %8 = arith.addf %5, %7 : vector<46x32xf32>
    %cst_7 = arith.constant dense<0.000000e+00> : vector<46xf32>
    %9 = vector.multi_reduction <add>, %8, %cst_7 [1] : vector<46x32xf32> to vector<46xf32>
    %10 = vector.shape_cast %9 : vector<46xf32> to vector<46x1xf32>
    %cst_8 = arith.constant 3.200000e+01 : f32
    %11 = vector.broadcast %cst_8 : f32 to vector<46x1xf32>
    %12 = arith.divf %10, %11 : vector<46x1xf32>
    %13 = vector.broadcast %12 : vector<46x1xf32> to vector<46x32xf32>
    %14 = arith.subf %8, %13 : vector<46x32xf32>
    %15 = arith.mulf %14, %14 : vector<46x32xf32>
    %cst_9 = arith.constant dense<0.000000e+00> : vector<46xf32>
    %16 = vector.multi_reduction <add>, %15, %cst_9 [1] : vector<46x32xf32> to vector<46xf32>
    %17 = vector.shape_cast %16 : vector<46xf32> to vector<46x1xf32>
    %cst_10 = arith.constant 3.200000e+01 : f32
    %18 = vector.broadcast %cst_10 : f32 to vector<46x1xf32>
    %19 = arith.divf %17, %18 : vector<46x1xf32>
    %cst_11 = arith.constant 9.99999996E-13 : f32
    %20 = vector.broadcast %cst_11 : f32 to vector<46x1xf32>
    %21 = arith.addf %19, %20 : vector<46x1xf32>
    %22 = math.rsqrt %21 : vector<46x1xf32>
    %23 = vector.broadcast %22 : vector<46x1xf32> to vector<46x32xf32>
    %24 = arith.mulf %14, %23 : vector<46x32xf32>
    %c0_12 = arith.constant 0 : index
    %c0_13 = arith.constant 0 : index
    %25 = vector.load %arg5[%c0_12, %c0_13] : memref<1x32xf32, #tpu.memory_space<vmem>>, vector<1x32xf32>
    %26 = vector.broadcast %25 : vector<1x32xf32> to vector<46x32xf32>
    %27 = arith.mulf %24, %26 : vector<46x32xf32>
    %c0_14 = arith.constant 0 : index
    %c0_15 = arith.constant 0 : index
    %28 = vector.load %arg6[%c0_14, %c0_15] : memref<1x32xf32, #tpu.memory_space<vmem>>, vector<1x32xf32>
    %29 = vector.broadcast %28 : vector<1x32xf32> to vector<46x32xf32>
    %30 = arith.addf %27, %29 : vector<46x32xf32>
    %31 = arith.truncf %30 : vector<46x32xf32> to vector<46x32xbf16>
    %c0_16 = arith.constant 0 : index
    %c0_17 = arith.constant 0 : index
    %32 = vector.load %arg7[%c0_16, %c0_17] : memref<46x32xbf16, #tpu.memory_space<vmem>>, vector<46x32xbf16>
    tpu.vector_store %arg7[%c0_16, %c0_17], %31 {strides = array<i32>} : memref<46x32xbf16, #tpu.memory_space<vmem>>, vector<46x32xbf16>,
    return
  }
  func.func @transform_0(%arg0: i32) -> (i32, i32) {
    %c0_i32 = arith.constant 0 : i32
    %c0_i32_0 = arith.constant 0 : i32
    return %arg0, %c0_i32 : i32, i32
  }
  func.func @transform_1(%arg0: i32) -> (i32, i32) {
    %c0_i32 = arith.constant 0 : i32
    %c0_i32_0 = arith.constant 0 : i32
    %c0_i32_1 = arith.constant 0 : i32
    return %c0_i32, %c0_i32_0 : i32, i32
  }
  func.func @transform_2(%arg0: i32) -> (i32, i32) {
    %c0_i32 = arith.constant 0 : i32
    %c0_i32_0 = arith.constant 0 : i32
    %c0_i32_1 = arith.constant 0 : i32
    return %c0_i32, %c0_i32_0 : i32, i32
  }
  func.func @transform_3(%arg0: i32) -> (i32, i32) {
    %c0_i32 = arith.constant 0 : i32
    %c0_i32_0 = arith.constant 0 : i32
    return %arg0, %c0_i32 : i32, i32
  }
  func.func @transform_4(%arg0: i32) -> (i32, i32) {
    %c0_i32 = arith.constant 0 : i32
    %c0_i32_0 = arith.constant 0 : i32
    %c0_i32_1 = arith.constant 0 : i32
    return %c0_i32, %c0_i32_0 : i32, i32
  }
  func.func @transform_5(%arg0: i32) -> (i32, i32) {
    %c0_i32 = arith.constant 0 : i32
    %c0_i32_0 = arith.constant 0 : i32
    %c0_i32_1 = arith.constant 0 : i32
    return %c0_i32, %c0_i32_0 : i32, i32
  }
  func.func @transform_6(%arg0: i32) -> (i32, i32) {
    %c0_i32 = arith.constant 0 : i32
    %c0_i32_0 = arith.constant 0 : i32
    return %arg0, %c0_i32 : i32, i32
  }
}

module attributes {stable_mosaic.version = 11 : i64} {
  func.func @_cls_head_kernel(%arg0: i32, %arg1: memref<1x23x32xbf16, #tpu.memory_space<vmem>>, %arg2: memref<4x32xbf16, #tpu.memory_space<vmem>>, %arg3: memref<4x1xf32, #tpu.memory_space<vmem>>, %arg4: memref<1x4x11xf32, #tpu.memory_space<vmem>>) attributes {dimension_semantics = [#tpu.dimension_semantics<parallel>], iteration_bounds = array<i64: 2>, scalar_prefetch = 0 : i64, scratch_operands = 0 : i64, tpu.core_type = #tpu.core_type<tc>, window_params = [{transform_indices = @transform_0, window_bounds = array<i64: 1, 23, 32>}, {pipeline_mode = #tpu.pipeline_mode<synchronous>, transform_indices = @transform_1, window_bounds = array<i64: 4, 32>}, {pipeline_mode = #tpu.pipeline_mode<synchronous>, transform_indices = @transform_2, window_bounds = array<i64: 4, 1>}, {transform_indices = @transform_3, window_bounds = array<i64: 1, 4, 11>}]} {
    %c0 = arith.constant 0 : index
    %c6 = arith.constant 6 : index
    %c0_0 = arith.constant 0 : index
    %0 = vector.load %arg1[%c0, %c6, %c0_0] : memref<1x23x32xbf16, #tpu.memory_space<vmem>>, vector<1x11x32xbf16>
    %1 = vector.shape_cast %0 : vector<1x11x32xbf16> to vector<11x32xbf16>
    %c0_1 = arith.constant 0 : index
    %c0_2 = arith.constant 0 : index
    %2 = vector.load %arg2[%c0_1, %c0_2] : memref<4x32xbf16, #tpu.memory_space<vmem>>, vector<4x32xbf16>
    %cst = arith.constant dense<0.000000e+00> : vector<4x11xf32>
    %3 = tpu.matmul %2, %1, %cst {dimension_numbers = #tpu.dot_dimension_numbers<[1], [1], [0], [0], [0, 0, 1, 0], [], []>} : vector<4x32xbf16>, vector<11x32xbf16>, vector<4x11xf32> -> vector<4x11xf32>
    %c0_3 = arith.constant 0 : index
    %c0_4 = arith.constant 0 : index
    %4 = vector.load %arg3[%c0_3, %c0_4] : memref<4x1xf32, #tpu.memory_space<vmem>>, vector<4x1xf32>
    %5 = vector.broadcast %4 : vector<4x1xf32> to vector<4x11xf32>
    %6 = arith.addf %3, %5 : vector<4x11xf32>
    %c0_5 = arith.constant 0 : index
    %c0_6 = arith.constant 0 : index
    %c0_7 = arith.constant 0 : index
    %7 = vector.load %arg4[%c0_5, %c0_6, %c0_7] : memref<1x4x11xf32, #tpu.memory_space<vmem>>, vector<1x4x11xf32>
    %8 = vector.shape_cast %7 : vector<1x4x11xf32> to vector<4x11xf32>
    %9 = vector.shape_cast %6 : vector<4x11xf32> to vector<1x4x11xf32>
    tpu.vector_store %arg4[%c0_5, %c0_6, %c0_7], %9 {strides = array<i32>} : memref<1x4x11xf32, #tpu.memory_space<vmem>>, vector<1x4x11xf32>,
    return
  }
  func.func @transform_0(%arg0: i32) -> (i32, i32, i32) {
    %c0_i32 = arith.constant 0 : i32
    %c0_i32_0 = arith.constant 0 : i32
    %c0_i32_1 = arith.constant 0 : i32
    return %arg0, %c0_i32, %c0_i32_0 : i32, i32, i32
  }
  func.func @transform_1(%arg0: i32) -> (i32, i32) {
    %c0_i32 = arith.constant 0 : i32
    %c0_i32_0 = arith.constant 0 : i32
    %c0_i32_1 = arith.constant 0 : i32
    return %c0_i32, %c0_i32_0 : i32, i32
  }
  func.func @transform_2(%arg0: i32) -> (i32, i32) {
    %c0_i32 = arith.constant 0 : i32
    %c0_i32_0 = arith.constant 0 : i32
    %c0_i32_1 = arith.constant 0 : i32
    return %c0_i32, %c0_i32_0 : i32, i32
  }
  func.func @transform_3(%arg0: i32) -> (i32, i32, i32) {
    %c0_i32 = arith.constant 0 : i32
    %c0_i32_0 = arith.constant 0 : i32
    %c0_i32_1 = arith.constant 0 : i32
    return %arg0, %c0_i32, %c0_i32_0 : i32, i32, i32
  }
}

</mosaic_0001>

<bundles_post_ra>
// kernel: splicebert_for_token_cls_forward.12
= control target key start
LH: loop header
LB: loop body
LE: loop exit
PB: predicated region body
PF: predicated region fallthrough
CT: control target
= control target key end

     0   :  { %8 = vsyncpa [#allocation3], 0  ;;  %s458_s0 = inlined_call_operand.hbm [shape: f32[46,32], index: 0, kind: input, shape index: {}]   ;;  %s459_s1 = inlined_call_operand.hbm [shape: f32[1,32], index: 1, kind: input, shape index: {}]   ;;  %s460_s2 = inlined_call_operand.hbm [shape: f32[1,32], index: 2, kind: input, shape index: {}]   ;;  %s461_s3 = inlined_call_operand.hbm [shape: bf16[46,32], index: 3, kind: output, shape index: {}]  }
   0x1   :  { %9 = vsyncpa [#allocation6], 0 }
   0x2   :  { %10 = vsyncpa [#allocation4], 0  ;;  %s343_s12 = smov [#allocation5]   ;;  %s344_s14 = smov [#allocation2]  }
   0x3   :  { %s29_s13 = sshll.u32 %s343_s12, 4  ;;  %s16_s15 = sshll.u32 %s344_s14, 4  ;;  %s30_s13 = int_to_ptr.vmem [resolvable:$true] %s29_s13  ;;  %s371_s15 = int_to_ptr.vmem [resolvable:$true] %s16_s15 }
   0x4   :  { %s249_s18 = scalar_lea.hbm %s459_s1, 16 }
   0x5   :  { %p250_p0 = scmp.ne.s32.totalorder %s459_s1, %s249_s18  ;;  %p253_p1 = scmp.lt.u32.totalorder %s249_s18, %s459_s1 }
   0x7   :  { %p255_p2 = pnand %p253_p1, %p250_p0 }
   0x9   :  { %258 = shalt.err (!%p255_p2)
}
   0xa   :  { %s259_s23 = scalar_lea.vmem %s30_s13, 16  ;;  %s263_s24 = scalar_lea.vmem %s30_s13, 32 }
   0xb   :  { %p260_p3 = scmp.ne.s32.totalorder %s30_s13, %s259_s23  ;;  %p264_p4 = scmp.lt.s32.totalorder %s30_s13, %s30_s13 }
   0xc   :  { %p265_p5 = scmp.lt.s32.totalorder %s263_s24, %s259_s23 }
   0xe   :  { %p266_p6 = por %p265_p5, %p264_p4 }
  0x10   :  { %p267_p7 = pnand %p266_p6, %p260_p3 }
  0x12   :  { %270 = shalt.err (!%p267_p7)
}
  0x13   :  { %32 = dma.hbm_to_vmem [thread:$0]  %s459_s1, 16, %s30_s13, [#allocation6]  }
  0x14   :  { %s271_s29 = scalar_lea.hbm %s458_s0, 768 }
  0x15   :  { %p272_p8 = scmp.ne.s32.totalorder %s458_s0, %s271_s29  ;;  %p275_p9 = scmp.lt.u32.totalorder %s271_s29, %s458_s0 }
  0x17   :  { %p277_p10 = pnand %p275_p9, %p272_p8 }
  0x19   :  { %280 = shalt.err (!%p277_p10)
}
  0x1a   :  { %s281_s7 = scalar_lea.vmem %s371_s15, 768  ;;  %p286_p12 = scmp.lt.s32.totalorder %s371_s15, %s371_s15 }
  0x1b   :  { %p282_p11 = scmp.ne.s32.totalorder %s371_s15, %s281_s7  ;;  %p287_p13 = scmp.lt.s32.totalorder %s281_s7, %s281_s7 }
  0x1d   :  { %p288_p0 = por %p287_p13, %p286_p12 }
  0x1f   :  { %p289_p1 = pnand %p288_p0, %p282_p11 }
  0x21   :  { %292 = shalt.err (!%p289_p1)
}
  0x22   :  { %s345_s1 = smov 128   ;;  %s346_s8 = smov 8  }
  0x23   :  { %22 = dma.hbm_to_vmem [thread:$0]  %s458_s0, 768, %s371_s15, [#allocation3], %s345_s1, %s345_s1, %s346_s8  }
  0x24   :  { %s347_s11 = smov [#allocation7]   ;;  %s293_s16 = scalar_lea.hbm %s460_s2, 16 }
  0x25   :  { %s39_s12 = sshll.u32 %s347_s11, 4  ;;  %p294_p2 = scmp.ne.s32.totalorder %s460_s2, %s293_s16  ;;  %s40_s12 = int_to_ptr.vmem [resolvable:$true] %s39_s12 }
  0x26   :  { %p297_p3 = scmp.lt.u32.totalorder %s293_s16, %s460_s2 }
  0x28   :  { %p299_p4 = pnand %p297_p3, %p294_p2 }
  0x2a   :  { %302 = shalt.err (!%p299_p4)
}
  0x2b   :  { %s303_s21 = scalar_lea.vmem %s40_s12, 16  ;;  %s307_s0 = scalar_lea.vmem %s40_s12, 32 }
  0x2c   :  { %p304_p5 = scmp.ne.s32.totalorder %s40_s12, %s303_s21  ;;  %p308_p6 = scmp.lt.s32.totalorder %s40_s12, %s40_s12 }
  0x2d   :  { %p309_p7 = scmp.lt.s32.totalorder %s307_s0, %s303_s21 }
  0x2f   :  { %p310_p8 = por %p309_p7, %p308_p6 }
  0x31   :  { %p311_p9 = pnand %p310_p8, %p304_p5 }
  0x33   :  { %314 = shalt.err (!%p311_p9)
}
  0x34   :  { %42 = dma.hbm_to_vmem [thread:$0]  %s460_s2, 16, %s40_s12, [#allocation6]  }
  0x35   :  { %337 = dma.done.wait [#allocation3], 768  }
  0x36   :  { %338 = vsyncadd [#allocation3], 4294966528 }
  0x37   :  { %339 = dma.done.wait [#allocation6], 32  }
  0x38   :  { %340 = vsyncadd [#allocation6], 4294967264  ;;  %vm58_vm0 = vcmask 261120   ;;  %v52_v0 = vld [vmem:[#allocation2] sm:$0xff]  ;;  %v54_v1 = vld [vmem:[#allocation2 + $0x10] sm:$0xff]  ;;  %vm74_vm1 = vcmask 259072  }
  0x39   :  { %v53_v2 = vld [vmem:[#allocation2 + $0x8] sm:$0xff]  ;;  %v59_v3 = vsel %vm58_vm0, %v52_v0, 0.0  ;;  %v65_v4 = vsel %vm58_vm0, %v54_v1, 0.0  ;;  %v55_v5 = vld [vmem:[#allocation2 + $0x18] sm:$0xff]  ;;  %v56_v8 = vld [vmem:[#allocation2 + $0x20] sm:$0xff]  ;;  %vm189_vm2 = vcmask 257024  }
  0x3a   :  { %60 = vadd.xlane.f32.xlu0 %v59_v3  ;;  %66 = vadd.xlane.f32.xlu1 %v65_v4  ;;  %v62_v6 = vsel %vm58_vm0, %v53_v2, 0.0  ;;  %v68_v7 = vsel %vm58_vm0, %v55_v5, 0.0  ;;  %v57_v9 = vld [vmem:[#allocation2 + $0x28] sm:$0x3f]  ;;  %v71_v10 = vsel %vm58_vm0, %v56_v8, 0.0  ;;  %s348_s2 = smov [#allocation8]  }
  0x3b   :  { %v75_v11 = vsel %vm74_vm1, %v57_v9, 0.0  ;;  %v215_v60 = vld [vmem:[#allocation5] ss:$0 sm:$0xff]  ;;  %v216_v63 = vld [vmem:[#allocation7] ss:$0 sm:$0xff]  ;;  %s202_s23 = sshll.u32 %s348_s2, 4  ;;  %s203_s23 = int_to_ptr.vmem [resolvable:$true] %s202_s23 }
  0x3c   :  { %vm195_vm3 = vcmask 256000   ;;  %s315_s24 = scalar_lea.vmem %s203_s23, 384  ;;  %p320_p11 = scmp.lt.s32.totalorder %s203_s23, %s203_s23 }
  0x3d   :  { %p316_p10 = scmp.ne.s32.totalorder %s203_s23, %s315_s24  ;;  %p321_p12 = scmp.lt.s32.totalorder %s315_s24, %s315_s24 }
  0x3e   :  { %63 = vadd.xlane.f32.xlu0 %v62_v6  ;;  %69 = vadd.xlane.f32.xlu1 %v68_v7 }
  0x3f   :  { %p322_p13 = por %p321_p12, %p320_p11 }
  0x41   :  { %p323_p0 = pnand %p322_p13, %p316_p10 }
  0x42   :  { %72 = vadd.xlane.f32.xlu0 %v71_v10  ;;  %76 = vadd.xlane.f32.xlu1 %v75_v11 }
  0xc7   :  { %v61_v12 = vpop.xlane.xlu0 %60  ;;  %v67_v13 = vpop.xlane.xlu1 %66 }
  0xc8   :  { %v79_v14 = vmul.f32 0.03125, %v61_v12  ;;  %v81_v15 = vmul.f32 0.03125, %v67_v13 }
  0xca   :  { %v85_v16 = vsub.f32 %v52_v0, %v79_v14  ;;  %v420_v17 = vsub.f32 %v54_v1, %v81_v15 }
  0xcb   :  { %v64_v18 = vpop.xlane.xlu0 %63  ;;  %v70_v19 = vpop.xlane.xlu1 %69 }
  0xcc   :  { %v80_v20 = vmul.f32 0.03125, %v64_v18  ;;  %v82_v21 = vmul.f32 0.03125, %v70_v19  ;;  %v91_v22 = vmul.f32 %v85_v16, %v85_v16  ;;  %v93_v23 = vmul.f32 %v420_v17, %v420_v17 }
  0xce   :  { %v86_v24 = vsub.f32 %v53_v2, %v80_v20  ;;  %v424_v25 = vsub.f32 %v55_v5, %v82_v21  ;;  %v97_v26 = vsel %vm58_vm0, %v91_v22, 0.0  ;;  %v103_v29 = vsel %vm58_vm0, %v93_v23, 0.0 }
  0xcf   :  { %98 = vadd.xlane.f32.xlu0 %v97_v26  ;;  %v73_v27 = vpop.xlane.xlu0 %72  ;;  %v77_v28 = vpop.xlane.xlu1 %76 }
  0xd0   :  { %v83_v30 = vmul.f32 0.03125, %v73_v27  ;;  %v84_v31 = vmul.f32 0.03125, %v77_v28  ;;  %v92_v32 = vmul.f32 %v86_v24, %v86_v24  ;;  %v94_v33 = vmul.f32 %v424_v25, %v424_v25 }
  0xd2   :  { %v89_v34 = vsub.f32 %v56_v8, %v83_v30  ;;  %v430_v35 = vsub.f32 %v57_v9, %v84_v31  ;;  %v100_v36 = vsel %vm58_vm0, %v92_v32, 0.0  ;;  %v106_v37 = vsel %vm58_vm0, %v94_v33, 0.0 }
  0xd3   :  { %104 = vadd.xlane.f32.xlu0 %v103_v29  ;;  %101 = vadd.xlane.f32.xlu1 %v100_v36 }
  0xd4   :  { %v95_v38 = vmul.f32 %v89_v34, %v89_v34  ;;  %v96_v39 = vmul.f32 %v430_v35, %v430_v35 }
  0xd6   :  { %v109_v40 = vsel %vm58_vm0, %v95_v38, 0.0  ;;  %v112_v41 = vsel %vm74_vm1, %v96_v39, 0.0 }
  0xd7   :  { %107 = vadd.xlane.f32.xlu1 %v106_v37  ;;  %110 = vadd.xlane.f32.xlu0 %v109_v40 }
  0xdb   :  { %113 = vadd.xlane.f32.xlu1 %v112_v41 }
 0x15c   :  { %v99_v42 = vpop.xlane.xlu0 %98 }
 0x15d   :  { %v115_v43 = vmul.f32 0.03125, %v99_v42 }
 0x15f   :  { %v121_v44 = vadd.f32 1e-12, %v115_v43 }
 0x160   :  { %v102_v45 = vpop.xlane.xlu1 %101  ;;  %v105_v46 = vpop.xlane.xlu0 %104 }
 0x161   :  { %237 = vrsqrt.f32 %v121_v44  ;;  %v116_v47 = vmul.f32 0.03125, %v102_v45  ;;  %v117_v48 = vmul.f32 0.03125, %v105_v46 }
 0x163   :  { %v122_v49 = vadd.f32 1e-12, %v116_v47  ;;  %v123_v50 = vadd.f32 1e-12, %v117_v48 }
 0x164   :  { %v108_v51 = vpop.xlane.xlu1 %107  ;;  %v111_v52 = vpop.xlane.xlu0 %110 }
 0x165   :  { %239 = vrsqrt.f32 %v122_v49  ;;  %v118_v53 = vmul.f32 0.03125, %v108_v51  ;;  %v119_v54 = vmul.f32 0.03125, %v111_v52 }
 0x166   :  { %241 = vrsqrt.f32 %v123_v50 }
 0x167   :  { %v124_v55 = vadd.f32 1e-12, %v118_v53  ;;  %v125_v56 = vadd.f32 1e-12, %v119_v54 }
 0x168   :  { %v114_v57 = vpop.xlane.xlu1 %113 }
 0x169   :  { %243 = vrsqrt.f32 %v124_v55  ;;  %v120_v58 = vmul.f32 0.03125, %v114_v57 }
 0x16a   :  { %245 = vrsqrt.f32 %v125_v56 }
 0x16b   :  { %v238_v59 = vpop.eup %237  ;;  %v126_v61 = vadd.f32 1e-12, %v120_v58 }
 0x16c   :  { %v133_v62 = vmul.f32 %v238_v59, %v85_v16 }
 0x16d   :  { %247 = vrsqrt.f32 %v126_v61 }
 0x16e   :  { %v146_v0 = vmul.f32 %v215_v60, %v133_v62 }
 0x16f   :  { %v240_v1 = vpop.eup %239 }
 0x170   :  { %v242_v2 = vpop.eup %241  ;;  %v159_v3 = vadd.f32 %v216_v63, %v146_v0  ;;  %v134_v4 = vmul.f32 %v240_v1, %v86_v24 }
 0x171   :  { %v135_v5 = vmul.f32 %v242_v2, %v420_v17 }
 0x172   :  { %v223_v6 = vpack.c.bf16 %v159_v3, %v159_v3  ;;  %v147_v7 = vmul.f32 %v215_v60, %v134_v4 }
 0x173   :  { %v244_v8 = vpop.eup %243  ;;  %v148_v9 = vmul.f32 %v215_v60, %v135_v5 }
 0x174   :  { %v246_v10 = vpop.eup %245  ;;  %190 = vst.msk [vmem:[#allocation8] sm:$0xf] %vm189_vm2, %v223_v6  ;;  %v160_v11 = vadd.f32 %v216_v63, %v147_v7  ;;  %v136_v12 = vmul.f32 %v244_v8, %v424_v25 }
 0x175   :  { %v161_v13 = vadd.f32 %v216_v63, %v148_v9  ;;  %v137_v14 = vmul.f32 %v246_v10, %v89_v34 }
 0x176   :  { %v224_v15 = vpack.c.bf16 %v160_v11, %v160_v11  ;;  %v149_v16 = vmul.f32 %v215_v60, %v136_v12 }
 0x177   :  { %v248_v18 = vpop.eup %247  ;;  %v225_v19 = vpack.c.bf16 %v161_v13, %v161_v13  ;;  %v150_v20 = vmul.f32 %v215_v60, %v137_v14 }
 0x178   :  { %191 = vst.msk [vmem:[#allocation8 + $0x4] sm:$0xf] %vm189_vm2, %v224_v15  ;;  %v162_v17 = vadd.f32 %v216_v63, %v149_v16  ;;  %v138_v21 = vmul.f32 %v248_v18, %v430_v35 }
 0x179   :  { %192 = vst.msk [vmem:[#allocation8 + $0x8] sm:$0xf] %vm189_vm2, %v225_v19  ;;  %v163_v22 = vadd.f32 %v216_v63, %v150_v20 }
 0x17a   :  { %v226_v23 = vpack.c.bf16 %v162_v17, %v162_v17  ;;  %v151_v24 = vmul.f32 %v215_v60, %v138_v21 }
 0x17b   :  { %v227_v26 = vpack.c.bf16 %v163_v22, %v163_v22 }
 0x17c   :  { %193 = vst.msk [vmem:[#allocation8 + $0xc] sm:$0xf] %vm189_vm2, %v226_v23  ;;  %v164_v25 = vadd.f32 %v216_v63, %v151_v24 }
 0x17d   :  { %194 = vst.msk [vmem:[#allocation8 + $0x10] sm:$0xf] %vm189_vm2, %v227_v26 }
 0x17e   :  { %v228_v27 = vpack.c.bf16 %v164_v25, %v164_v25 }
 0x180   :  { %196 = vst.msk [vmem:[#allocation8 + $0x14] sm:$0x7] %vm195_vm3, %v228_v27 }
 0x181   :  { %326 = shalt.err (!%p323_p0)
}
 0x182   :  { %s327_s27 = scalar_lea.hbm %s461_s3, 384 }
 0x183   :  { %p328_p1 = scmp.ne.s32.totalorder %s461_s3, %s327_s27  ;;  %p331_p2 = scmp.lt.u32.totalorder %s327_s27, %s461_s3 }
 0x185   :  { %p333_p3 = pnand %p331_p2, %p328_p1 }
 0x187   :  { %336 = shalt.err (!%p333_p3)
}
 0x188   :  { %s349_s5 = smov 64   ;;  %s350_s6 = smov 4  }
 0x189   :  { %208 = dma.vmem_to_hbm [thread:$0]  %s203_s23, 384, %s461_s3, [#allocation4], %s349_s5, %s349_s5, %s350_s6  }
 0x18a   :  { %341 = dma.done.wait [#allocation4], 384  }
 0x18b   :  { %342 = vsyncadd [#allocation4], 4294966912 }
 0x18c   :  { %212 = vsyncpa [#allocation3], 1 }
 0x18d   :  { %213 = vsyncpa [#allocation6], 1 }
 0x18e   :  { %214 = vsyncpa [#allocation4], 1 }

// kernel: splicebert_for_token_cls_forward.13
= control target key start
LH: loop header
LB: loop body
LE: loop exit
PB: predicated region body
PF: predicated region fallthrough
CT: control target
= control target key end

     0   :  { %8 = vsyncpa [#allocation3], 0  ;;  %s469_s0 = inlined_call_operand.hbm [shape: bf16[46,32], index: 0, kind: input, shape index: {}]   ;;  %s470_s1 = inlined_call_operand.hbm [shape: bf16[32,96], index: 1, kind: input, shape index: {}]   ;;  %s471_s2 = inlined_call_operand.hbm [shape: f32[1,96], index: 2, kind: input, shape index: {}]   ;;  %s472_s3 = inlined_call_operand.hbm [shape: bf16[46,96], index: 3, kind: output, shape index: {}]  }
   0x1   :  { %9 = vsyncpa [#allocation6], 0 }
   0x2   :  { %10 = vsyncpa [#allocation4], 0  ;;  %s369_s12 = smov [#allocation5]   ;;  %s370_s14 = smov [#allocation2]  }
   0x3   :  { %s28_s13 = sshll.u32 %s369_s12, 4  ;;  %s16_s15 = sshll.u32 %s370_s14, 4  ;;  %s29_s13 = int_to_ptr.vmem [resolvable:$true] %s28_s13  ;;  %s397_s15 = int_to_ptr.vmem [resolvable:$true] %s16_s15 }
   0x4   :  { %s275_s18 = scalar_lea.hbm %s470_s1, 256 }
   0x5   :  { %p276_p0 = scmp.ne.s32.totalorder %s470_s1, %s275_s18  ;;  %p279_p1 = scmp.lt.u32.totalorder %s275_s18, %s470_s1 }
   0x7   :  { %p281_p2 = pnand %p279_p1, %p276_p0 }
   0x9   :  { %284 = shalt.err (!%p281_p2)
}
   0xa   :  { %s285_s23 = scalar_lea.vmem %s29_s13, 256  ;;  %p290_p4 = scmp.lt.s32.totalorder %s29_s13, %s29_s13 }
   0xb   :  { %p286_p3 = scmp.ne.s32.totalorder %s29_s13, %s285_s23  ;;  %p291_p5 = scmp.lt.s32.totalorder %s285_s23, %s285_s23 }
   0xd   :  { %p292_p6 = por %p291_p5, %p290_p4 }
   0xf   :  { %p293_p7 = pnand %p292_p6, %p286_p3 }
  0x11   :  { %296 = shalt.err (!%p293_p7)
}
  0x12   :  { %s371_s24 = smov 64   ;;  %s372_s25 = smov 4  }
  0x13   :  { %34 = dma.hbm_to_vmem [thread:$0]  %s470_s1, 256, %s29_s13, [#allocation6], %s371_s24, %s371_s24, %s372_s25  }
  0x14   :  { %s297_s30 = scalar_lea.hbm %s469_s0, 384 }
  0x15   :  { %p298_p8 = scmp.ne.s32.totalorder %s469_s0, %s297_s30  ;;  %p301_p9 = scmp.lt.u32.totalorder %s297_s30, %s469_s0 }
  0x17   :  { %p303_p10 = pnand %p301_p9, %p298_p8 }
  0x19   :  { %306 = shalt.err (!%p303_p10)
}
  0x1a   :  { %s307_s8 = scalar_lea.vmem %s397_s15, 384  ;;  %p312_p12 = scmp.lt.s32.totalorder %s397_s15, %s397_s15 }
  0x1b   :  { %p308_p11 = scmp.ne.s32.totalorder %s397_s15, %s307_s8  ;;  %p313_p13 = scmp.lt.s32.totalorder %s307_s8, %s307_s8 }
  0x1d   :  { %p314_p0 = por %p313_p13, %p312_p12 }
  0x1f   :  { %p315_p1 = pnand %p314_p0, %p308_p11 }
  0x21   :  { %318 = shalt.err (!%p315_p1)
}
  0x22   :  { %22 = dma.hbm_to_vmem [thread:$0]  %s469_s0, 384, %s397_s15, [#allocation3], %s371_s24, %s371_s24, %s372_s25  }
  0x23   :  { %s373_s10 = smov [#allocation7]   ;;  %s319_s14 = scalar_lea.hbm %s471_s2, 16 }
  0x24   :  { %s41_s11 = sshll.u32 %s373_s10, 4  ;;  %p320_p2 = scmp.ne.s32.totalorder %s471_s2, %s319_s14  ;;  %s42_s11 = int_to_ptr.vmem [resolvable:$true] %s41_s11 }
  0x25   :  { %p323_p3 = scmp.lt.u32.totalorder %s319_s14, %s471_s2 }
  0x27   :  { %p325_p4 = pnand %p323_p3, %p320_p2 }
  0x29   :  { %328 = shalt.err (!%p325_p4)
}
  0x2a   :  { %s329_s20 = scalar_lea.vmem %s42_s11, 16  ;;  %s333_s0 = scalar_lea.vmem %s42_s11, 32 }
  0x2b   :  { %p330_p5 = scmp.ne.s32.totalorder %s42_s11, %s329_s20  ;;  %p334_p6 = scmp.lt.s32.totalorder %s42_s11, %s42_s11 }
  0x2c   :  { %p335_p7 = scmp.lt.s32.totalorder %s333_s0, %s329_s20 }
  0x2e   :  { %p336_p8 = por %p335_p7, %p334_p6 }
  0x30   :  { %p337_p9 = pnand %p336_p8, %p330_p5 }
  0x32   :  { %340 = shalt.err (!%p337_p9)
}
  0x33   :  { %44 = dma.hbm_to_vmem [thread:$0]  %s471_s2, 16, %s42_s11, [#allocation6]  }
  0x34   :  { %363 = dma.done.wait [#allocation3], 384  }
  0x35   :  { %364 = vsyncadd [#allocation3], 4294966912 }
  0x36   :  { %365 = dma.done.wait [#allocation6], 272  }
  0x37   :  { %366 = vsyncadd [#allocation6], 4294967024  ;;  %v374_v0 = vmov 0.0   ;;  %vm375_vm0 = vmmov 0   ;;  %v270_v1 = vld [vmem:[#allocation5] sm:$0xff]   ;;  %v271_v2 = vld [vmem:[#allocation5 + $0x8] sm:$0xff]  }
  0x38   :  { %258 = vmatprep.subr.bf16.mxu1 %v374_v0  ;;  %242 = vmatprep.subr.bf16.mxu0 %v374_v0  ;;  %v272_v3 = vld [vmem:[#allocation2 + $0x8] sm:$0xff]   ;;  %v273_v4 = vld [vmem:[#allocation2] sm:$0xff]   ;;  %vm99_vm1 = vcmask 261120   ;;  %v274_v5 = vld [vmem:[#allocation2 + $0x10] sm:$0x7f]   ;;  %vm190_vm2 = vcmask 781312  }
  0x39   :  { %250 = vmatprep.mubr.msk.bf16.mxu1 %vm375_vm0, %v374_v0  ;;  %246 = vmatprep.mubr.msk.bf16.mxu0 %vm375_vm0, %v374_v0  ;;  %v216_v6 = vld [vmem:[#allocation7] ss:$0 sm:$0xff]  ;;  %s376_s2 = smov [#allocation8]   ;;  %vm196_vm3 = vcmask 780288  }
  0x3a   :  { %260 = vmatpush3.bf16.msra.mxu1 %v270_v1  ;;  %243 = vmatpush3.bf16.msra.mxu0 %v270_v1  ;;  %s203_s22 = sshll.u32 %s376_s2, 4  ;;  %s204_s22 = int_to_ptr.vmem [resolvable:$true] %s203_s22 }
  0x3b   :  { %259 = vmatprep.subr.bf16.mxu1 %v374_v0  ;;  %244 = vmatprep.subr.bf16.mxu0 %v374_v0  ;;  %s341_s23 = scalar_lea.vmem %s204_s22, 384  ;;  %p346_p11 = scmp.lt.s32.totalorder %s204_s22, %s204_s22 }
  0x3c   :  { %p342_p10 = scmp.ne.s32.totalorder %s204_s22, %s341_s23  ;;  %p347_p12 = scmp.lt.s32.totalorder %s341_s23, %s341_s23 }
  0x3e   :  { %261 = vmatpush3.bf16.msra.mxu1 %v271_v2  ;;  %245 = vmatpush3.bf16.msra.mxu0 %v271_v2  ;;  %p348_p13 = por %p347_p12, %p346_p11 }
  0x40   :  { %p349_p0 = pnand %p348_p13, %p342_p10 }
  0x41   :  { %251 = vmatmul.mubr.msk.bf16.vlgmr.msra.gmra.mrb[0].mxu1 %vm99_vm1, %v272_v3  ;;  %247 = vmatmul.mubr.msk.bf16.vlgmr.msra.gmra.mrb[0].mxu0 %vm99_vm1, %v273_v4 }
  0x42   :  { %254 = vmatprep.mubr.msk.bf16.mxu1 %vm375_vm0, %v374_v0 }
  0x49   :  { %255 = vmatmul.mubr.msk.bf16.gmra.mrb[4].mxu1 %vm99_vm1, %v274_v5 }
 0x114   :  { %v151_v7 = vpop.f32.mrb[0].mxu1  ;;  %v143_v8 = vpop.f32.mrb[0].mxu0 }
 0x115   :  { %v152_v9 = vadd.f32 %v216_v6, %v151_v7  ;;  %v252_v10 = vpop.f32.mrb[1].mxu1  ;;  %v144_v11 = vadd.f32 %v216_v6, %v143_v8  ;;  %v248_v12 = vpop.f32.mrb[1].mxu0 }
 0x116   :  { %v154_v13 = vpop.f32.mrb[2].mxu1  ;;  %v146_v14 = vpop.f32.mrb[2].mxu0 }
 0x117   :  { %v233_v15 = vpack.c.bf16 %v152_v9, %v152_v9  ;;  %v155_v16 = vadd.f32 %v216_v6, %v154_v13  ;;  %v253_v17 = vpop.f32.mrb[3].mxu1  ;;  %v231_v18 = vpack.c.bf16 %v144_v11, %v144_v11  ;;  %v147_v19 = vadd.f32 %v216_v6, %v146_v14  ;;  %v249_v20 = vpop.f32.mrb[3].mxu0 }
 0x119   :  { %193 = vst.msk [vmem:[#allocation8 + $0x8] sm:$0xf] %vm190_vm2, %v233_v15  ;;  %v234_v21 = vpack.c.bf16 %v155_v16, %v155_v16  ;;  %191 = vst.msk [vmem:[#allocation8] sm:$0xf] %vm190_vm2, %v231_v18  ;;  %v232_v22 = vpack.c.bf16 %v147_v19, %v147_v19 }
 0x11b   :  { %194 = vst.msk [vmem:[#allocation8 + $0xc] sm:$0xf] %vm190_vm2, %v234_v21  ;;  %192 = vst.msk [vmem:[#allocation8 + $0x4] sm:$0xf] %vm190_vm2, %v232_v22 }
 0x11c   :  { %v159_v23 = vpop.f32.mrb[4].mxu1 }
 0x11d   :  { %v160_v24 = vadd.f32 %v216_v6, %v159_v23  ;;  %v256_v25 = vpop.f32.mrb[5].mxu1 }
 0x11e   :  { %v162_v26 = vpop.f32.mrb[6].mxu1 }
 0x11f   :  { %v235_v27 = vpack.c.bf16 %v160_v24, %v160_v24  ;;  %v163_v28 = vadd.f32 %v216_v6, %v162_v26  ;;  %v257_v29 = vpop.f32.mrb[7].mxu1 }
 0x121   :  { %195 = vst.msk [vmem:[#allocation8 + $0x10] sm:$0xf] %vm190_vm2, %v235_v27  ;;  %v236_v30 = vpack.c.bf16 %v163_v28, %v163_v28 }
 0x123   :  { %197 = vst.msk [vmem:[#allocation8 + $0x14] sm:$0x7] %vm196_vm3, %v236_v30 }
 0x124   :  { %352 = shalt.err (!%p349_p0)
}
 0x125   :  { %s353_s28 = scalar_lea.hbm %s472_s3, 384 }
 0x126   :  { %p354_p1 = scmp.ne.s32.totalorder %s472_s3, %s353_s28  ;;  %p357_p2 = scmp.lt.u32.totalorder %s353_s28, %s472_s3 }
 0x128   :  { %p359_p3 = pnand %p357_p2, %p354_p1 }
 0x12a   :  { %362 = shalt.err (!%p359_p3)
}
 0x12b   :  { %209 = dma.vmem_to_hbm [thread:$0]  %s204_s22, 384, %s472_s3, [#allocation4], %s371_s24, %s371_s24, %s372_s25  }
 0x12c   :  { %367 = dma.done.wait [#allocation4], 384  }
 0x12d   :  { %368 = vsyncadd [#allocation4], 4294966912 }
 0x12e   :  { %213 = vsyncpa [#allocation3], 1 }
 0x12f   :  { %214 = vsyncpa [#allocation6], 1 }
 0x130   :  { %215 = vsyncpa [#allocation4], 1 }

// kernel: splicebert_for_token_cls_forward.14
= control target key start
LH: loop header
LB: loop body
LE: loop exit
PB: predicated region body
PF: predicated region fallthrough
CT: control target
= control target key end

     0   :  { %6 = vsyncpa [#allocation3], 0  ;;  %s1654_s0 = inlined_call_operand.hbm [shape: bf16[2,23,96], index: 0, kind: input, shape index: {}]   ;;  %s1655_s1 = inlined_call_operand.hbm [shape: bf16[2,23,32], index: 1, kind: output, shape index: {}]  }
   0x1   :  { %8 = vsyncpa [#allocation3 + $0x1], 0 }
   0x2   :  { %9 = vsyncpa [#allocation4], 0 }
   0x3   :  { %11 = vsyncpa [#allocation4 + $0x1], 0  ;;  %s1363_s6 = smov 0   ;;  %s1365_s7 = smov 0  }
   0x4   :  { %s1367_s8 = smov 0   ;;  %s1369_s9 = smov 0  }
   0x5 LB: > { %s1384_s10 = sadd.s32 4294967295, %s1331_s9   ;;  %s966_s11 = sadd.s32 4294967294, %s1331_s9   ;;  %s1331_s9 = sphi %s1369_s9, %s1667_s9   ;;  %s1327_s8 = sphi %s1367_s8, %s1666_s8   ;;  %s1323_s7 = sphi %s1365_s7, %s1665_s7   ;;  %s1319_s6 = sphi %s1363_s6, %s1664_s6  }
   0x6   : > { %s1388_s12 = sadd.s32 1, %s1331_s9   ;;  %s24_s13 = sadd.s32 1, %s1327_s8 }
   0x7   : > { %s21_s14 = ssub.s32 %s1331_s9, %s1388_s12  ;;  %p31_p0 = scmp.ne.s32.totalorder %s1327_s8, %s1323_s7 }
   0x8   : > { %p22_p1 = scmp.eq.s32.totalorder %s21_s14, 0  ;;  %p32_p2 = scmp.eq.s32.totalorder %s1331_s9, 0 }
   0x9   : > { %p37_p3 = scmp.ne.s32.totalorder %s1323_s7, %s1319_s6  ;;  %p38_p4 = scmp.eq.s32.totalorder %s1384_s10, 0 }
   0xa   : > { %s1400_s15 = scalar_select %p22_p1, %s1327_s8, %s24_s13  }
   0xb   : > { %p33_p5 = por %p32_p2, %p31_p0  ;;  %p1402_p6 = por %p38_p4, %p37_p3 }
   0xc   : > { %p61_p7 = scmp.eq.s32.totalorder %s1384_s10, 1  ;;  %p67_p8 = scmp.eq.s32.totalorder %s966_s11, 1 }
   0xd   : > { %p1118_p10 = scmp.lt.s32.totalorder %s1331_s9, 2  ;;  %s87_s19 = sand.u32 1, %s1327_s8  }
   0xe   : > { %p1409_p11 = por %p61_p7, %p31_p0  ;;  %p1413_p12 = por %p67_p8, %p37_p3 }
   0xf   : > { %s1103_s20 = smul.u32 192, %s1331_s9  ;;  %p1424_p13 = pnand %p1118_p10, %p33_p5 }
  0x10   : > { %s1658_s17 = scalar_select %p1409_p11, 1, 0 }
  0x11   : > { %s1659_s18 = scalar_select %p1413_p12, 1, 0 }
  0x12   : > { %s1102_s21 = smul.u32 12, %s87_s19  ;;  %s1422_s24 = scalar_lea.hbm %s1654_s0, %s1103_s20 }
  0x13   : > { %s1430_s28 = scalar_lea.sflag [#allocation3], %s87_s19  ;;  %s1235_s29 = scalar_lea.hbm %s1422_s24, 192 }
  0x14   : > { %s91_s26 = scalar_lea.vmem [#allocation2], %s1102_s21  ;;  %p1236_p0 = scmp.ne.s32.totalorder %s1422_s24, %s1235_s29 }
  0x15   : > { %s98_s27 = sshll.u32 %s91_s26, 4  ;;  %p1237_p1 = pneg %p1424_p13  ;;  %s1428_s27 = int_to_ptr.vmem [resolvable:$true] %s98_s27 }
  0x16   : > { %s1240_s3 = scalar_lea.hbm %s1654_s0, 384  ;;  %p1241_p4 = scmp.lt.u32.totalorder %s1422_s24, %s1654_s0 }
  0x17   : > { %p1238_p2 = pnand %p1237_p1, %p1236_p0  ;;  %p1242_p5 = scmp.lt.u32.totalorder %s1240_s3, %s1235_s29 }
  0x18   : > { %p1244_p8 = scmp.lt.u32.totalorder %s1235_s29, %s1422_s24 }
  0x19   : > { %p1239_p3 = pneg %p1238_p2  ;;  %p1243_p7 = por %p1242_p5, %p1241_p4 }
  0x1b   : > { %p1245_p10 = por %p1244_p8, %p1243_p7 }
  0x1d   : > { %p1246_p9 = pnand %p1245_p10, %p1239_p3 }
  0x1f   : > { %1249 = shalt.err (!%p1246_p9)
}
  0x20   : > { %s1250_s11 = scalar_lea.vmem %s1428_s27, 192  ;;  %s1333_s13 = smov [#allocation2]  }
  0x21   : > { %p1251_p0 = scmp.ne.s32.totalorder %s1428_s27, %s1250_s11  ;;  %s1255_s14 = sshll.u32 %s1333_s13, 4  ;;  %s1256_s14 = int_to_ptr.vmem [resolvable:$false] %s1255_s14 }
  0x22   : > { %s1257_s19 = scalar_lea.vmem %s1256_s14, 384  ;;  %p1258_p11 = scmp.lt.s32.totalorder %s1428_s27, %s1256_s14 }
  0x23   : > { %p1253_p2 = pnand %p1251_p0, %p1237_p1  ;;  %p1259_p4 = scmp.lt.s32.totalorder %s1257_s19, %s1250_s11 }
  0x25   : > { %p1254_p12 = pneg %p1253_p2  ;;  %p1260_p5 = por %p1259_p4, %p1258_p11 }
  0x27   : > { %p1261_p7 = pnand %p1260_p5, %p1254_p12 }
  0x29   : > { %1264 = shalt.err (!%p1261_p7)
}
  0x2a   : > { %s1334_s20 = smov 64   ;;  %s1335_s21 = smov 4  }
  0x2b   : > { %1113 = dma.hbm_to_vmem [thread:$0]  (!%p1424_p13), %s1422_s24, 192, %s1428_s27, %s1430_s28, %s1334_s20, %s1334_s20, %s1335_s21  }
  0x2c   : > { %p970_p9 = scmp.ge.s32.totalorder %s1331_s9, 1  ;;  %p106_p1 = scmp.lt.s32.totalorder %s1331_s9, 3 }
  0x2e   : > { %p107_p3 = pnand %p970_p9, %p106_p1 }
  0x2f   : > { %s1461_s22 = sand.u32 (!%p107_p3), 1, %s1323_s7  }
  0x30   : > { %110 = sbr.rel (%p107_p3) target bundleno = 2738 (0xab2), region = 24  ;;  %s113_s26 = scalar_lea.sflag (!%p107_p3), [#allocation3], %s1461_s22 }
  0x31   : > { %s1104_s23 = smul.u32 (!%p107_p3), 12, %s1461_s22 }
  0x33   : > { %s116_s29 = scalar_lea.vmem (!%p107_p3), [#allocation2], %s1104_s23 }
  0x37   : > { %1310 = dma.done.wait (%p1402_p6), %s113_s26, 192  }
  0x38   : > { %1312 = vsyncadd (%p1402_p6), %s113_s26, 4294967104  ;;  %v1471_v0 = vld [vmem:[%s116_s29] sm:$0xff]   ;;  %vm151_vm0 = vcmask 64512   ;;  %s1336_s24 = smov 96   ;;  %v1474_v1 = vld [vmem:[%s116_s29 + $0x8] ss:$0 sps:$4 sm:$0xff]  }
  0x39   : > { %147 = vrot.lane.b32.xlu0 %v1471_v0, %s1336_s24  ;;  %1034 = vmatprep.mubr.msk.bf16.mxu0 %vm151_vm0, %v1471_v0  ;;  %vm219_vm1 = vcmask 186368   ;;  %vm212_vm2 = vcmask 187392   ;;  %s1337_s16 = smov 64   ;;  %s1338_s25 = smov 88   ;;  %vm260_vm3 = vcmask 1042432   ;;  %vm261_vm4 = vcmask 1043456  }
  0x3a   : > { %s1339_s27 = smov 120   ;;  %v1340_v31 = vmov 65535   ;;  %s1341_s28 = smov 56   ;;  %vm849_vm5 = vcmask 130048   ;;  %vm853_vm6 = vcmask 195584   ;;  %vm870_vm7 = vcmask 257024  }
  0x3b   : > { %v262_v32 = vsel %vm260_vm3, 4294967295, %v1340_v31  ;;  %s1342_s30 = smov 80   ;;  %s1343_s2 = smov 112   ;;  %vm874_vm8 = vsmask.f32 3328 }
  0x3c   : > { %v1499_v34 = vsel %vm261_vm4, %v262_v32, 0  ;;  %s1344_s3 = smov 48   ;;  %s1345_s4 = smov 72   ;;  %vm875_vm9 = vmand %vm870_vm7, %vm874_vm8 }
  0x3d   : > { %149 = vrot.lane.b32.xlu0 %v1474_v1, %s1336_s24  ;;  %s1346_s5 = smov 104   ;;  %s1347_s11 = smov 40  }
  0x3e   : > { %s1348_s13 = smov 8   ;;  %s1349_s14 = smov 16  }
  0x3f   : > { %s1350_s19 = smov 24   ;;  %s1105_s20 = smul.u32 192, %s1384_s10 }
  0x40   : > { %s134_s21 = scalar_lea.vmem [#allocation5], %s1104_s23  ;;  %s880_s23 = scalar_lea.sflag [#allocation4], %s1461_s22 }
  0x41   : > { %s893_s26 = sshll.u32 %s134_s21, 4  ;;  %s1605_s24 = scalar_lea.hbm %s1655_s1, %s1105_s20  ;;  %s1607_s26 = int_to_ptr.vmem [resolvable:$true] %s893_s26 }
  0x42   : > { %p1661_p11 = scmp.ne.s32.totalorder %s1658_s17, 0 }
  0xab   : > { %v148_v2 = vpop.permute.xlu0 %147 }
  0xac   : > { %1094 = vmatprep.subr.msk.bf16.mxu0 %vm151_vm0, %v148_v2  ;;  %v159_v3 = vsel %vm151_vm0, %v148_v2, 0 }
  0xad   : > { %1031 = vmatpush3.bf16.xpose.msra.mxu0 %v159_v3 }
  0xaf   : > { %v150_v4 = vpop.permute.xlu0 %149 }
  0xb0   : > { %1095 = vmatprep.subr.msk.bf16.mxu0 %vm151_vm0, %v150_v4  ;;  %v162_v5 = vsel %vm151_vm0, %v150_v4, 0 }
  0xb5   : > { %1033 = vmatpush3.bf16.xpose.msra.mxu0 %v162_v5 }
  0xbc   : > { %1035 = vmatmul.mubr.msk.bf16.vlgmr.msra.gmra.mrb[0].mxu0 %vm151_vm0, %v1474_v1 }
 0x18f   : > { %v1036_v6 = vpop.f32.mrb[0].mxu0 }
 0x190   : > { %v198_v7 = vpop.f32.mrb[1].mxu0  ;;  %v220_v8 = vsel %vm219_vm1, %v1036_v6, -inf }
 0x191   : > { %221 = vmax.xlane.f32.xlu0 %v220_v8  ;;  %v1037_v9 = vpop.f32.mrb[2].mxu0  ;;  %v213_v10 = vsel %vm212_vm2, %v198_v7, -inf }
 0x192   : > { %214 = vmax.xlane.f32.xlu1 %v213_v10  ;;  %v201_v11 = vpop.f32.mrb[3].mxu0 }
 0x193   : > { %v216_v12 = vsel %vm212_vm2, %v201_v11, -inf }
 0x196   : > { %217 = vmax.xlane.f32.xlu1 %v216_v12 }
 0x1a7   : > { %249 = vrot.lane.b32.xlu1 %v1471_v0, %s1337_s16  ;;  %319 = vrot.lane.b32.xlu0 %v1471_v0, %s1338_s25 }
 0x21e   : > { %v222_v13 = vpop.xlane.xlu0 %221 }
 0x21f   : > { %v225_v14 = vsub.f32 %v1036_v6, %v222_v13  ;;  %v215_v15 = vpop.xlane.xlu1 %214 }
 0x220   : > { %v223_v16 = vsub.f32 %v198_v7, %v215_v15 }
 0x221   : > { %v230_v17 = vmul.f32 1.442695, %v225_v14 }
 0x222   : > { %v226_v18 = vmul.f32 1.442695, %v223_v16  ;;  %v320_v37 = vpop.permute.xlu0 %319 }
 0x223   : > { %1187 = vpow2.f32 %v230_v17  ;;  %v218_v19 = vpop.xlane.xlu1 %217  ;;  %v330_v46 = vsel %vm151_vm0, %v320_v37, 0 }
 0x224   : > { %v224_v20 = vsub.f32 %v201_v11, %v218_v19  ;;  %1189 = vpow2.f32 %v226_v18 }
 0x226   : > { %v228_v21 = vmul.f32 1.442695, %v224_v20 }
 0x227   : > { %v250_v22 = vpop.permute.xlu1 %249 }
 0x228   : > { %1038 = vmatprep.subr.bf16.mxu1 %v250_v22  ;;  %1191 = vpow2.f32 %v228_v21 }
 0x229   : > { %1039 = vmatpush3.bf16.msra.mxu1 %v250_v22 }
 0x22d   : > { %v1188_v23 = vpop.eup %1187 }
 0x22e   : > { %v238_v24 = vsel %vm219_vm1, %v1188_v23, 0.0  ;;  %v1190_v25 = vpop.eup %1189 }
 0x22f   : > { %239 = vadd.xlane.f32.xlu1 %v238_v24  ;;  %v232_v26 = vsel %vm212_vm2, %v1190_v25, 0.0 }
 0x232   : > { %v1192_v27 = vpop.eup %1191 }
 0x233   : > { %233 = vadd.xlane.f32.xlu1 %v232_v26  ;;  %v235_v28 = vsel %vm212_vm2, %v1192_v27, 0.0 }
 0x237   : > { %236 = vadd.xlane.f32.xlu1 %v235_v28 }
 0x248   : > { %251 = vrot.lane.b32.xlu1 %v1474_v1, %s1337_s16 }
 0x24c   : > { %321 = vrot.lane.b32.xlu1 %v1474_v1, %s1338_s25  ;;  %s1265_s25 = scalar_lea.vmem %s1607_s26, 192 }
 0x24d   : > { %p1266_p6 = scmp.ne.s32.totalorder %s1607_s26, %s1265_s25 }
 0x24f   : > { %p1267_p12 = pnand %p1266_p6, %p1661_p11 }
 0x250   : > { %315 = vrot.lane.b32.xlu1 %v1471_v0, %s1339_s27 }
 0x251   : > { %p1268_p13 = pneg %p1267_p12 }
 0x254   : > { %317 = vrot.lane.b32.xlu1 %v1474_v1, %s1339_s27  ;;  %s1351_s27 = smov [#allocation5]  }
 0x2bc   : > { %v240_v29 = vpop.xlane.xlu1 %239 }
 0x2bd   : > { %1193 = vrcp.f32 %v240_v29 }
 0x2c0   : > { %v234_v30 = vpop.xlane.xlu1 %233 }
 0x2c1   : > { %1195 = vrcp.f32 %v234_v30 }
 0x2c4   : > { %v237_v33 = vpop.xlane.xlu1 %236 }
 0x2c5   : > { %1197 = vrcp.f32 %v237_v33 }
 0x2c7   : > { %v1194_v38 = vpop.eup %1193 }
 0x2c8   : > { %v252_v35 = vpop.permute.xlu1 %251  ;;  %v246_v42 = vmul.f32 %v1194_v38, %v1188_v23 }
 0x2c9   : > { %v265_v36 = vand.u32 %v1499_v34, %v252_v35 }
 0x2ca   : > { %v248_v47 = vpack.c.bf16 %v246_v42, %v246_v42 }
 0x2cb   : > { %1040 = vmatprep.subr.bf16.mxu1 %v265_v36  ;;  %v1196_v39 = vpop.eup %1195 }
 0x2cc   : > { %1041 = vmatpush3.bf16.msra.mxu1 %v265_v36  ;;  %v322_v40 = vpop.permute.xlu1 %321  ;;  %v244_v43 = vmul.f32 %v1196_v39, %v1190_v25 }
 0x2cd   : > { %1096 = vmatprep.subr.msk.bf16.mxu1 %vm151_vm0, %v320_v37  ;;  %v333_v49 = vsel %vm151_vm0, %v322_v40, 0 }
 0x2cf   : > { %v1198_v41 = vpop.eup %1197 }
 0x2d0   : > { %v245_v44 = vmul.f32 %v1198_v41, %v1192_v27  ;;  %v316_v48 = vpop.permute.xlu1 %315 }
 0x2d2   : > { %v247_v45 = vpack.c.bf16 %v245_v44, %v244_v43 }
 0x2d4   : > { %1042 = vmatprep.mubr.msk.bf16.mxu1 %vm212_vm2, %v247_v45  ;;  %v318_v50 = vpop.permute.xlu1 %317 }
 0x2d5   : > { %1043 = vmatmul.mubr.msk.bf16.vlgmr.msra.gmra.mrb[0].mxu1 %vm212_vm2, %v248_v47 }
 0x2d6   : > { %1047 = vmatpush3.bf16.xpose.msra.mxu1 %v330_v46  ;;  %1050 = vmatprep.mubr.msk.bf16.mxu1 %vm151_vm0, %v316_v48 }
 0x2d7   : > { %1097 = vmatprep.subr.msk.bf16.mxu1 %vm151_vm0, %v322_v40 }
 0x2de   : > { %1049 = vmatpush3.bf16.xpose.msra.mxu1 %v333_v49 }
 0x2e5   : > { %1051 = vmatmul.mubr.msk.bf16.vlgmr.msra.gmra.mrb[4].mxu1 %vm151_vm0, %v318_v50 }
 0x3a8   : > { %v1510_v51 = vpop.f32.mrb[0].mxu1 }
 0x3a9   : > { %v1512_v52 = vpop.f32.mrb[1].mxu1 }
 0x3aa   : > { %v1045_v53 = vpop.f32.mrb[2].mxu1 }
 0x3ab   : > { %v1514_v54 = vpop.f32.mrb[3].mxu1 }
 0x3b8   : > { %v1052_v55 = vpop.f32.mrb[4].mxu1 }
 0x3b9   : > { %v369_v56 = vpop.f32.mrb[5].mxu1  ;;  %v389_v61 = vsel %vm219_vm1, %v1052_v55, -inf }
 0x3ba   : > { %v1053_v57 = vpop.f32.mrb[6].mxu1  ;;  %v383_v58 = vsel %vm212_vm2, %v369_v56, -inf }
 0x3bb   : > { %384 = vmax.xlane.f32.xlu1 %v383_v58  ;;  %v372_v59 = vpop.f32.mrb[7].mxu1 }
 0x3bc   : > { %v386_v60 = vsel %vm212_vm2, %v372_v59, -inf }
 0x3bd   : > { %387 = vmax.xlane.f32.xlu0 %v386_v60 }
 0x3bf   : > { %390 = vmax.xlane.f32.xlu1 %v389_v61 }
 0x3d0   : > { %418 = vrot.lane.b32.xlu1 %v1471_v0, %s1341_s28 }
 0x448   : > { %v385_v62 = vpop.xlane.xlu1 %384 }
 0x449   : > { %v392_v2 = vsub.f32 %v369_v56, %v385_v62 }
 0x44a   : > { %v388_v63 = vpop.xlane.xlu0 %387 }
 0x44b   : > { %v393_v3 = vsub.f32 %v372_v59, %v388_v63  ;;  %v395_v7 = vmul.f32 1.442695, %v392_v2 }
 0x44c   : > { %v391_v4 = vpop.xlane.xlu1 %390 }
 0x44d   : > { %v397_v5 = vmul.f32 1.442695, %v393_v3  ;;  %v394_v6 = vsub.f32 %v1052_v55, %v391_v4 }
 0x44f   : > { %1199 = vpow2.f32 %v397_v5  ;;  %v399_v8 = vmul.f32 1.442695, %v394_v6 }
 0x450   : > { %v419_v9 = vpop.permute.xlu1 %418 }
 0x451   : > { %1201 = vpow2.f32 %v399_v8  ;;  %1054 = vmatprep.subr.bf16.mxu0 %v419_v9 }
 0x452   : > { %1055 = vmatpush3.bf16.msra.mxu0 %v419_v9  ;;  %1203 = vpow2.f32 %v395_v7 }
 0x459   : > { %v1200_v10 = vpop.eup %1199 }
 0x45a   : > { %v404_v11 = vsel %vm212_vm2, %v1200_v10, 0.0 }
 0x45b   : > { %v1202_v12 = vpop.eup %1201  ;;  %405 = vadd.xlane.f32.xlu1 %v404_v11 }
 0x45c   : > { %v407_v13 = vsel %vm219_vm1, %v1202_v12, 0.0  ;;  %v1204_v14 = vpop.eup %1203 }
 0x45d   : > { %408 = vadd.xlane.f32.xlu0 %v407_v13  ;;  %v401_v15 = vsel %vm212_vm2, %v1204_v14, 0.0 }
 0x461   : > { %402 = vadd.xlane.f32.xlu0 %v401_v15 }
 0x46c   : > { %484 = vrot.lane.b32.xlu1 %v1471_v0, %s1342_s30 }
 0x470   : > { %486 = vrot.lane.b32.xlu1 %v1474_v1, %s1342_s30 }
 0x474   : > { %482 = vrot.lane.b32.xlu1 %v1474_v1, %s1343_s2 }
 0x477   : > { %420 = vrot.lane.b32.xlu0 %v1474_v1, %s1341_s28  ;;  %s1269_s28 = sshll.u32 %s1351_s27, 4  ;;  %s1270_s28 = int_to_ptr.vmem [resolvable:$false] %s1269_s28 }
 0x478   : > { %s1271_s30 = scalar_lea.vmem %s1270_s28, 384  ;;  %p1272_p8 = scmp.lt.s32.totalorder %s1607_s26, %s1270_s28 }
 0x479   : > { %p1273_p10 = scmp.lt.s32.totalorder %s1271_s30, %s1265_s25 }
 0x47b   : > { %480 = vrot.lane.b32.xlu0 %v1471_v0, %s1343_s2  ;;  %p1274_p0 = por %p1273_p10, %p1272_p8 }
 0x47d   : > { %p1275_p2 = pnand %p1274_p0, %p1268_p13 }
 0x4e8   : > { %v406_v16 = vpop.xlane.xlu1 %405 }
 0x4ea   : > { %v409_v17 = vpop.xlane.xlu0 %408 }
 0x4eb   : > { %1205 = vrcp.f32 %v409_v17 }
 0x4ec   : > { %1207 = vrcp.f32 %v406_v16  ;;  %v485_v21 = vpop.permute.xlu1 %484 }
 0x4ed   : > { %v495_v29 = vsel %vm151_vm0, %v485_v21, 0 }
 0x4ee   : > { %v403_v18 = vpop.xlane.xlu0 %402 }
 0x4ef   : > { %1209 = vrcp.f32 %v403_v18 }
 0x4f0   : > { %v487_v32 = vpop.permute.xlu1 %486 }
 0x4f1   : > { %v498_v33 = vsel %vm151_vm0, %v487_v32, 0 }
 0x4f2   : > { %v421_v19 = vpop.permute.xlu0 %420 }
 0x4f3   : > { %v430_v20 = vand.u32 %v421_v19, %v1499_v34 }
 0x4f4   : > { %v483_v35 = vpop.permute.xlu1 %482 }
 0x4f5   : > { %1056 = vmatprep.subr.bf16.mxu0 %v430_v20  ;;  %v1206_v22 = vpop.eup %1205 }
 0x4f6   : > { %1057 = vmatpush3.bf16.msra.mxu0 %v430_v20  ;;  %v1208_v23 = vpop.eup %1207  ;;  %v415_v25 = vmul.f32 %v1206_v22, %v1202_v12  ;;  %v481_v31 = vpop.permute.xlu0 %480 }
 0x4f7   : > { %1098 = vmatprep.subr.msk.bf16.mxu0 %vm151_vm0, %v485_v21  ;;  %v414_v27 = vmul.f32 %v1208_v23, %v1200_v10 }
 0x4f8   : > { %v417_v30 = vpack.c.bf16 %v415_v25, %v415_v25 }
 0x4f9   : > { %v1210_v24 = vpop.eup %1209 }
 0x4fa   : > { %v413_v26 = vmul.f32 %v1210_v24, %v1204_v14 }
 0x4fc   : > { %v416_v28 = vpack.c.bf16 %v414_v27, %v413_v26 }
 0x4fe   : > { %1058 = vmatprep.mubr.msk.bf16.mxu0 %vm212_vm2, %v416_v28 }
 0x4ff   : > { %1059 = vmatmul.mubr.msk.bf16.vlgmr.msra.gmra.mrb[4].mxu0 %vm212_vm2, %v417_v30 }
 0x500   : > { %1063 = vmatpush3.bf16.xpose.msra.mxu0 %v495_v29  ;;  %1066 = vmatprep.mubr.msk.bf16.mxu0 %vm151_vm0, %v481_v31 }
 0x501   : > { %1099 = vmatprep.subr.msk.bf16.mxu0 %vm151_vm0, %v487_v32 }
 0x508   : > { %1065 = vmatpush3.bf16.xpose.msra.mxu0 %v498_v33 }
 0x50f   : > { %1067 = vmatmul.mubr.msk.bf16.vlgmr.msra.gmra.mrb[8].mxu0 %vm151_vm0, %v483_v35 }
 0x5d2   : > { %v1539_v36 = vpop.f32.mrb[4].mxu0 }
 0x5d3   : > { %v1541_v37 = vpop.f32.mrb[5].mxu0 }
 0x5d4   : > { %v1170_v38 = vpack.i.bf16 %v1541_v37, %v1539_v36  ;;  %v1061_v39 = vpop.f32.mrb[6].mxu0 }
 0x5d5   : > { %v1545_v40 = vpop.f32.mrb[7].mxu0 }
 0x5e2   : > { %v1068_v41 = vpop.f32.mrb[8].mxu0 }
 0x5e3   : > { %v534_v42 = vpop.f32.mrb[9].mxu0  ;;  %v554_v47 = vsel %vm219_vm1, %v1068_v41, -inf }
 0x5e4   : > { %v1069_v43 = vpop.f32.mrb[10].mxu0  ;;  %v548_v44 = vsel %vm212_vm2, %v534_v42, -inf }
 0x5e5   : > { %549 = vmax.xlane.f32.xlu0 %v548_v44  ;;  %v537_v45 = vpop.f32.mrb[11].mxu0 }
 0x5e6   : > { %v551_v46 = vsel %vm212_vm2, %v537_v45, -inf }
 0x5e7   : > { %552 = vmax.xlane.f32.xlu1 %v551_v46 }
 0x5e9   : > { %555 = vmax.xlane.f32.xlu0 %v554_v47 }
 0x5f8   : > { %583 = vrot.lane.b32.xlu1 %v1471_v0, %s1344_s3 }
 0x672   : > { %v550_v48 = vpop.xlane.xlu0 %549 }
 0x673   : > { %v557_v50 = vsub.f32 %v534_v42, %v550_v48 }
 0x674   : > { %v553_v49 = vpop.xlane.xlu1 %552 }
 0x675   : > { %v558_v53 = vsub.f32 %v537_v45, %v553_v49  ;;  %v560_v59 = vmul.f32 1.442695, %v557_v50 }
 0x676   : > { %v556_v55 = vpop.xlane.xlu0 %555 }
 0x677   : > { %v562_v56 = vmul.f32 1.442695, %v558_v53  ;;  %v559_v57 = vsub.f32 %v1068_v41, %v556_v55 }
 0x678   : > { %v584_v58 = vpop.permute.xlu1 %583 }
 0x679   : > { %1211 = vpow2.f32 %v562_v56  ;;  %v564_v60 = vmul.f32 1.442695, %v559_v57  ;;  %1070 = vmatprep.subr.bf16.mxu1 %v584_v58 }
 0x67a   : > { %1071 = vmatpush3.bf16.msra.mxu1 %v584_v58 }
 0x67b   : > { %1213 = vpow2.f32 %v564_v60 }
 0x67c   : > { %1215 = vpow2.f32 %v560_v59 }
 0x683   : > { %v1212_v61 = vpop.eup %1211 }
 0x684   : > { %v569_v62 = vsel %vm212_vm2, %v1212_v61, 0.0 }
 0x685   : > { %v1214_v63 = vpop.eup %1213  ;;  %570 = vadd.xlane.f32.xlu1 %v569_v62 }
 0x686   : > { %v572_v2 = vsel %vm219_vm1, %v1214_v63, 0.0  ;;  %v1216_v3 = vpop.eup %1215 }
 0x687   : > { %573 = vadd.xlane.f32.xlu0 %v572_v2  ;;  %v566_v4 = vsel %vm212_vm2, %v1216_v3, 0.0 }
 0x68b   : > { %567 = vadd.xlane.f32.xlu0 %v566_v4 }
 0x696   : > { %649 = vrot.lane.b32.xlu1 %v1471_v0, %s1345_s4 }
 0x69a   : > { %651 = vrot.lane.b32.xlu1 %v1474_v1, %s1345_s4 }
 0x69e   : > { %647 = vrot.lane.b32.xlu1 %v1474_v1, %s1346_s5 }
 0x6a1   : > { %585 = vrot.lane.b32.xlu0 %v1474_v1, %s1344_s3 }
 0x6a5   : > { %645 = vrot.lane.b32.xlu0 %v1471_v0, %s1346_s5 }
 0x712   : > { %v571_v5 = vpop.xlane.xlu1 %570 }
 0x714   : > { %v574_v6 = vpop.xlane.xlu0 %573 }
 0x715   : > { %1217 = vrcp.f32 %v574_v6 }
 0x716   : > { %1219 = vrcp.f32 %v571_v5  ;;  %v650_v10 = vpop.permute.xlu1 %649 }
 0x717   : > { %v660_v18 = vsel %vm151_vm0, %v650_v10, 0 }
 0x718   : > { %v568_v7 = vpop.xlane.xlu0 %567 }
 0x719   : > { %1221 = vrcp.f32 %v568_v7 }
 0x71a   : > { %v652_v21 = vpop.permute.xlu1 %651 }
 0x71b   : > { %v663_v22 = vsel %vm151_vm0, %v652_v21, 0 }
 0x71c   : > { %v586_v8 = vpop.permute.xlu0 %585 }
 0x71d   : > { %v595_v9 = vand.u32 %v586_v8, %v1499_v34 }
 0x71e   : > { %v648_v23 = vpop.permute.xlu1 %647 }
 0x71f   : > { %1072 = vmatprep.subr.bf16.mxu1 %v595_v9  ;;  %v1218_v11 = vpop.eup %1217 }
 0x720   : > { %1073 = vmatpush3.bf16.msra.mxu1 %v595_v9  ;;  %v1220_v12 = vpop.eup %1219  ;;  %v580_v14 = vmul.f32 %v1218_v11, %v1214_v63  ;;  %v646_v20 = vpop.permute.xlu0 %645 }
 0x721   : > { %1100 = vmatprep.subr.msk.bf16.mxu1 %vm151_vm0, %v650_v10  ;;  %v579_v16 = vmul.f32 %v1220_v12, %v1212_v61 }
 0x722   : > { %v582_v19 = vpack.c.bf16 %v580_v14, %v580_v14 }
 0x723   : > { %v1222_v13 = vpop.eup %1221 }
 0x724   : > { %v578_v15 = vmul.f32 %v1222_v13, %v1216_v3 }
 0x726   : > { %v581_v17 = vpack.c.bf16 %v579_v16, %v578_v15 }
 0x728   : > { %1074 = vmatprep.mubr.msk.bf16.mxu1 %vm212_vm2, %v581_v17 }
 0x729   : > { %1075 = vmatmul.mubr.msk.bf16.vlgmr.msra.gmra.mrb[8].mxu1 %vm212_vm2, %v582_v19 }
 0x72a   : > { %1079 = vmatpush3.bf16.xpose.msra.mxu1 %v660_v18  ;;  %1082 = vmatprep.mubr.msk.bf16.mxu1 %vm151_vm0, %v646_v20 }
 0x72b   : > { %1101 = vmatprep.subr.msk.bf16.mxu1 %vm151_vm0, %v652_v21 }
 0x732   : > { %1081 = vmatpush3.bf16.xpose.msra.mxu1 %v663_v22 }
 0x739   : > { %1083 = vmatmul.mubr.msk.bf16.vlgmr.msra.gmra.mrb[12].mxu1 %vm151_vm0, %v648_v23 }
 0x7fc   : > { %v1076_v24 = vpop.f32.mrb[8].mxu1 }
 0x7fd   : > { %v631_v25 = vpop.f32.mrb[9].mxu1 }
 0x7fe   : > { %v1175_v26 = vpack.i.bf16 %v631_v25, %v1076_v24  ;;  %v1077_v27 = vpop.f32.mrb[10].mxu1 }
 0x7ff   : > { %v634_v28 = vpop.f32.mrb[11].mxu1  ;;  %v876_v27 = vld [vmem:[%s134_s21 + $0x8] sm:$0xf] }
 0x80c   : > { %v1084_v29 = vpop.f32.mrb[12].mxu1 }
 0x80d   : > { %v699_v30 = vpop.f32.mrb[13].mxu1  ;;  %v719_v39 = vsel %vm219_vm1, %v1084_v29, -inf }
 0x80e   : > { %v1085_v31 = vpop.f32.mrb[14].mxu1  ;;  %v713_v32 = vsel %vm212_vm2, %v699_v30, -inf }
 0x80f   : > { %714 = vmax.xlane.f32.xlu0 %v713_v32  ;;  %v702_v33 = vpop.f32.mrb[15].mxu1 }
 0x810   : > { %v716_v35 = vsel %vm212_vm2, %v702_v33, -inf }
 0x811   : > { %717 = vmax.xlane.f32.xlu1 %v716_v35 }
 0x813   : > { %720 = vmax.xlane.f32.xlu0 %v719_v39 }
 0x89c   : > { %v715_v41 = vpop.xlane.xlu0 %714 }
 0x89d   : > { %v722_v43 = vsub.f32 %v699_v30, %v715_v41 }
 0x89e   : > { %v718_v42 = vpop.xlane.xlu1 %717 }
 0x89f   : > { %v723_v44 = vsub.f32 %v702_v33, %v718_v42  ;;  %v725_v48 = vmul.f32 1.442695, %v722_v43 }
 0x8a0   : > { %v721_v45 = vpop.xlane.xlu0 %720 }
 0x8a1   : > { %v727_v46 = vmul.f32 1.442695, %v723_v44  ;;  %v724_v47 = vsub.f32 %v1084_v29, %v721_v45 }
 0x8a3   : > { %1223 = vpow2.f32 %v727_v46  ;;  %v729_v49 = vmul.f32 1.442695, %v724_v47 }
 0x8a5   : > { %1225 = vpow2.f32 %v729_v49 }
 0x8a6   : > { %1227 = vpow2.f32 %v725_v48 }
 0x8ad   : > { %v1224_v50 = vpop.eup %1223 }
 0x8ae   : > { %v734_v53 = vsel %vm212_vm2, %v1224_v50, 0.0 }
 0x8af   : > { %v1226_v55 = vpop.eup %1225  ;;  %735 = vadd.xlane.f32.xlu1 %v734_v53 }
 0x8b0   : > { %v737_v56 = vsel %vm219_vm1, %v1226_v55, 0.0  ;;  %v1228_v57 = vpop.eup %1227 }
 0x8b1   : > { %738 = vadd.xlane.f32.xlu0 %v737_v56  ;;  %v731_v58 = vsel %vm212_vm2, %v1228_v57, 0.0 }
 0x8b5   : > { %732 = vadd.xlane.f32.xlu0 %v731_v58 }
 0x8c0   : > { %748 = vrot.lane.b32.xlu1 %v1471_v0, %s1347_s11 }
 0x8c4   : > { %1171 = vrot.lane.b32.xlu1 %v1170_v38, %s1348_s13 }
 0x8c8   : > { %815 = vrot.lane.b32.xlu1 %v1545_v40, %s1348_s13 }
 0x8cb   : > { %750 = vrot.lane.b32.xlu0 %v1474_v1, %s1347_s11 }
 0x8cc   : > { %827 = vrot.lane.b32.xlu1 %v634_v28, %s1349_s14 }
 0x8cf   : > { %1176 = vrot.lane.b32.xlu0 %v1175_v26, %s1349_s14 }
 0x93c   : > { %v736_v59 = vpop.xlane.xlu1 %735 }
 0x93e   : > { %v739_v60 = vpop.xlane.xlu0 %738 }
 0x93f   : > { %1229 = vrcp.f32 %v739_v60 }
 0x940   : > { %v749_v61 = vpop.permute.xlu1 %748  ;;  %1231 = vrcp.f32 %v736_v59 }
 0x941   : > { %1086 = vmatprep.subr.bf16.mxu0 %v749_v61 }
 0x942   : > { %v733_v62 = vpop.xlane.xlu0 %732  ;;  %1087 = vmatpush3.bf16.msra.mxu0 %v749_v61 }
 0x943   : > { %1233 = vrcp.f32 %v733_v62 }
 0x946   : > { %v751_v0 = vpop.permute.xlu0 %750 }
 0x947   : > { %v760_v36 = vand.u32 %v751_v0, %v1499_v34  ;;  %v1172_v34 = vpop.permute.xlu1 %1171 }
 0x948   : > { %v1174_v12 = vunpack.i.h.bf16 %v1172_v34  ;;  %v1173_v14 = vunpack.i.l.bf16 %v1172_v34 }
 0x949   : > { %1088 = vmatprep.subr.bf16.mxu0 %v760_v36  ;;  %v1230_v37 = vpop.eup %1229 }
 0x94a   : > { %1089 = vmatpush3.bf16.msra.mxu0 %v760_v36  ;;  %v1232_v38 = vpop.eup %1231  ;;  %v745_v40 = vmul.f32 %v1230_v37, %v1226_v55  ;;  %v1177_v11 = vpop.permute.xlu0 %1176  ;;  %v846_v18 = vsel %vm151_vm0, %v1512_v52, %v1174_v12  ;;  %v848_v22 = vsel %vm151_vm0, %v1510_v51, %v1173_v14 }
 0x94b   : > { %v744_v2 = vmul.f32 %v1232_v38, %v1224_v50  ;;  %v816_v10 = vpop.permute.xlu1 %815  ;;  %v1179_v15 = vunpack.i.h.bf16 %v1177_v11  ;;  %v1178_v16 = vunpack.i.l.bf16 %v1177_v11 }
 0x94c   : > { %v747_v4 = vpack.c.bf16 %v745_v40, %v745_v40  ;;  %v847_v17 = vsel %vm151_vm0, %v1514_v54, %v816_v10 }
 0x94d   : > { %v1234_v1 = vpop.eup %1233  ;;  %v850_v26 = vsel %vm849_vm5, %v846_v18, %v1179_v15  ;;  %v852_v54 = vsel %vm849_vm5, %v848_v22, %v1178_v16 }
 0x94e   : > { %v743_v63 = vmul.f32 %v1234_v1, %v1228_v57 }
 0x94f   : > { %v828_v13 = vpop.permute.xlu1 %827 }
 0x950   : > { %v746_v3 = vpack.c.bf16 %v744_v2, %v743_v63  ;;  %v851_v19 = vsel %vm849_vm5, %v847_v17, %v828_v13 }
 0x952   : > { %1090 = vmatprep.mubr.msk.bf16.mxu0 %vm212_vm2, %v746_v3 }
 0x953   : > { %1091 = vmatmul.mubr.msk.bf16.vlgmr.msra.gmra.mrb[12].mxu0 %vm212_vm2, %v747_v4 }
 0xa26   : > { %v1092_v5 = vpop.f32.mrb[12].mxu0 }
 0xa27   : > { %v796_v6 = vpop.f32.mrb[13].mxu0 }
 0xa28   : > { %v1180_v7 = vpack.i.bf16 %v796_v6, %v1092_v5  ;;  %v1093_v8 = vpop.f32.mrb[14].mxu0 }
 0xa29   : > { %v799_v9 = vpop.f32.mrb[15].mxu0 }
 0xa2a   : > { %1181 = vrot.lane.b32.xlu0 %v1180_v7, %s1350_s19  ;;  %839 = vrot.lane.b32.xlu1 %v799_v9, %s1350_s19 }
 0xa9c   : > { %v1182_v20 = vpop.permute.xlu0 %1181  ;;  %v840_v21 = vpop.permute.xlu1 %839 }
 0xa9d   : > { %v1184_v23 = vunpack.i.h.bf16 %v1182_v20  ;;  %v1183_v24 = vunpack.i.l.bf16 %v1182_v20  ;;  %v855_v25 = vsel %vm853_vm6, %v851_v19, %v840_v21 }
 0xa9e   : > { %v996_v52 = vpack.c.bf16 %v855_v25, %v855_v25 }
 0xa9f   : > { %v854_v28 = vsel %vm853_vm6, %v850_v26, %v1184_v23  ;;  %v856_v51 = vsel %vm853_vm6, %v852_v54, %v1183_v24 }
 0xaa0   : > { %v995_v29 = vpack.c.bf16 %v854_v28, %v854_v28  ;;  %v997_v30 = vpack.c.bf16 %v856_v51, %v856_v51  ;;  %872 = vst.msk [vmem:[%s134_s21 + $0x4] sm:$0xf] %vm870_vm7, %v996_v52 }
 0xaa2   : > { %871 = vst.msk [vmem:[%s134_s21] sm:$0xf] %vm870_vm7, %v995_v29  ;;  %v877_v31 = vsel %vm875_vm9, %v997_v30, %v876_v27 }
 0xaa3   : > { %878 = vst [vmem:[%s134_s21 + $0x8] sm:$0xf] %v877_v31 }
 0xaa4   : > { %1278 = shalt.err (!%p1275_p2)
}
 0xaa5   : > { %s1279_s2 = scalar_lea.hbm %s1605_s24, 192  ;;  %s1283_s5 = scalar_lea.hbm %s1655_s1, 384 }
 0xaa6   : > { %p1280_p4 = scmp.ne.s32.totalorder %s1605_s24, %s1279_s2  ;;  %p1284_p9 = scmp.lt.u32.totalorder %s1605_s24, %s1655_s1 }
 0xaa7   : > { %p1285_p1 = scmp.lt.u32.totalorder %s1283_s5, %s1279_s2  ;;  %p1287_p6 = scmp.lt.u32.totalorder %s1279_s2, %s1605_s24 }
 0xaa8   : > { %p1281_p5 = pnand %p1280_p4, %p1661_p11 }
 0xaa9   : > { %p1286_p3 = por %p1285_p1, %p1284_p9 }
 0xaaa   : > { %p1282_p7 = pneg %p1281_p5 }
 0xaab   : > { %p1288_p12 = por %p1287_p6, %p1286_p3 }
 0xaad   : > { %p1289_p13 = pnand %p1288_p12, %p1282_p7 }
 0xaaf   : > { %1292 = shalt.err (!%p1289_p13)
}
 0xab0   : > { %s1352_s14 = smov 4  }
 0xab1   : > { %1108 = dma.vmem_to_hbm [thread:$0]  (%p1661_p11), %s1607_s26, 192, %s1605_s24, %s880_s23, %s1337_s16, %s1337_s16, %s1352_s14  }
 0xab2 PF: > { %s908_s19 = sand.u32 1, %s1319_s6   ;;  %p1662_p8 = scmp.ne.s32.totalorder %s1659_s18, 0 }
 0xab3   : > { %p1663_p10 = scmp.ge.s32.totalorder %s1331_s9, 2  ;;  %s909_s20 = scalar_lea.sflag [#allocation4], %s908_s19 }
 0xab5   : > { %p1115_p0 = pnand %p1663_p10, %p1662_p8 }
 0xab7   : > { %1314 = dma.done.wait (!%p1115_p0), %s909_s20, 192  }
 0xab8   : > { %1316 = vsyncadd (!%p1115_p0), %s909_s20, 4294967104  ;;  %p14_p2 = scmp.ge.s32.totalorder %s1388_s12, 4   ;;  %s1664_s6 = smov %s1323_s7 }
 0xab9   : > { %s1665_s7 = smov %s1327_s8  ;;  %s1666_s8 = smov %s1400_s15 }
 0xaba   : > { %s1667_s9 = smov %s1388_s12  ;;  %16 = sbr.rel (!%p14_p2) target bundleno = 5 (0x5), region = 69 }
 0xac1   :  { %914 = vsyncpa [#allocation3], 1 }
 0xac2   :  { %916 = vsyncpa [#allocation3 + $0x1], 1 }
 0xac3   :  { %917 = vsyncpa [#allocation4], 1 }
 0xac4   :  { %919 = vsyncpa [#allocation4 + $0x1], 1 }

// kernel: splicebert_for_token_cls_forward.15
= control target key start
LH: loop header
LB: loop body
LE: loop exit
PB: predicated region body
PF: predicated region fallthrough
CT: control target
= control target key end

     0   :  { %11 = vsyncpa [#allocation3], 0  ;;  %s819_s0 = inlined_call_operand.hbm [shape: bf16[46,32], index: 0, kind: input, shape index: {}]   ;;  %s820_s1 = inlined_call_operand.hbm [shape: bf16[32,32], index: 1, kind: input, shape index: {}]   ;;  %s821_s2 = inlined_call_operand.hbm [shape: f32[1,32], index: 2, kind: input, shape index: {}, may-alias: {2,5}]   ;;  %s822_s3 = inlined_call_operand.hbm [shape: bf16[46,32], index: 3, kind: input, shape index: {}]   ;;  %s823_s4 = inlined_call_operand.hbm [shape: f32[1,32], index: 4, kind: input, shape index: {}]   ;;  %s824_s5 = inlined_call_operand.hbm [shape: f32[1,32], index: 5, kind: input, shape index: {}, may-alias: {2,5}]   ;;  %s825_s6 = inlined_call_operand.hbm [shape: bf16[46,32], index: 6, kind: output, shape index: {}]  }
   0x1   :  { %12 = vsyncpa [#allocation6], 0 }
   0x2   :  { %13 = vsyncpa [#allocation9], 0 }
   0x3   :  { %14 = vsyncpa [#allocation12], 0 }
   0x4   :  { %15 = vsyncpa [#allocation4], 0  ;;  %s637_s21 = smov [#allocation5]   ;;  %s638_s23 = smov [#allocation8]  }
   0x5   :  { %s33_s22 = sshll.u32 %s637_s21, 4  ;;  %s55_s24 = sshll.u32 %s638_s23, 4  ;;  %s34_s22 = int_to_ptr.vmem [resolvable:$true] %s33_s22  ;;  %s683_s24 = int_to_ptr.vmem [resolvable:$true] %s55_s24 }
   0x6   :  { %s473_s27 = scalar_lea.hbm %s820_s1, 256 }
   0x7   :  { %p474_p0 = scmp.ne.s32.totalorder %s820_s1, %s473_s27  ;;  %p477_p1 = scmp.lt.u32.totalorder %s473_s27, %s820_s1 }
   0x9   :  { %p479_p2 = pnand %p477_p1, %p474_p0 }
   0xb   :  { %482 = shalt.err (!%p479_p2)
}
   0xc   :  { %s483_s8 = scalar_lea.vmem %s34_s22, 256  ;;  %p488_p4 = scmp.lt.s32.totalorder %s34_s22, %s34_s22 }
   0xd   :  { %p484_p3 = scmp.ne.s32.totalorder %s34_s22, %s483_s8  ;;  %p489_p5 = scmp.lt.s32.totalorder %s483_s8, %s483_s8 }
   0xf   :  { %p490_p6 = por %p489_p5, %p488_p4 }
  0x11   :  { %p491_p7 = pnand %p490_p6, %p484_p3 }
  0x13   :  { %494 = shalt.err (!%p491_p7)
}
  0x14   :  { %s639_s9 = smov 64   ;;  %s640_s10 = smov 4  }
  0x15   :  { %39 = dma.hbm_to_vmem [thread:$0]  %s820_s1, 256, %s34_s22, [#allocation6], %s639_s9, %s639_s9, %s640_s10  }
  0x16   :  { %s495_s15 = scalar_lea.hbm %s822_s3, 384 }
  0x17   :  { %p496_p8 = scmp.ne.s32.totalorder %s822_s3, %s495_s15  ;;  %p499_p9 = scmp.lt.u32.totalorder %s495_s15, %s822_s3 }
  0x19   :  { %p501_p10 = pnand %p499_p9, %p496_p8 }
  0x1b   :  { %504 = shalt.err (!%p501_p10)
}
  0x1c   :  { %s505_s20 = scalar_lea.vmem %s683_s24, 384  ;;  %p510_p12 = scmp.lt.s32.totalorder %s683_s24, %s683_s24 }
  0x1d   :  { %p506_p11 = scmp.ne.s32.totalorder %s683_s24, %s505_s20  ;;  %p511_p13 = scmp.lt.s32.totalorder %s505_s20, %s505_s20 }
  0x1f   :  { %p512_p0 = por %p511_p13, %p510_p12 }
  0x21   :  { %p513_p1 = pnand %p512_p0, %p506_p11 }
  0x23   :  { %516 = shalt.err (!%p513_p1)
}
  0x24   :  { %61 = dma.hbm_to_vmem [thread:$0]  %s822_s3, 384, %s683_s24, [#allocation9], %s639_s9, %s639_s9, %s640_s10  }
  0x25   :  { %s641_s22 = smov [#allocation2]   ;;  %s642_s25 = smov [#allocation7]  }
  0x26   :  { %s21_s23 = sshll.u32 %s641_s22, 4  ;;  %s46_s26 = sshll.u32 %s642_s25, 4  ;;  %s22_s23 = int_to_ptr.vmem [resolvable:$true] %s21_s23  ;;  %s47_s26 = int_to_ptr.vmem [resolvable:$true] %s46_s26 }
  0x27   :  { %s517_s29 = scalar_lea.hbm %s819_s0, 384 }
  0x28   :  { %p518_p2 = scmp.ne.s32.totalorder %s819_s0, %s517_s29  ;;  %p521_p3 = scmp.lt.u32.totalorder %s517_s29, %s819_s0 }
  0x2a   :  { %p523_p4 = pnand %p521_p3, %p518_p2 }
  0x2c   :  { %526 = shalt.err (!%p523_p4)
}
  0x2d   :  { %s527_s3 = scalar_lea.vmem %s22_s23, 384  ;;  %p532_p6 = scmp.lt.s32.totalorder %s22_s23, %s22_s23 }
  0x2e   :  { %p528_p5 = scmp.ne.s32.totalorder %s22_s23, %s527_s3  ;;  %p533_p7 = scmp.lt.s32.totalorder %s527_s3, %s527_s3 }
  0x30   :  { %p534_p8 = por %p533_p7, %p532_p6 }
  0x32   :  { %p535_p9 = pnand %p534_p8, %p528_p5 }
  0x34   :  { %538 = shalt.err (!%p535_p9)
}
  0x35   :  { %27 = dma.hbm_to_vmem [thread:$0]  %s819_s0, 384, %s22_s23, [#allocation3], %s639_s9, %s639_s9, %s640_s10  }
  0x36   :  { %s539_s15 = scalar_lea.hbm %s821_s2, 16 }
  0x37   :  { %p540_p10 = scmp.ne.s32.totalorder %s821_s2, %s539_s15  ;;  %p543_p11 = scmp.lt.u32.totalorder %s539_s15, %s821_s2 }
  0x39   :  { %p545_p12 = pnand %p543_p11, %p540_p10 }
  0x3b   :  { %548 = shalt.err (!%p545_p12)
}
  0x3c   :  { %s549_s20 = scalar_lea.vmem %s47_s26, 16  ;;  %s553_s1 = scalar_lea.vmem %s47_s26, 32 }
  0x3d   :  { %p550_p13 = scmp.ne.s32.totalorder %s47_s26, %s549_s20  ;;  %p554_p0 = scmp.lt.s32.totalorder %s47_s26, %s47_s26 }
  0x3e   :  { %p555_p1 = scmp.lt.s32.totalorder %s553_s1, %s549_s20 }
  0x40   :  { %p556_p2 = por %p555_p1, %p554_p0 }
  0x42   :  { %p557_p3 = pnand %p556_p2, %p550_p13 }
  0x44   :  { %560 = shalt.err (!%p557_p3)
}
  0x45   :  { %49 = dma.hbm_to_vmem [thread:$0]  %s821_s2, 16, %s47_s26, [#allocation6]  }
  0x46   :  { %s643_s22 = smov [#allocation10]   ;;  %s644_s25 = smov [#allocation11]  }
  0x47   :  { %s68_s23 = sshll.u32 %s643_s22, 4  ;;  %s78_s27 = sshll.u32 %s644_s25, 4  ;;  %s69_s23 = int_to_ptr.vmem [resolvable:$true] %s68_s23  ;;  %s79_s27 = int_to_ptr.vmem [resolvable:$true] %s78_s27 }
  0x48   :  { %s561_s30 = scalar_lea.hbm %s823_s4, 16 }
  0x49   :  { %p562_p4 = scmp.ne.s32.totalorder %s823_s4, %s561_s30  ;;  %p565_p5 = scmp.lt.u32.totalorder %s561_s30, %s823_s4 }
  0x4b   :  { %p567_p6 = pnand %p565_p5, %p562_p4 }
  0x4d   :  { %570 = shalt.err (!%p567_p6)
}
  0x4e   :  { %s571_s2 = scalar_lea.vmem %s69_s23, 16  ;;  %s575_s26 = scalar_lea.vmem %s69_s23, 32 }
  0x4f   :  { %p572_p7 = scmp.ne.s32.totalorder %s69_s23, %s571_s2  ;;  %p576_p8 = scmp.lt.s32.totalorder %s69_s23, %s69_s23 }
  0x50   :  { %p577_p9 = scmp.lt.s32.totalorder %s575_s26, %s571_s2 }
  0x52   :  { %p578_p10 = por %p577_p9, %p576_p8 }
  0x54   :  { %p579_p11 = pnand %p578_p10, %p572_p7 }
  0x56   :  { %582 = shalt.err (!%p579_p11)
}
  0x57   :  { %71 = dma.hbm_to_vmem [thread:$0]  %s823_s4, 16, %s69_s23, [#allocation9]  }
  0x58   :  { %s583_s15 = scalar_lea.hbm %s824_s5, 16 }
  0x59   :  { %p584_p12 = scmp.ne.s32.totalorder %s824_s5, %s583_s15  ;;  %p587_p13 = scmp.lt.u32.totalorder %s583_s15, %s824_s5 }
  0x5b   :  { %p589_p0 = pnand %p587_p13, %p584_p12 }
  0x5d   :  { %592 = shalt.err (!%p589_p0)
}
  0x5e   :  { %s593_s20 = scalar_lea.vmem %s79_s27, 16  ;;  %s597_s1 = scalar_lea.vmem %s79_s27, 32 }
  0x5f   :  { %p594_p1 = scmp.ne.s32.totalorder %s79_s27, %s593_s20  ;;  %p598_p2 = scmp.lt.s32.totalorder %s79_s27, %s79_s27 }
  0x60   :  { %p599_p3 = scmp.lt.s32.totalorder %s597_s1, %s593_s20 }
  0x62   :  { %p600_p4 = por %p599_p3, %p598_p2 }
  0x64   :  { %p601_p5 = pnand %p600_p4, %p594_p1 }
  0x66   :  { %604 = shalt.err (!%p601_p5)
}
  0x67   :  { %81 = dma.hbm_to_vmem [thread:$0]  %s824_s5, 16, %s79_s27, [#allocation12]  }
  0x68   :  { %627 = dma.done.wait [#allocation3], 384  }
  0x69   :  { %628 = vsyncadd [#allocation3], 4294966912 }
  0x6a   :  { %629 = dma.done.wait [#allocation6], 272  }
  0x6b   :  { %630 = vsyncadd [#allocation6], 4294967024 }
  0x6c   :  { %631 = dma.done.wait [#allocation9], 400  }
  0x6d   :  { %632 = vsyncadd [#allocation9], 4294966896 }
  0x6e   :  { %633 = dma.done.wait [#allocation12], 16  }
  0x6f   :  { %634 = vsyncadd [#allocation12], 4294967280  ;;  %v645_v0 = vmov 0.0   ;;  %vm646_vm0 = vmmov 0   ;;  %v456_v1 = vld [vmem:[#allocation5] sm:$0xff]   ;;  %v457_v2 = vld [vmem:[#allocation5 + $0x8] sm:$0xff]  }
  0x70   :  { %425 = vmatprep.subr.bf16.mxu0 %v645_v0  ;;  %441 = vmatprep.subr.bf16.mxu1 %v645_v0  ;;  %v458_v3 = vld [vmem:[#allocation2] sm:$0xff]   ;;  %v459_v4 = vld [vmem:[#allocation2 + $0x8] sm:$0xff]   ;;  %vm145_vm1 = vcmask 261120   ;;  %v460_v5 = vld [vmem:[#allocation2 + $0x10] sm:$0x7f]   ;;  %vm245_vm2 = vcmask 259072  }
  0x71   :  { %429 = vmatprep.mubr.msk.bf16.mxu0 %vm646_vm0, %v645_v0  ;;  %433 = vmatprep.mubr.msk.bf16.mxu1 %vm646_vm0, %v645_v0  ;;  %v419_v6 = vld [vmem:[#allocation8 + $0x8] sm:$0xff]   ;;  %v412_v7 = vld [vmem:[#allocation8] sm:$0xff]   ;;  %v388_v8 = vld [vmem:[#allocation7] ss:$0 sm:$0xff]  ;;  %vm360_vm3 = vcmask 257024   ;;  %s647_s5 = smov [#allocation13]  }
  0x72   :  { %426 = vmatpush3.bf16.msra.mxu0 %v456_v1  ;;  %443 = vmatpush3.bf16.msra.mxu1 %v456_v1  ;;  %v417_v9 = vunpack.c.l.bf16 %v419_v6  ;;  %v413_v10 = vunpack.c.l.bf16 %v412_v7  ;;  %v418_v17 = vunpack.c.h.bf16 %v419_v6  ;;  %v414_v18 = vunpack.c.h.bf16 %v412_v7  ;;  %v216_v27 = vld [vmem:[#allocation8 + $0x10] sm:$0xf]  ;;  %v217_v32 = vld [vmem:[#allocation8 + $0x14] sm:$0x7]  ;;  %s373_s21 = sshll.u32 %s647_s5, 4  ;;  %s374_s21 = int_to_ptr.vmem [resolvable:$true] %s373_s21 }
  0x73   :  { %427 = vmatprep.subr.bf16.mxu0 %v645_v0  ;;  %442 = vmatprep.subr.bf16.mxu1 %v645_v0  ;;  %v222_v33 = vunpack.c.l.bf16 %v216_v27  ;;  %v223_v39 = vunpack.c.l.bf16 %v217_v32  ;;  %vm366_vm4 = vcmask 256000   ;;  %s605_s22 = scalar_lea.vmem %s374_s21, 384  ;;  %p610_p7 = scmp.lt.s32.totalorder %s374_s21, %s374_s21 }
  0x74   :  { %p606_p6 = scmp.ne.s32.totalorder %s374_s21, %s605_s22  ;;  %p611_p8 = scmp.lt.s32.totalorder %s605_s22, %s605_s22 }
  0x76   :  { %428 = vmatpush3.bf16.msra.mxu0 %v457_v2  ;;  %444 = vmatpush3.bf16.msra.mxu1 %v457_v2  ;;  %p612_p9 = por %p611_p8, %p610_p7 }
  0x78   :  { %p613_p10 = pnand %p612_p9, %p606_p6 }
  0x79   :  { %430 = vmatmul.mubr.msk.bf16.vlgmr.msra.gmra.mrb[0].mxu0 %vm145_vm1, %v458_v3  ;;  %434 = vmatmul.mubr.msk.bf16.vlgmr.msra.gmra.mrb[0].mxu1 %vm145_vm1, %v459_v4 }
  0x7a   :  { %437 = vmatprep.mubr.msk.bf16.mxu1 %vm646_vm0, %v645_v0 }
  0x81   :  { %438 = vmatmul.mubr.msk.bf16.gmra.mrb[4].mxu1 %vm145_vm1, %v460_v5 }
 0x14c   :  { %v189_v11 = vpop.f32.mrb[0].mxu0  ;;  %v197_v12 = vpop.f32.mrb[0].mxu1 }
 0x14d   :  { %v190_v13 = vadd.f32 %v388_v8, %v189_v11  ;;  %v198_v14 = vadd.f32 %v388_v8, %v197_v12  ;;  %v431_v15 = vpop.f32.mrb[1].mxu0  ;;  %v435_v16 = vpop.f32.mrb[1].mxu1 }
 0x14e   :  { %v192_v19 = vpop.f32.mrb[2].mxu0  ;;  %v200_v20 = vpop.f32.mrb[2].mxu1 }
 0x14f   :  { %v193_v21 = vadd.f32 %v388_v8, %v192_v19  ;;  %v201_v22 = vadd.f32 %v388_v8, %v200_v20  ;;  %v432_v23 = vpop.f32.mrb[3].mxu0  ;;  %v436_v24 = vpop.f32.mrb[3].mxu1  ;;  %v226_v25 = vadd.f32 %v417_v9, %v198_v14  ;;  %v224_v26 = vadd.f32 %v413_v10, %v190_v13 }
 0x151   :  { %v236_v28 = vsel %vm145_vm1, %v226_v25, 0.0  ;;  %v230_v29 = vsel %vm145_vm1, %v224_v26, 0.0  ;;  %v227_v30 = vadd.f32 %v418_v17, %v201_v22  ;;  %v225_v31 = vadd.f32 %v414_v18, %v193_v21 }
 0x152   :  { %237 = vadd.xlane.f32.xlu1 %v236_v28  ;;  %231 = vadd.xlane.f32.xlu0 %v230_v29 }
 0x153   :  { %v239_v37 = vsel %vm145_vm1, %v227_v30, 0.0  ;;  %v233_v38 = vsel %vm145_vm1, %v225_v31, 0.0 }
 0x154   :  { %v205_v34 = vpop.f32.mrb[4].mxu1 }
 0x155   :  { %v206_v35 = vadd.f32 %v388_v8, %v205_v34  ;;  %v439_v36 = vpop.f32.mrb[5].mxu1  ;;  %v398_v34 = vld [vmem:[#allocation11] ss:$0 sm:$0xff] }
 0x156   :  { %240 = vadd.xlane.f32.xlu1 %v239_v37  ;;  %v208_v40 = vpop.f32.mrb[6].mxu1  ;;  %234 = vadd.xlane.f32.xlu0 %v233_v38 }
 0x157   :  { %v209_v41 = vadd.f32 %v388_v8, %v208_v40  ;;  %v440_v42 = vpop.f32.mrb[7].mxu1  ;;  %v228_v43 = vadd.f32 %v222_v33, %v206_v35 }
 0x159   :  { %v242_v44 = vsel %vm145_vm1, %v228_v43, 0.0  ;;  %v229_v45 = vadd.f32 %v223_v39, %v209_v41 }
 0x15a   :  { %243 = vadd.xlane.f32.xlu0 %v242_v44 }
 0x15b   :  { %v246_v46 = vsel %vm245_vm2, %v229_v45, 0.0 }
 0x15c   :  { %247 = vadd.xlane.f32.xlu1 %v246_v46 }
 0x1df   :  { %v238_v47 = vpop.xlane.xlu1 %237  ;;  %v232_v48 = vpop.xlane.xlu0 %231 }
 0x1e0   :  { %v252_v49 = vmul.f32 0.03125, %v238_v47  ;;  %v250_v50 = vmul.f32 0.03125, %v232_v48 }
 0x1e2   :  { %v783_v51 = vsub.f32 %v226_v25, %v252_v49  ;;  %v256_v52 = vsub.f32 %v224_v26, %v250_v50 }
 0x1e3   :  { %v241_v53 = vpop.xlane.xlu1 %240  ;;  %v235_v54 = vpop.xlane.xlu0 %234 }
 0x1e4   :  { %v253_v55 = vmul.f32 0.03125, %v241_v53  ;;  %v251_v56 = vmul.f32 0.03125, %v235_v54  ;;  %v262_v57 = vmul.f32 %v256_v52, %v256_v52  ;;  %v264_v58 = vmul.f32 %v783_v51, %v783_v51 }
 0x1e6   :  { %v787_v59 = vsub.f32 %v227_v30, %v253_v55  ;;  %v257_v60 = vsub.f32 %v225_v31, %v251_v56  ;;  %v268_v61 = vsel %vm145_vm1, %v262_v57, 0.0  ;;  %v274_v2 = vsel %vm145_vm1, %v264_v58, 0.0  ;;  %v397_v31 = vld [vmem:[#allocation10] ss:$0 sm:$0xff] }
 0x1e7   :  { %269 = vadd.xlane.f32.xlu0 %v268_v61  ;;  %v244_v62 = vpop.xlane.xlu0 %243 }
 0x1e8   :  { %v254_v63 = vmul.f32 0.03125, %v244_v62  ;;  %v263_v0 = vmul.f32 %v257_v60, %v257_v60  ;;  %v265_v6 = vmul.f32 %v787_v59, %v787_v59 }
 0x1e9   :  { %v248_v1 = vpop.xlane.xlu1 %247 }
 0x1ea   :  { %v260_v3 = vsub.f32 %v228_v43, %v254_v63  ;;  %v255_v4 = vmul.f32 0.03125, %v248_v1  ;;  %v271_v5 = vsel %vm145_vm1, %v263_v0, 0.0  ;;  %v277_v9 = vsel %vm145_vm1, %v265_v6, 0.0 }
 0x1eb   :  { %275 = vadd.xlane.f32.xlu0 %v274_v2  ;;  %272 = vadd.xlane.f32.xlu1 %v271_v5 }
 0x1ec   :  { %v261_v7 = vsub.f32 %v229_v45, %v255_v4  ;;  %v266_v8 = vmul.f32 %v260_v3, %v260_v3 }
 0x1ee   :  { %v280_v10 = vsel %vm145_vm1, %v266_v8, 0.0  ;;  %v267_v11 = vmul.f32 %v261_v7, %v261_v7 }
 0x1ef   :  { %278 = vadd.xlane.f32.xlu1 %v277_v9  ;;  %281 = vadd.xlane.f32.xlu0 %v280_v10 }
 0x1f0   :  { %v283_v12 = vsel %vm245_vm2, %v267_v11, 0.0 }
 0x1f3   :  { %284 = vadd.xlane.f32.xlu1 %v283_v12 }
 0x274   :  { %v270_v13 = vpop.xlane.xlu0 %269 }
 0x275   :  { %v286_v14 = vmul.f32 0.03125, %v270_v13 }
 0x277   :  { %v292_v15 = vadd.f32 1e-12, %v286_v14 }
 0x278   :  { %v273_v16 = vpop.xlane.xlu1 %272  ;;  %v276_v17 = vpop.xlane.xlu0 %275 }
 0x279   :  { %461 = vrsqrt.f32 %v292_v15  ;;  %v287_v18 = vmul.f32 0.03125, %v273_v16  ;;  %v288_v19 = vmul.f32 0.03125, %v276_v17 }
 0x27b   :  { %v293_v20 = vadd.f32 1e-12, %v287_v18  ;;  %v294_v21 = vadd.f32 1e-12, %v288_v19 }
 0x27c   :  { %v279_v22 = vpop.xlane.xlu1 %278  ;;  %v282_v23 = vpop.xlane.xlu0 %281 }
 0x27d   :  { %463 = vrsqrt.f32 %v293_v20  ;;  %v289_v24 = vmul.f32 0.03125, %v279_v22  ;;  %v290_v25 = vmul.f32 0.03125, %v282_v23 }
 0x27e   :  { %465 = vrsqrt.f32 %v294_v21 }
 0x27f   :  { %v295_v26 = vadd.f32 1e-12, %v289_v24  ;;  %v296_v27 = vadd.f32 1e-12, %v290_v25 }
 0x280   :  { %v285_v28 = vpop.xlane.xlu1 %284 }
 0x281   :  { %467 = vrsqrt.f32 %v295_v26  ;;  %v291_v29 = vmul.f32 0.03125, %v285_v28 }
 0x282   :  { %469 = vrsqrt.f32 %v296_v27 }
 0x283   :  { %v462_v30 = vpop.eup %461  ;;  %v297_v32 = vadd.f32 1e-12, %v291_v29 }
 0x284   :  { %v304_v33 = vmul.f32 %v462_v30, %v256_v52 }
 0x285   :  { %471 = vrsqrt.f32 %v297_v32 }
 0x286   :  { %v317_v35 = vmul.f32 %v397_v31, %v304_v33 }
 0x287   :  { %v464_v36 = vpop.eup %463 }
 0x288   :  { %v466_v37 = vpop.eup %465  ;;  %v330_v38 = vadd.f32 %v398_v34, %v317_v35  ;;  %v305_v39 = vmul.f32 %v464_v36, %v257_v60 }
 0x289   :  { %v306_v40 = vmul.f32 %v466_v37, %v783_v51 }
 0x28a   :  { %v405_v41 = vpack.c.bf16 %v330_v38, %v330_v38  ;;  %v318_v42 = vmul.f32 %v397_v31, %v305_v39 }
 0x28b   :  { %v468_v43 = vpop.eup %467  ;;  %v319_v44 = vmul.f32 %v397_v31, %v306_v40 }
 0x28c   :  { %v470_v45 = vpop.eup %469  ;;  %v331_v46 = vadd.f32 %v398_v34, %v318_v42  ;;  %v307_v47 = vmul.f32 %v468_v43, %v787_v59  ;;  %361 = vst.msk [vmem:[#allocation13] sm:$0xf] %vm360_vm3, %v405_v41 }
 0x28d   :  { %v332_v48 = vadd.f32 %v398_v34, %v319_v44  ;;  %v308_v49 = vmul.f32 %v470_v45, %v260_v3 }
 0x28e   :  { %v406_v50 = vpack.c.bf16 %v331_v46, %v331_v46  ;;  %v320_v52 = vmul.f32 %v397_v31, %v307_v47 }
 0x28f   :  { %v472_v53 = vpop.eup %471  ;;  %v407_v54 = vpack.c.bf16 %v332_v48, %v332_v48  ;;  %v321_v55 = vmul.f32 %v397_v31, %v308_v49 }
 0x290   :  { %v333_v56 = vadd.f32 %v398_v34, %v320_v52  ;;  %v309_v51 = vmul.f32 %v472_v53, %v261_v7  ;;  %362 = vst.msk [vmem:[#allocation13 + $0x4] sm:$0xf] %vm360_vm3, %v406_v50 }
 0x291   :  { %v334_v57 = vadd.f32 %v398_v34, %v321_v55  ;;  %363 = vst.msk [vmem:[#allocation13 + $0x8] sm:$0xf] %vm360_vm3, %v407_v54 }
 0x292   :  { %v408_v58 = vpack.c.bf16 %v333_v56, %v333_v56  ;;  %v322_v60 = vmul.f32 %v397_v31, %v309_v51 }
 0x293   :  { %v409_v61 = vpack.c.bf16 %v334_v57, %v334_v57 }
 0x294   :  { %v335_v59 = vadd.f32 %v398_v34, %v322_v60  ;;  %364 = vst.msk [vmem:[#allocation13 + $0xc] sm:$0xf] %vm360_vm3, %v408_v58 }
 0x295   :  { %365 = vst.msk [vmem:[#allocation13 + $0x10] sm:$0xf] %vm360_vm3, %v409_v61 }
 0x296   :  { %v410_v62 = vpack.c.bf16 %v335_v59, %v335_v59 }
 0x298   :  { %367 = vst.msk [vmem:[#allocation13 + $0x14] sm:$0x7] %vm366_vm4, %v410_v62 }
 0x299   :  { %616 = shalt.err (!%p613_p10)
}
 0x29a   :  { %s617_s27 = scalar_lea.hbm %s825_s6, 384 }
 0x29b   :  { %p618_p11 = scmp.ne.s32.totalorder %s825_s6, %s617_s27  ;;  %p621_p12 = scmp.lt.u32.totalorder %s617_s27, %s825_s6 }
 0x29d   :  { %p623_p13 = pnand %p621_p12, %p618_p11 }
 0x29f   :  { %626 = shalt.err (!%p623_p13)
}
 0x2a0   :  { %379 = dma.vmem_to_hbm [thread:$0]  %s374_s21, 384, %s825_s6, [#allocation4], %s639_s9, %s639_s9, %s640_s10  }
 0x2a1   :  { %635 = dma.done.wait [#allocation4], 384  }
 0x2a2   :  { %636 = vsyncadd [#allocation4], 4294966912 }
 0x2a3   :  { %383 = vsyncpa [#allocation3], 1 }
 0x2a4   :  { %384 = vsyncpa [#allocation6], 1 }
 0x2a5   :  { %385 = vsyncpa [#allocation9], 1 }
 0x2a6   :  { %386 = vsyncpa [#allocation12], 1 }
 0x2a7   :  { %387 = vsyncpa [#allocation4], 1 }

// kernel: splicebert_for_token_cls_forward.16
= control target key start
LH: loop header
LB: loop body
LE: loop exit
PB: predicated region body
PF: predicated region fallthrough
CT: control target
= control target key end

     0   :  { %8 = vsyncpa [#allocation3], 0  ;;  %s542_s0 = inlined_call_operand.hbm [shape: bf16[46,32], index: 0, kind: input, shape index: {}]   ;;  %s543_s1 = inlined_call_operand.hbm [shape: bf16[32,64], index: 1, kind: input, shape index: {}]   ;;  %s544_s2 = inlined_call_operand.hbm [shape: f32[1,64], index: 2, kind: input, shape index: {}]   ;;  %s545_s3 = inlined_call_operand.hbm [shape: bf16[46,64], index: 3, kind: output, shape index: {}]  }
   0x1   :  { %9 = vsyncpa [#allocation6], 0 }
   0x2   :  { %10 = vsyncpa [#allocation4], 0  ;;  %s435_s12 = smov [#allocation5]   ;;  %s436_s14 = smov [#allocation2]  }
   0x3   :  { %s28_s13 = sshll.u32 %s435_s12, 4  ;;  %s16_s15 = sshll.u32 %s436_s14, 4  ;;  %s29_s13 = int_to_ptr.vmem [resolvable:$true] %s28_s13  ;;  %s463_s15 = int_to_ptr.vmem [resolvable:$true] %s16_s15 }
   0x4   :  { %s341_s18 = scalar_lea.hbm %s543_s1, 256 }
   0x5   :  { %p342_p0 = scmp.ne.s32.totalorder %s543_s1, %s341_s18  ;;  %p345_p1 = scmp.lt.u32.totalorder %s341_s18, %s543_s1 }
   0x7   :  { %p347_p2 = pnand %p345_p1, %p342_p0 }
   0x9   :  { %350 = shalt.err (!%p347_p2)
}
   0xa   :  { %s351_s23 = scalar_lea.vmem %s29_s13, 256  ;;  %p356_p4 = scmp.lt.s32.totalorder %s29_s13, %s29_s13 }
   0xb   :  { %p352_p3 = scmp.ne.s32.totalorder %s29_s13, %s351_s23  ;;  %p357_p5 = scmp.lt.s32.totalorder %s351_s23, %s351_s23 }
   0xd   :  { %p358_p6 = por %p357_p5, %p356_p4 }
   0xf   :  { %p359_p7 = pnand %p358_p6, %p352_p3 }
  0x11   :  { %362 = shalt.err (!%p359_p7)
}
  0x12   :  { %s437_s24 = smov 64   ;;  %s438_s25 = smov 4  }
  0x13   :  { %34 = dma.hbm_to_vmem [thread:$0]  %s543_s1, 256, %s29_s13, [#allocation6], %s437_s24, %s437_s24, %s438_s25  }
  0x14   :  { %s363_s30 = scalar_lea.hbm %s542_s0, 384 }
  0x15   :  { %p364_p8 = scmp.ne.s32.totalorder %s542_s0, %s363_s30  ;;  %p367_p9 = scmp.lt.u32.totalorder %s363_s30, %s542_s0 }
  0x17   :  { %p369_p10 = pnand %p367_p9, %p364_p8 }
  0x19   :  { %372 = shalt.err (!%p369_p10)
}
  0x1a   :  { %s373_s8 = scalar_lea.vmem %s463_s15, 384  ;;  %p378_p12 = scmp.lt.s32.totalorder %s463_s15, %s463_s15 }
  0x1b   :  { %p374_p11 = scmp.ne.s32.totalorder %s463_s15, %s373_s8  ;;  %p379_p13 = scmp.lt.s32.totalorder %s373_s8, %s373_s8 }
  0x1d   :  { %p380_p0 = por %p379_p13, %p378_p12 }
  0x1f   :  { %p381_p1 = pnand %p380_p0, %p374_p11 }
  0x21   :  { %384 = shalt.err (!%p381_p1)
}
  0x22   :  { %22 = dma.hbm_to_vmem [thread:$0]  %s542_s0, 384, %s463_s15, [#allocation3], %s437_s24, %s437_s24, %s438_s25  }
  0x23   :  { %s439_s10 = smov [#allocation7]   ;;  %s385_s14 = scalar_lea.hbm %s544_s2, 16 }
  0x24   :  { %s41_s11 = sshll.u32 %s439_s10, 4  ;;  %p386_p2 = scmp.ne.s32.totalorder %s544_s2, %s385_s14  ;;  %s42_s11 = int_to_ptr.vmem [resolvable:$true] %s41_s11 }
  0x25   :  { %p389_p3 = scmp.lt.u32.totalorder %s385_s14, %s544_s2 }
  0x27   :  { %p391_p4 = pnand %p389_p3, %p386_p2 }
  0x29   :  { %394 = shalt.err (!%p391_p4)
}
  0x2a   :  { %s395_s20 = scalar_lea.vmem %s42_s11, 16  ;;  %s399_s0 = scalar_lea.vmem %s42_s11, 32 }
  0x2b   :  { %p396_p5 = scmp.ne.s32.totalorder %s42_s11, %s395_s20  ;;  %p400_p6 = scmp.lt.s32.totalorder %s42_s11, %s42_s11 }
  0x2c   :  { %p401_p7 = scmp.lt.s32.totalorder %s399_s0, %s395_s20 }
  0x2e   :  { %p402_p8 = por %p401_p7, %p400_p6 }
  0x30   :  { %p403_p9 = pnand %p402_p8, %p396_p5 }
  0x32   :  { %406 = shalt.err (!%p403_p9)
}
  0x33   :  { %44 = dma.hbm_to_vmem [thread:$0]  %s544_s2, 16, %s42_s11, [#allocation6]  }
  0x34   :  { %429 = dma.done.wait [#allocation3], 384  }
  0x35   :  { %430 = vsyncadd [#allocation3], 4294966912 }
  0x36   :  { %431 = dma.done.wait [#allocation6], 272  }
  0x37   :  { %432 = vsyncadd [#allocation6], 4294967024  ;;  %v440_v0 = vmov 0.0   ;;  %vm441_vm0 = vmmov 0   ;;  %v324_v1 = vld [vmem:[#allocation5] sm:$0xff]   ;;  %v325_v2 = vld [vmem:[#allocation5 + $0x8] sm:$0xff]  }
  0x38   :  { %296 = vmatprep.subr.bf16.mxu0 %v440_v0  ;;  %312 = vmatprep.subr.bf16.mxu1 %v440_v0  ;;  %v326_v3 = vld [vmem:[#allocation2] sm:$0xff]   ;;  %v327_v4 = vld [vmem:[#allocation2 + $0x8] sm:$0xff]   ;;  %vm99_vm1 = vcmask 261120   ;;  %v328_v5 = vld [vmem:[#allocation2 + $0x10] sm:$0x7f]   ;;  %vm244_vm2 = vcmask 519168  }
  0x39   :  { %300 = vmatprep.mubr.msk.bf16.mxu0 %vm441_vm0, %v440_v0  ;;  %304 = vmatprep.mubr.msk.bf16.mxu1 %vm441_vm0, %v440_v0  ;;  %v270_v6 = vld [vmem:[#allocation7] ss:$0 sm:$0xff]  ;;  %s442_s2 = smov [#allocation8]   ;;  %vm250_vm3 = vcmask 518144  }
  0x3a   :  { %297 = vmatpush3.bf16.msra.mxu0 %v324_v1  ;;  %314 = vmatpush3.bf16.msra.mxu1 %v324_v1  ;;  %s257_s22 = sshll.u32 %s442_s2, 4  ;;  %s258_s22 = int_to_ptr.vmem [resolvable:$true] %s257_s22 }
  0x3b   :  { %298 = vmatprep.subr.bf16.mxu0 %v440_v0  ;;  %313 = vmatprep.subr.bf16.mxu1 %v440_v0  ;;  %s407_s23 = scalar_lea.vmem %s258_s22, 384  ;;  %p412_p11 = scmp.lt.s32.totalorder %s258_s22, %s258_s22 }
  0x3c   :  { %p408_p10 = scmp.ne.s32.totalorder %s258_s22, %s407_s23  ;;  %p413_p12 = scmp.lt.s32.totalorder %s407_s23, %s407_s23 }
  0x3e   :  { %299 = vmatpush3.bf16.msra.mxu0 %v325_v2  ;;  %315 = vmatpush3.bf16.msra.mxu1 %v325_v2  ;;  %p414_p13 = por %p413_p12, %p412_p11 }
  0x40   :  { %p415_p0 = pnand %p414_p13, %p408_p10 }
  0x41   :  { %301 = vmatmul.mubr.msk.bf16.vlgmr.msra.gmra.mrb[0].mxu0 %vm99_vm1, %v326_v3  ;;  %305 = vmatmul.mubr.msk.bf16.vlgmr.msra.gmra.mrb[0].mxu1 %vm99_vm1, %v327_v4 }
  0x42   :  { %308 = vmatprep.mubr.msk.bf16.mxu1 %vm441_vm0, %v440_v0 }
  0x49   :  { %309 = vmatmul.mubr.msk.bf16.gmra.mrb[4].mxu1 %vm99_vm1, %v328_v5 }
 0x114   :  { %v143_v7 = vpop.f32.mrb[0].mxu0  ;;  %v151_v8 = vpop.f32.mrb[0].mxu1 }
 0x115   :  { %v144_v9 = vadd.f32 %v270_v6, %v143_v7  ;;  %v515_v10 = vadd.f32 %v270_v6, %v151_v8  ;;  %v302_v11 = vpop.f32.mrb[1].mxu0  ;;  %v306_v12 = vpop.f32.mrb[1].mxu1 }
 0x116   :  { %v146_v13 = vpop.f32.mrb[2].mxu0  ;;  %v154_v14 = vpop.f32.mrb[2].mxu1 }
 0x117   :  { %v166_v15 = vmul.f32 %v144_v9, %v144_v9  ;;  %v168_v16 = vmul.f32 %v515_v10, %v515_v10  ;;  %v147_v17 = vadd.f32 %v270_v6, %v146_v13  ;;  %v155_v18 = vadd.f32 %v270_v6, %v154_v14  ;;  %v307_v19 = vpop.f32.mrb[3].mxu1  ;;  %v303_v20 = vpop.f32.mrb[3].mxu0 }
 0x119   :  { %v172_v21 = vmul.f32 %v166_v15, %v144_v9  ;;  %v174_v22 = vmul.f32 %v168_v16, %v515_v10  ;;  %v167_v23 = vmul.f32 %v147_v17, %v147_v17  ;;  %v169_v24 = vmul.f32 %v155_v18, %v155_v18 }
 0x11b   :  { %v178_v25 = vmul.f32 0.044715, %v172_v21  ;;  %v180_v26 = vmul.f32 0.044715, %v174_v22  ;;  %v173_v27 = vmul.f32 %v167_v23, %v147_v17  ;;  %v175_v28 = vmul.f32 %v169_v24, %v155_v18 }
 0x11c   :  { %v159_v29 = vpop.f32.mrb[4].mxu1 }
 0x11d   :  { %v184_v30 = vadd.f32 %v178_v25, %v144_v9  ;;  %v186_v31 = vadd.f32 %v180_v26, %v515_v10  ;;  %v179_v32 = vmul.f32 0.044715, %v173_v27  ;;  %v181_v33 = vmul.f32 0.044715, %v175_v28  ;;  %v310_v34 = vpop.f32.mrb[5].mxu1 }
 0x11e   :  { %v160_v35 = vadd.f32 %v270_v6, %v159_v29  ;;  %v162_v36 = vpop.f32.mrb[6].mxu1 }
 0x11f   :  { %v190_v37 = vmul.f32 0.7978846, %v184_v30  ;;  %v192_v38 = vmul.f32 0.7978846, %v186_v31  ;;  %v185_v39 = vadd.f32 %v179_v32, %v147_v17  ;;  %v187_v40 = vadd.f32 %v181_v33, %v155_v18  ;;  %v311_v41 = vpop.f32.mrb[7].mxu1 }
 0x120   :  { %v170_v42 = vmul.f32 %v160_v35, %v160_v35  ;;  %v163_v43 = vadd.f32 %v270_v6, %v162_v36 }
 0x121   :  { %329 = vtanh.f32 %v190_v37  ;;  %v191_v44 = vmul.f32 0.7978846, %v185_v39  ;;  %v193_v45 = vmul.f32 0.7978846, %v187_v40 }
 0x122   :  { %331 = vtanh.f32 %v192_v38  ;;  %v176_v46 = vmul.f32 %v170_v42, %v160_v35  ;;  %v171_v47 = vmul.f32 %v163_v43, %v163_v43 }
 0x123   :  { %333 = vtanh.f32 %v191_v44 }
 0x124   :  { %335 = vtanh.f32 %v193_v45  ;;  %v182_v48 = vmul.f32 0.044715, %v176_v46  ;;  %v177_v49 = vmul.f32 %v171_v47, %v163_v43 }
 0x126   :  { %v188_v50 = vadd.f32 %v182_v48, %v160_v35  ;;  %v183_v51 = vmul.f32 0.044715, %v177_v49 }
 0x128   :  { %v194_v52 = vmul.f32 0.7978846, %v188_v50  ;;  %v189_v53 = vadd.f32 %v183_v51, %v163_v43 }
 0x12a   :  { %337 = vtanh.f32 %v194_v52  ;;  %v195_v54 = vmul.f32 0.7978846, %v189_v53 }
 0x12b   :  { %v330_v55 = vpop.eup %329 }
 0x12c   :  { %v332_v56 = vpop.eup %331  ;;  %v202_v57 = vadd.f32 1.0, %v330_v55  ;;  %339 = vtanh.f32 %v195_v54 }
 0x12d   :  { %v334_v58 = vpop.eup %333  ;;  %v204_v59 = vadd.f32 1.0, %v332_v56 }
 0x12e   :  { %v336_v60 = vpop.eup %335  ;;  %v208_v61 = vmul.f32 0.5, %v202_v57  ;;  %v203_v62 = vadd.f32 1.0, %v334_v58 }
 0x12f   :  { %v210_v63 = vmul.f32 0.5, %v204_v59  ;;  %v205_v0 = vadd.f32 1.0, %v336_v60 }
 0x130   :  { %v214_v1 = vmul.f32 %v208_v61, %v144_v9  ;;  %v209_v2 = vmul.f32 0.5, %v203_v62 }
 0x131   :  { %v216_v3 = vmul.f32 %v210_v63, %v515_v10  ;;  %v211_v4 = vmul.f32 0.5, %v205_v0 }
 0x132   :  { %v285_v5 = vpack.c.bf16 %v214_v1, %v214_v1  ;;  %v215_v6 = vmul.f32 %v209_v2, %v147_v17 }
 0x133   :  { %v287_v7 = vpack.c.bf16 %v216_v3, %v216_v3  ;;  %v217_v8 = vmul.f32 %v211_v4, %v155_v18 }
 0x134   :  { %v338_v11 = vpop.eup %337  ;;  %245 = vst.msk [vmem:[#allocation8] sm:$0xf] %vm244_vm2, %v285_v5  ;;  %v286_v12 = vpack.c.bf16 %v215_v6, %v215_v6 }
 0x135   :  { %247 = vst.msk [vmem:[#allocation8 + $0x8] sm:$0xf] %vm244_vm2, %v287_v7  ;;  %v288_v13 = vpack.c.bf16 %v217_v8, %v217_v8  ;;  %v206_v14 = vadd.f32 1.0, %v338_v11 }
 0x136   :  { %v340_v15 = vpop.eup %339  ;;  %246 = vst.msk [vmem:[#allocation8 + $0x4] sm:$0xf] %vm244_vm2, %v286_v12 }
 0x137   :  { %248 = vst.msk [vmem:[#allocation8 + $0xc] sm:$0xf] %vm244_vm2, %v288_v13  ;;  %v212_v9 = vmul.f32 0.5, %v206_v14  ;;  %v207_v10 = vadd.f32 1.0, %v340_v15 }
 0x139   :  { %v218_v16 = vmul.f32 %v212_v9, %v160_v35  ;;  %v213_v19 = vmul.f32 0.5, %v207_v10 }
 0x13b   :  { %v289_v17 = vpack.c.bf16 %v218_v16, %v218_v16  ;;  %v219_v18 = vmul.f32 %v213_v19, %v163_v43 }
 0x13d   :  { %249 = vst.msk [vmem:[#allocation8 + $0x10] sm:$0xf] %vm244_vm2, %v289_v17  ;;  %v290_v20 = vpack.c.bf16 %v219_v18, %v219_v18 }
 0x13f   :  { %251 = vst.msk [vmem:[#allocation8 + $0x14] sm:$0x7] %vm250_vm3, %v290_v20 }
 0x140   :  { %418 = shalt.err (!%p415_p0)
}
 0x141   :  { %s419_s28 = scalar_lea.hbm %s545_s3, 384 }
 0x142   :  { %p420_p1 = scmp.ne.s32.totalorder %s545_s3, %s419_s28  ;;  %p423_p2 = scmp.lt.u32.totalorder %s419_s28, %s545_s3 }
 0x144   :  { %p425_p3 = pnand %p423_p2, %p420_p1 }
 0x146   :  { %428 = shalt.err (!%p425_p3)
}
 0x147   :  { %263 = dma.vmem_to_hbm [thread:$0]  %s258_s22, 384, %s545_s3, [#allocation4], %s437_s24, %s437_s24, %s438_s25  }
 0x148   :  { %433 = dma.done.wait [#allocation4], 384  }
 0x149   :  { %434 = vsyncadd [#allocation4], 4294966912 }
 0x14a   :  { %267 = vsyncpa [#allocation3], 1 }
 0x14b   :  { %268 = vsyncpa [#allocation6], 1 }
 0x14c   :  { %269 = vsyncpa [#allocation4], 1 }

// kernel: splicebert_for_token_cls_forward.17
= control target key start
LH: loop header
LB: loop body
LE: loop exit
PB: predicated region body
PF: predicated region fallthrough
CT: control target
= control target key end

     0   :  { %11 = vsyncpa [#allocation3], 0  ;;  %s847_s0 = inlined_call_operand.hbm [shape: bf16[46,64], index: 0, kind: input, shape index: {}]   ;;  %s848_s1 = inlined_call_operand.hbm [shape: bf16[64,32], index: 1, kind: input, shape index: {}]   ;;  %s849_s2 = inlined_call_operand.hbm [shape: f32[1,32], index: 2, kind: input, shape index: {}, may-alias: {2,5}]   ;;  %s850_s3 = inlined_call_operand.hbm [shape: bf16[46,32], index: 3, kind: input, shape index: {}]   ;;  %s851_s4 = inlined_call_operand.hbm [shape: f32[1,32], index: 4, kind: input, shape index: {}]   ;;  %s852_s5 = inlined_call_operand.hbm [shape: f32[1,32], index: 5, kind: input, shape index: {}, may-alias: {2,5}]   ;;  %s853_s6 = inlined_call_operand.hbm [shape: bf16[46,32], index: 6, kind: output, shape index: {}]  }
   0x1   :  { %12 = vsyncpa [#allocation6], 0 }
   0x2   :  { %13 = vsyncpa [#allocation9], 0 }
   0x3   :  { %14 = vsyncpa [#allocation12], 0 }
   0x4   :  { %15 = vsyncpa [#allocation4], 0  ;;  %s668_s21 = smov [#allocation5]   ;;  %s669_s23 = smov [#allocation8]  }
   0x5   :  { %s33_s22 = sshll.u32 %s668_s21, 4  ;;  %s55_s24 = sshll.u32 %s669_s23, 4  ;;  %s34_s22 = int_to_ptr.vmem [resolvable:$true] %s33_s22  ;;  %s714_s24 = int_to_ptr.vmem [resolvable:$true] %s55_s24 }
   0x6   :  { %s504_s27 = scalar_lea.hbm %s848_s1, 512 }
   0x7   :  { %p505_p0 = scmp.ne.s32.totalorder %s848_s1, %s504_s27  ;;  %p508_p1 = scmp.lt.u32.totalorder %s504_s27, %s848_s1 }
   0x9   :  { %p510_p2 = pnand %p508_p1, %p505_p0 }
   0xb   :  { %513 = shalt.err (!%p510_p2)
}
   0xc   :  { %s514_s8 = scalar_lea.vmem %s34_s22, 512  ;;  %p519_p4 = scmp.lt.s32.totalorder %s34_s22, %s34_s22 }
   0xd   :  { %p515_p3 = scmp.ne.s32.totalorder %s34_s22, %s514_s8  ;;  %p520_p5 = scmp.lt.s32.totalorder %s514_s8, %s514_s8 }
   0xf   :  { %p521_p6 = por %p520_p5, %p519_p4 }
  0x11   :  { %p522_p7 = pnand %p521_p6, %p515_p3 }
  0x13   :  { %525 = shalt.err (!%p522_p7)
}
  0x14   :  { %s670_s9 = smov 64   ;;  %s671_s10 = smov 4  }
  0x15   :  { %39 = dma.hbm_to_vmem [thread:$0]  %s848_s1, 512, %s34_s22, [#allocation6], %s670_s9, %s670_s9, %s671_s10  }
  0x16   :  { %s526_s15 = scalar_lea.hbm %s850_s3, 384 }
  0x17   :  { %p527_p8 = scmp.ne.s32.totalorder %s850_s3, %s526_s15  ;;  %p530_p9 = scmp.lt.u32.totalorder %s526_s15, %s850_s3 }
  0x19   :  { %p532_p10 = pnand %p530_p9, %p527_p8 }
  0x1b   :  { %535 = shalt.err (!%p532_p10)
}
  0x1c   :  { %s536_s20 = scalar_lea.vmem %s714_s24, 384  ;;  %p541_p12 = scmp.lt.s32.totalorder %s714_s24, %s714_s24 }
  0x1d   :  { %p537_p11 = scmp.ne.s32.totalorder %s714_s24, %s536_s20  ;;  %p542_p13 = scmp.lt.s32.totalorder %s536_s20, %s536_s20 }
  0x1f   :  { %p543_p0 = por %p542_p13, %p541_p12 }
  0x21   :  { %p544_p1 = pnand %p543_p0, %p537_p11 }
  0x23   :  { %547 = shalt.err (!%p544_p1)
}
  0x24   :  { %61 = dma.hbm_to_vmem [thread:$0]  %s850_s3, 384, %s714_s24, [#allocation9], %s670_s9, %s670_s9, %s671_s10  }
  0x25   :  { %s672_s22 = smov [#allocation2]   ;;  %s673_s25 = smov [#allocation7]  }
  0x26   :  { %s21_s23 = sshll.u32 %s672_s22, 4  ;;  %s46_s26 = sshll.u32 %s673_s25, 4  ;;  %s22_s23 = int_to_ptr.vmem [resolvable:$true] %s21_s23  ;;  %s47_s26 = int_to_ptr.vmem [resolvable:$true] %s46_s26 }
  0x27   :  { %s548_s29 = scalar_lea.hbm %s847_s0, 384 }
  0x28   :  { %p549_p2 = scmp.ne.s32.totalorder %s847_s0, %s548_s29  ;;  %p552_p3 = scmp.lt.u32.totalorder %s548_s29, %s847_s0 }
  0x2a   :  { %p554_p4 = pnand %p552_p3, %p549_p2 }
  0x2c   :  { %557 = shalt.err (!%p554_p4)
}
  0x2d   :  { %s558_s3 = scalar_lea.vmem %s22_s23, 384  ;;  %p563_p6 = scmp.lt.s32.totalorder %s22_s23, %s22_s23 }
  0x2e   :  { %p559_p5 = scmp.ne.s32.totalorder %s22_s23, %s558_s3  ;;  %p564_p7 = scmp.lt.s32.totalorder %s558_s3, %s558_s3 }
  0x30   :  { %p565_p8 = por %p564_p7, %p563_p6 }
  0x32   :  { %p566_p9 = pnand %p565_p8, %p559_p5 }
  0x34   :  { %569 = shalt.err (!%p566_p9)
}
  0x35   :  { %27 = dma.hbm_to_vmem [thread:$0]  %s847_s0, 384, %s22_s23, [#allocation3], %s670_s9, %s670_s9, %s671_s10  }
  0x36   :  { %s570_s15 = scalar_lea.hbm %s849_s2, 16 }
  0x37   :  { %p571_p10 = scmp.ne.s32.totalorder %s849_s2, %s570_s15  ;;  %p574_p11 = scmp.lt.u32.totalorder %s570_s15, %s849_s2 }
  0x39   :  { %p576_p12 = pnand %p574_p11, %p571_p10 }
  0x3b   :  { %579 = shalt.err (!%p576_p12)
}
  0x3c   :  { %s580_s20 = scalar_lea.vmem %s47_s26, 16  ;;  %s584_s1 = scalar_lea.vmem %s47_s26, 32 }
  0x3d   :  { %p581_p13 = scmp.ne.s32.totalorder %s47_s26, %s580_s20  ;;  %p585_p0 = scmp.lt.s32.totalorder %s47_s26, %s47_s26 }
  0x3e   :  { %p586_p1 = scmp.lt.s32.totalorder %s584_s1, %s580_s20 }
  0x40   :  { %p587_p2 = por %p586_p1, %p585_p0 }
  0x42   :  { %p588_p3 = pnand %p587_p2, %p581_p13 }
  0x44   :  { %591 = shalt.err (!%p588_p3)
}
  0x45   :  { %49 = dma.hbm_to_vmem [thread:$0]  %s849_s2, 16, %s47_s26, [#allocation6]  }
  0x46   :  { %s674_s22 = smov [#allocation10]   ;;  %s675_s25 = smov [#allocation11]  }
  0x47   :  { %s68_s23 = sshll.u32 %s674_s22, 4  ;;  %s78_s27 = sshll.u32 %s675_s25, 4  ;;  %s69_s23 = int_to_ptr.vmem [resolvable:$true] %s68_s23  ;;  %s79_s27 = int_to_ptr.vmem [resolvable:$true] %s78_s27 }
  0x48   :  { %s592_s30 = scalar_lea.hbm %s851_s4, 16 }
  0x49   :  { %p593_p4 = scmp.ne.s32.totalorder %s851_s4, %s592_s30  ;;  %p596_p5 = scmp.lt.u32.totalorder %s592_s30, %s851_s4 }
  0x4b   :  { %p598_p6 = pnand %p596_p5, %p593_p4 }
  0x4d   :  { %601 = shalt.err (!%p598_p6)
}
  0x4e   :  { %s602_s2 = scalar_lea.vmem %s69_s23, 16  ;;  %s606_s26 = scalar_lea.vmem %s69_s23, 32 }
  0x4f   :  { %p603_p7 = scmp.ne.s32.totalorder %s69_s23, %s602_s2  ;;  %p607_p8 = scmp.lt.s32.totalorder %s69_s23, %s69_s23 }
  0x50   :  { %p608_p9 = scmp.lt.s32.totalorder %s606_s26, %s602_s2 }
  0x52   :  { %p609_p10 = por %p608_p9, %p607_p8 }
  0x54   :  { %p610_p11 = pnand %p609_p10, %p603_p7 }
  0x56   :  { %613 = shalt.err (!%p610_p11)
}
  0x57   :  { %71 = dma.hbm_to_vmem [thread:$0]  %s851_s4, 16, %s69_s23, [#allocation9]  }
  0x58   :  { %s614_s15 = scalar_lea.hbm %s852_s5, 16 }
  0x59   :  { %p615_p12 = scmp.ne.s32.totalorder %s852_s5, %s614_s15  ;;  %p618_p13 = scmp.lt.u32.totalorder %s614_s15, %s852_s5 }
  0x5b   :  { %p620_p0 = pnand %p618_p13, %p615_p12 }
  0x5d   :  { %623 = shalt.err (!%p620_p0)
}
  0x5e   :  { %s624_s20 = scalar_lea.vmem %s79_s27, 16  ;;  %s628_s1 = scalar_lea.vmem %s79_s27, 32 }
  0x5f   :  { %p625_p1 = scmp.ne.s32.totalorder %s79_s27, %s624_s20  ;;  %p629_p2 = scmp.lt.s32.totalorder %s79_s27, %s79_s27 }
  0x60   :  { %p630_p3 = scmp.lt.s32.totalorder %s628_s1, %s624_s20 }
  0x62   :  { %p631_p4 = por %p630_p3, %p629_p2 }
  0x64   :  { %p632_p5 = pnand %p631_p4, %p625_p1 }
  0x66   :  { %635 = shalt.err (!%p632_p5)
}
  0x67   :  { %81 = dma.hbm_to_vmem [thread:$0]  %s852_s5, 16, %s79_s27, [#allocation12]  }
  0x68   :  { %658 = dma.done.wait [#allocation3], 384  }
  0x69   :  { %659 = vsyncadd [#allocation3], 4294966912 }
  0x6a   :  { %660 = dma.done.wait [#allocation6], 528  }
  0x6b   :  { %661 = vsyncadd [#allocation6], 4294966768 }
  0x6c   :  { %662 = dma.done.wait [#allocation9], 400  }
  0x6d   :  { %663 = vsyncadd [#allocation9], 4294966896 }
  0x6e   :  { %664 = dma.done.wait [#allocation12], 16  }
  0x6f   :  { %665 = vsyncadd [#allocation12], 4294967280  ;;  %v676_v0 = vmov 0.0   ;;  %vm677_vm0 = vmmov 0   ;;  %v485_v1 = vld [vmem:[#allocation5] sm:$0xff]   ;;  %v486_v2 = vld [vmem:[#allocation5 + $0x8] sm:$0xff]  }
  0x70   :  { %446 = vmatprep.subr.bf16.mxu0 %v676_v0  ;;  %466 = vmatprep.subr.bf16.mxu1 %v676_v0  ;;  %v487_v3 = vld [vmem:[#allocation5 + $0x10] sm:$0xff]   ;;  %v488_v4 = vld [vmem:[#allocation5 + $0x18] sm:$0xff]   ;;  %v489_v5 = vld [vmem:[#allocation2] sm:$0xff]   ;;  %vm161_vm1 = vcmask 523264   ;;  %vm246_vm2 = vcmask 261120   ;;  %vm262_vm3 = vcmask 259072  }
  0x71   :  { %454 = vmatprep.mubr.msk.bf16.mxu0 %vm677_vm0, %v676_v0  ;;  %458 = vmatprep.mubr.msk.bf16.mxu1 %vm677_vm0, %v676_v0  ;;  %v490_v6 = vld [vmem:[#allocation2 + $0x8] sm:$0xff]   ;;  %v491_v7 = vld [vmem:[#allocation2 + $0x10] sm:$0x7f]   ;;  %v431_v9 = vld [vmem:[#allocation8] sm:$0xff]   ;;  %vm377_vm4 = vcmask 257024   ;;  %s678_s5 = smov [#allocation13]  }
  0x72   :  { %447 = vmatpush3.bf16.msra.mxu0 %v485_v1  ;;  %470 = vmatpush3.bf16.msra.mxu1 %v485_v1  ;;  %v438_v8 = vld [vmem:[#allocation8 + $0x8] sm:$0xff]   ;;  %v405_v10 = vld [vmem:[#allocation7] ss:$0 sm:$0xff]  ;;  %v432_v12 = vunpack.c.l.bf16 %v431_v9  ;;  %v433_v20 = vunpack.c.h.bf16 %v431_v9  ;;  %v232_v29 = vld [vmem:[#allocation8 + $0x10] sm:$0xf]  ;;  %s390_s21 = sshll.u32 %s678_s5, 4  ;;  %s391_s21 = int_to_ptr.vmem [resolvable:$true] %s390_s21 }
  0x73   :  { %448 = vmatprep.subr.bf16.mxu0 %v676_v0  ;;  %467 = vmatprep.subr.bf16.mxu1 %v676_v0  ;;  %v436_v11 = vunpack.c.l.bf16 %v438_v8  ;;  %v437_v19 = vunpack.c.h.bf16 %v438_v8  ;;  %v233_v34 = vld [vmem:[#allocation8 + $0x14] sm:$0x7]  ;;  %v238_v35 = vunpack.c.l.bf16 %v232_v29  ;;  %vm383_vm5 = vcmask 256000   ;;  %s636_s22 = scalar_lea.vmem %s391_s21, 384  ;;  %p641_p7 = scmp.lt.s32.totalorder %s391_s21, %s391_s21 }
  0x74   :  { %v239_v41 = vunpack.c.l.bf16 %v233_v34  ;;  %p637_p6 = scmp.ne.s32.totalorder %s391_s21, %s636_s22  ;;  %p642_p8 = scmp.lt.s32.totalorder %s636_s22, %s636_s22 }
  0x76   :  { %449 = vmatpush3.bf16.msra.mxu0 %v486_v2  ;;  %471 = vmatpush3.bf16.msra.mxu1 %v486_v2  ;;  %p643_p9 = por %p642_p8, %p641_p7 }
  0x77   :  { %450 = vmatprep.subr.bf16.mxu0 %v676_v0  ;;  %468 = vmatprep.subr.bf16.mxu1 %v676_v0 }
  0x78   :  { %p644_p10 = pnand %p643_p9, %p637_p6 }
  0x7a   :  { %451 = vmatpush3.bf16.msra.mxu0 %v487_v3  ;;  %472 = vmatpush3.bf16.msra.mxu1 %v487_v3 }
  0x7b   :  { %452 = vmatprep.subr.bf16.mxu0 %v676_v0  ;;  %469 = vmatprep.subr.bf16.mxu1 %v676_v0 }
  0x7e   :  { %453 = vmatpush3.bf16.msra.mxu0 %v488_v4  ;;  %473 = vmatpush3.bf16.msra.mxu1 %v488_v4 }
  0x81   :  { %455 = vmatmul.mubr.msk.bf16.vlgmr.msra.gmra.mrb[0].mxu0 %vm161_vm1, %v489_v5  ;;  %459 = vmatmul.mubr.msk.bf16.vlgmr.msra.gmra.mrb[0].mxu1 %vm161_vm1, %v490_v6 }
  0x82   :  { %462 = vmatprep.mubr.msk.bf16.mxu1 %vm677_vm0, %v676_v0 }
  0x89   :  { %463 = vmatmul.mubr.msk.bf16.gmra.mrb[4].mxu1 %vm161_vm1, %v491_v7 }
 0x154   :  { %v205_v13 = vpop.f32.mrb[0].mxu0  ;;  %v213_v14 = vpop.f32.mrb[0].mxu1 }
 0x155   :  { %v206_v15 = vadd.f32 %v405_v10, %v205_v13  ;;  %v214_v16 = vadd.f32 %v405_v10, %v213_v14  ;;  %v456_v17 = vpop.f32.mrb[1].mxu0  ;;  %v460_v18 = vpop.f32.mrb[1].mxu1 }
 0x156   :  { %v208_v21 = vpop.f32.mrb[2].mxu0  ;;  %v216_v22 = vpop.f32.mrb[2].mxu1 }
 0x157   :  { %v209_v23 = vadd.f32 %v405_v10, %v208_v21  ;;  %v217_v24 = vadd.f32 %v405_v10, %v216_v22  ;;  %v457_v25 = vpop.f32.mrb[3].mxu0  ;;  %v461_v26 = vpop.f32.mrb[3].mxu1  ;;  %v242_v27 = vadd.f32 %v436_v11, %v214_v16  ;;  %v240_v28 = vadd.f32 %v432_v12, %v206_v15 }
 0x159   :  { %v253_v30 = vsel %vm246_vm2, %v242_v27, 0.0  ;;  %v247_v31 = vsel %vm246_vm2, %v240_v28, 0.0  ;;  %v243_v32 = vadd.f32 %v437_v19, %v217_v24  ;;  %v241_v33 = vadd.f32 %v433_v20, %v209_v23 }
 0x15a   :  { %254 = vadd.xlane.f32.xlu1 %v253_v30  ;;  %248 = vadd.xlane.f32.xlu0 %v247_v31 }
 0x15b   :  { %v256_v39 = vsel %vm246_vm2, %v243_v32, 0.0  ;;  %v250_v40 = vsel %vm246_vm2, %v241_v33, 0.0 }
 0x15c   :  { %v221_v36 = vpop.f32.mrb[4].mxu1 }
 0x15d   :  { %v222_v37 = vadd.f32 %v405_v10, %v221_v36  ;;  %v464_v38 = vpop.f32.mrb[5].mxu1  ;;  %v417_v36 = vld [vmem:[#allocation11] ss:$0 sm:$0xff] }
 0x15e   :  { %257 = vadd.xlane.f32.xlu1 %v256_v39  ;;  %v224_v42 = vpop.f32.mrb[6].mxu1  ;;  %251 = vadd.xlane.f32.xlu0 %v250_v40 }
 0x15f   :  { %v225_v43 = vadd.f32 %v405_v10, %v224_v42  ;;  %v465_v44 = vpop.f32.mrb[7].mxu1  ;;  %v244_v45 = vadd.f32 %v238_v35, %v222_v37 }
 0x161   :  { %v259_v46 = vsel %vm246_vm2, %v244_v45, 0.0  ;;  %v245_v47 = vadd.f32 %v239_v41, %v225_v43 }
 0x162   :  { %260 = vadd.xlane.f32.xlu0 %v259_v46 }
 0x163   :  { %v263_v48 = vsel %vm262_vm3, %v245_v47, 0.0 }
 0x164   :  { %264 = vadd.xlane.f32.xlu1 %v263_v48 }
 0x1e7   :  { %v255_v49 = vpop.xlane.xlu1 %254  ;;  %v249_v50 = vpop.xlane.xlu0 %248 }
 0x1e8   :  { %v269_v51 = vmul.f32 0.03125, %v255_v49  ;;  %v267_v52 = vmul.f32 0.03125, %v249_v50 }
 0x1ea   :  { %v811_v53 = vsub.f32 %v242_v27, %v269_v51  ;;  %v273_v54 = vsub.f32 %v240_v28, %v267_v52 }
 0x1eb   :  { %v258_v55 = vpop.xlane.xlu1 %257  ;;  %v252_v56 = vpop.xlane.xlu0 %251 }
 0x1ec   :  { %v270_v57 = vmul.f32 0.03125, %v258_v55  ;;  %v268_v58 = vmul.f32 0.03125, %v252_v56  ;;  %v279_v59 = vmul.f32 %v273_v54, %v273_v54  ;;  %v281_v60 = vmul.f32 %v811_v53, %v811_v53 }
 0x1ee   :  { %v815_v61 = vsub.f32 %v243_v32, %v270_v57  ;;  %v274_v62 = vsub.f32 %v241_v33, %v268_v58  ;;  %v285_v63 = vsel %vm246_vm2, %v279_v59, 0.0  ;;  %v291_v4 = vsel %vm246_vm2, %v281_v60, 0.0  ;;  %v416_v33 = vld [vmem:[#allocation10] ss:$0 sm:$0xff] }
 0x1ef   :  { %286 = vadd.xlane.f32.xlu0 %v285_v63  ;;  %v261_v0 = vpop.xlane.xlu0 %260 }
 0x1f0   :  { %v271_v1 = vmul.f32 0.03125, %v261_v0  ;;  %v280_v2 = vmul.f32 %v274_v62, %v274_v62  ;;  %v282_v8 = vmul.f32 %v815_v61, %v815_v61 }
 0x1f1   :  { %v265_v3 = vpop.xlane.xlu1 %264 }
 0x1f2   :  { %v277_v5 = vsub.f32 %v244_v45, %v271_v1  ;;  %v272_v6 = vmul.f32 0.03125, %v265_v3  ;;  %v288_v7 = vsel %vm246_vm2, %v280_v2, 0.0  ;;  %v294_v11 = vsel %vm246_vm2, %v282_v8, 0.0 }
 0x1f3   :  { %292 = vadd.xlane.f32.xlu0 %v291_v4  ;;  %289 = vadd.xlane.f32.xlu1 %v288_v7 }
 0x1f4   :  { %v278_v9 = vsub.f32 %v245_v47, %v272_v6  ;;  %v283_v10 = vmul.f32 %v277_v5, %v277_v5 }
 0x1f6   :  { %v297_v12 = vsel %vm246_vm2, %v283_v10, 0.0  ;;  %v284_v13 = vmul.f32 %v278_v9, %v278_v9 }
 0x1f7   :  { %295 = vadd.xlane.f32.xlu1 %v294_v11  ;;  %298 = vadd.xlane.f32.xlu0 %v297_v12 }
 0x1f8   :  { %v300_v14 = vsel %vm262_vm3, %v284_v13, 0.0 }
 0x1fb   :  { %301 = vadd.xlane.f32.xlu1 %v300_v14 }
 0x27c   :  { %v287_v15 = vpop.xlane.xlu0 %286 }
 0x27d   :  { %v303_v16 = vmul.f32 0.03125, %v287_v15 }
 0x27f   :  { %v309_v17 = vadd.f32 1e-12, %v303_v16 }
 0x280   :  { %v290_v18 = vpop.xlane.xlu1 %289  ;;  %v293_v19 = vpop.xlane.xlu0 %292 }
 0x281   :  { %492 = vrsqrt.f32 %v309_v17  ;;  %v304_v20 = vmul.f32 0.03125, %v290_v18  ;;  %v305_v21 = vmul.f32 0.03125, %v293_v19 }
 0x283   :  { %v310_v22 = vadd.f32 1e-12, %v304_v20  ;;  %v311_v23 = vadd.f32 1e-12, %v305_v21 }
 0x284   :  { %v296_v24 = vpop.xlane.xlu1 %295  ;;  %v299_v25 = vpop.xlane.xlu0 %298 }
 0x285   :  { %494 = vrsqrt.f32 %v310_v22  ;;  %v306_v26 = vmul.f32 0.03125, %v296_v24  ;;  %v307_v27 = vmul.f32 0.03125, %v299_v25 }
 0x286   :  { %496 = vrsqrt.f32 %v311_v23 }
 0x287   :  { %v312_v28 = vadd.f32 1e-12, %v306_v26  ;;  %v313_v29 = vadd.f32 1e-12, %v307_v27 }
 0x288   :  { %v302_v30 = vpop.xlane.xlu1 %301 }
 0x289   :  { %498 = vrsqrt.f32 %v312_v28  ;;  %v308_v31 = vmul.f32 0.03125, %v302_v30 }
 0x28a   :  { %500 = vrsqrt.f32 %v313_v29 }
 0x28b   :  { %v493_v32 = vpop.eup %492  ;;  %v314_v34 = vadd.f32 1e-12, %v308_v31 }
 0x28c   :  { %v321_v35 = vmul.f32 %v493_v32, %v273_v54 }
 0x28d   :  { %502 = vrsqrt.f32 %v314_v34 }
 0x28e   :  { %v334_v37 = vmul.f32 %v416_v33, %v321_v35 }
 0x28f   :  { %v495_v38 = vpop.eup %494 }
 0x290   :  { %v497_v39 = vpop.eup %496  ;;  %v347_v40 = vadd.f32 %v417_v36, %v334_v37  ;;  %v322_v41 = vmul.f32 %v495_v38, %v274_v62 }
 0x291   :  { %v323_v42 = vmul.f32 %v497_v39, %v811_v53 }
 0x292   :  { %v424_v43 = vpack.c.bf16 %v347_v40, %v347_v40  ;;  %v335_v44 = vmul.f32 %v416_v33, %v322_v41 }
 0x293   :  { %v499_v45 = vpop.eup %498  ;;  %v336_v46 = vmul.f32 %v416_v33, %v323_v42 }
 0x294   :  { %v501_v47 = vpop.eup %500  ;;  %v348_v48 = vadd.f32 %v417_v36, %v335_v44  ;;  %v324_v49 = vmul.f32 %v499_v45, %v815_v61  ;;  %378 = vst.msk [vmem:[#allocation13] sm:$0xf] %vm377_vm4, %v424_v43 }
 0x295   :  { %v349_v50 = vadd.f32 %v417_v36, %v336_v46  ;;  %v325_v51 = vmul.f32 %v501_v47, %v277_v5 }
 0x296   :  { %v425_v52 = vpack.c.bf16 %v348_v48, %v348_v48  ;;  %v337_v54 = vmul.f32 %v416_v33, %v324_v49 }
 0x297   :  { %v503_v55 = vpop.eup %502  ;;  %v426_v56 = vpack.c.bf16 %v349_v50, %v349_v50  ;;  %v338_v57 = vmul.f32 %v416_v33, %v325_v51 }
 0x298   :  { %v350_v58 = vadd.f32 %v417_v36, %v337_v54  ;;  %v326_v53 = vmul.f32 %v503_v55, %v278_v9  ;;  %379 = vst.msk [vmem:[#allocation13 + $0x4] sm:$0xf] %vm377_vm4, %v425_v52 }
 0x299   :  { %v351_v59 = vadd.f32 %v417_v36, %v338_v57  ;;  %380 = vst.msk [vmem:[#allocation13 + $0x8] sm:$0xf] %vm377_vm4, %v426_v56 }
 0x29a   :  { %v427_v60 = vpack.c.bf16 %v350_v58, %v350_v58  ;;  %v339_v62 = vmul.f32 %v416_v33, %v326_v53 }
 0x29b   :  { %v428_v63 = vpack.c.bf16 %v351_v59, %v351_v59 }
 0x29c   :  { %v352_v61 = vadd.f32 %v417_v36, %v339_v62  ;;  %381 = vst.msk [vmem:[#allocation13 + $0xc] sm:$0xf] %vm377_vm4, %v427_v60 }
 0x29d   :  { %382 = vst.msk [vmem:[#allocation13 + $0x10] sm:$0xf] %vm377_vm4, %v428_v63 }
 0x29e   :  { %v429_v0 = vpack.c.bf16 %v352_v61, %v352_v61 }
 0x2a0   :  { %384 = vst.msk [vmem:[#allocation13 + $0x14] sm:$0x7] %vm383_vm5, %v429_v0 }
 0x2a1   :  { %647 = shalt.err (!%p644_p10)
}
 0x2a2   :  { %s648_s27 = scalar_lea.hbm %s853_s6, 384 }
 0x2a3   :  { %p649_p11 = scmp.ne.s32.totalorder %s853_s6, %s648_s27  ;;  %p652_p12 = scmp.lt.u32.totalorder %s648_s27, %s853_s6 }
 0x2a5   :  { %p654_p13 = pnand %p652_p12, %p649_p11 }
 0x2a7   :  { %657 = shalt.err (!%p654_p13)
}
 0x2a8   :  { %396 = dma.vmem_to_hbm [thread:$0]  %s391_s21, 384, %s853_s6, [#allocation4], %s670_s9, %s670_s9, %s671_s10  }
 0x2a9   :  { %666 = dma.done.wait [#allocation4], 384  }
 0x2aa   :  { %667 = vsyncadd [#allocation4], 4294966912 }
 0x2ab   :  { %400 = vsyncpa [#allocation3], 1 }
 0x2ac   :  { %401 = vsyncpa [#allocation6], 1 }
 0x2ad   :  { %402 = vsyncpa [#allocation9], 1 }
 0x2ae   :  { %403 = vsyncpa [#allocation12], 1 }
 0x2af   :  { %404 = vsyncpa [#allocation4], 1 }

// kernel: splicebert_for_token_cls_forward.23
= control target key start
LH: loop header
LB: loop body
LE: loop exit
PB: predicated region body
PF: predicated region fallthrough
CT: control target
= control target key end

     0   :  { %8 = vsyncpa [#allocation3], 0  ;;  %s909_s0 = inlined_call_operand.hbm [shape: bf16[2,23,32], index: 0, kind: input, shape index: {}]   ;;  %s910_s1 = inlined_call_operand.hbm [shape: bf16[4,32], index: 1, kind: input, shape index: {}]   ;;  %s911_s2 = inlined_call_operand.hbm [shape: f32[4,1], index: 2, kind: input, shape index: {}]   ;;  %s912_s3 = inlined_call_operand.hbm [shape: f32[2,4,11], index: 3, kind: output, shape index: {}]  }
   0x1   :  { %10 = vsyncpa [#allocation3 + $0x1], 0 }
   0x2   :  { %11 = vsyncpa [#allocation6], 0 }
   0x3   :  { %12 = vsyncpa [#allocation4], 0 }
   0x4   :  { %14 = vsyncpa [#allocation4 + $0x1], 0  ;;  %s679_s12 = smov 0   ;;  %s681_s13 = smov 0  }
   0x5   :  { %s683_s14 = smov 0   ;;  %s685_s15 = smov 0  }
   0x6 LB: > { %s700_s16 = sadd.s32 4294967295, %s648_s15   ;;  %s389_s17 = sadd.s32 4294967294, %s648_s15   ;;  %s648_s15 = sphi %s685_s15, %s937_s15   ;;  %s644_s14 = sphi %s683_s14, %s936_s14   ;;  %s640_s13 = sphi %s681_s13, %s935_s13   ;;  %s636_s12 = sphi %s679_s12, %s934_s12  }
   0x7   : > { %s704_s18 = sadd.s32 1, %s648_s15   ;;  %s27_s19 = sadd.s32 1, %s644_s14 }
   0x8   : > { %s24_s20 = ssub.s32 %s648_s15, %s704_s18  ;;  %p34_p0 = scmp.ne.s32.totalorder %s644_s14, %s640_s13 }
   0x9   : > { %p25_p1 = scmp.eq.s32.totalorder %s24_s20, 0  ;;  %p35_p2 = scmp.eq.s32.totalorder %s648_s15, 0 }
   0xa   : > { %p40_p3 = scmp.ne.s32.totalorder %s640_s13, %s636_s12  ;;  %p913_p4 = scmp.eq.s32.totalorder %s700_s16, 0 }
   0xb   : > { %s716_s21 = scalar_select %p25_p1, %s644_s14, %s27_s19  }
   0xc   : > { %p718_p5 = por %p35_p2, %p34_p0  ;;  %p724_p6 = por %p913_p4, %p40_p3 }
   0xd   : > { %p106_p7 = scmp.eq.s32.totalorder %s700_s16, 1  ;;  %p112_p8 = scmp.eq.s32.totalorder %s389_s17, 1 }
   0xe   : > { %s919_s23 = scalar_select %p724_p6, 1, 0 }
   0xf   : > { %p390_p9 = scmp.ge.s32.totalorder %s648_s15, 1  ;;  %p119_p10 = scmp.lt.s32.totalorder %s648_s15, 3 }
  0x10   : > { %p731_p11 = por %p106_p7, %p34_p0  ;;  %p735_p12 = por %p112_p8, %p40_p3 }
  0x11   : > { %p739_p13 = pnand %p390_p9, %p119_p10  ;;  %s650_s27 = smov [#allocation5]  }
  0x12   : > { %s920_s24 = scalar_select %p731_p11, 1, 0 }
  0x13   : > { %s921_s25 = scalar_select %p735_p12, 1, 0 }
  0x14   : > { %s922_s26 = scalar_select %p739_p13, 1, 0 }
  0x15   : > { %p429_p2 = pneg %p739_p13  ;;  %s132_s28 = sshll.u32 %s650_s27, 4  ;;  %s133_s28 = int_to_ptr.vmem [resolvable:$true] %s132_s28 }
  0x16   : > { %p446_p4 = scmp.lt.s32.totalorder %s648_s15, 2  ;;  %p923_p0 = scmp.eq.s32.totalorder %s700_s16, 0 }
  0x17   : > { %s651_s4 = smov [#allocation7]   ;;  %s492_s8 = scalar_lea.hbm %s910_s1, 32 }
  0x18   : > { %p749_p7 = pnand %p429_p2, %p923_p0  ;;  %p755_p3 = pnand %p446_p4, %p718_p5 }
  0x19   : > { %s143_s5 = sshll.u32 %s651_s4, 4  ;;  %p493_p8 = scmp.ne.s32.totalorder %s910_s1, %s492_s8  ;;  %s759_s5 = int_to_ptr.vmem [resolvable:$true] %s143_s5 }
  0x1a   : > { %s925_s30 = scalar_select %p755_p3, 1, 0 }
  0x1b   : > { %p494_p9 = pneg %p749_p7  ;;  %p499_p10 = scmp.lt.u32.totalorder %s492_s8, %s910_s1 }
  0x1d   : > { %p495_p4 = pnand %p494_p9, %p493_p8 }
  0x1f   : > { %p496_p5 = pneg %p495_p4 }
  0x21   : > { %p501_p2 = pnand %p499_p10, %p496_p5 }
  0x23   : > { %504 = shalt.err (!%p501_p2)
}
  0x24   : > { %s505_s19 = scalar_lea.vmem %s133_s28, 32  ;;  %p513_p11 = scmp.lt.s32.totalorder %s133_s28, %s133_s28 }
  0x25   : > { %p506_p0 = scmp.ne.s32.totalorder %s133_s28, %s505_s19  ;;  %p514_p6 = scmp.lt.s32.totalorder %s505_s19, %s505_s19 }
  0x27   : > { %p508_p1 = pnand %p506_p0, %p494_p9  ;;  %p515_p13 = por %p514_p6, %p513_p11 }
  0x29   : > { %p509_p12 = pneg %p508_p1 }
  0x2b   : > { %p516_p3 = pnand %p515_p13, %p509_p12 }
  0x2d   : > { %519 = shalt.err (!%p516_p3)
}
  0x2e   : > { %432 = dma.hbm_to_vmem [thread:$0]  (!%p749_p7), %s910_s1, 32, %s133_s28, [#allocation6]  }
  0x2f   : > { %s154_s27 = sand.u32 1, %s644_s14   ;;  %s520_s7 = scalar_lea.hbm %s911_s2, 64 }
  0x30   : > { %p521_p1 = scmp.ne.s32.totalorder %s911_s2, %s520_s7  ;;  %p527_p12 = scmp.lt.u32.totalorder %s520_s7, %s911_s2 }
  0x32   : > { %p523_p6 = pnand %p521_p1, %p494_p9 }
  0x34   : > { %p524_p11 = pneg %p523_p6 }
  0x36   : > { %p529_p13 = pnand %p527_p12, %p524_p11 }
  0x38   : > { %532 = shalt.err (!%p529_p13)
}
  0x39   : > { %s533_s28 = scalar_lea.vmem %s759_s5, 64  ;;  %p541_p5 = scmp.lt.s32.totalorder %s759_s5, %s759_s5 }
  0x3a   : > { %p534_p3 = scmp.ne.s32.totalorder %s759_s5, %s533_s28  ;;  %p542_p10 = scmp.lt.s32.totalorder %s533_s28, %s533_s28 }
  0x3c   : > { %p536_p8 = pnand %p534_p3, %p494_p9  ;;  %p543_p2 = por %p542_p10, %p541_p5 }
  0x3e   : > { %p537_p4 = pneg %p536_p8 }
  0x40   : > { %p544_p0 = pnand %p543_p2, %p537_p4 }
  0x42   : > { %547 = shalt.err (!%p544_p0)
}
  0x43   : > { %435 = dma.hbm_to_vmem [thread:$0]  (!%p749_p7), %s911_s2, 64, %s759_s5, [#allocation6]  }
  0x44   : > { %s414_s20 = smul.u32 12, %s154_s27  ;;  %s817_s9 = scalar_lea.sflag [#allocation3], %s154_s27 }
  0x45   : > { %s415_s22 = smul.u32 192, %s648_s15  ;;  %p926_p7 = scmp.ne.s32.totalorder %s925_s30, 0 }
  0x46   : > { %s158_s29 = scalar_lea.vmem [#allocation2], %s414_s20  ;;  %s553_s28 = scalar_lea.hbm %s909_s0, 384 }
  0x47   : > { %s813_s7 = scalar_lea.hbm %s909_s0, %s415_s22  ;;  %s165_s8 = sshll.u32 %s158_s29, 4  ;;  %s815_s8 = int_to_ptr.vmem [resolvable:$true] %s165_s8 }
  0x48   : > { %s548_s10 = scalar_lea.hbm %s813_s7, 192  ;;  %p550_p1 = pneg %p926_p7 }
  0x49   : > { %p549_p9 = scmp.ne.s32.totalorder %s813_s7, %s548_s10  ;;  %p554_p12 = scmp.lt.u32.totalorder %s813_s7, %s909_s0 }
  0x4a   : > { %p555_p13 = scmp.lt.u32.totalorder %s553_s28, %s548_s10  ;;  %p557_p8 = scmp.lt.u32.totalorder %s548_s10, %s813_s7 }
  0x4b   : > { %p551_p6 = pnand %p550_p1, %p549_p9 }
  0x4c   : > { %p556_p3 = por %p555_p13, %p554_p12 }
  0x4d   : > { %p552_p11 = pneg %p551_p6 }
  0x4e   : > { %p558_p4 = por %p557_p8, %p556_p3 }
  0x50   : > { %p559_p5 = pnand %p558_p4, %p552_p11 }
  0x52   : > { %562 = shalt.err (!%p559_p5)
}
  0x53   : > { %s563_s27 = scalar_lea.vmem %s815_s8, 192  ;;  %s652_s20 = smov [#allocation2]  }
  0x54   : > { %p564_p10 = scmp.ne.s32.totalorder %s815_s8, %s563_s27  ;;  %s568_s22 = sshll.u32 %s652_s20, 4  ;;  %s569_s22 = int_to_ptr.vmem [resolvable:$false] %s568_s22 }
  0x55   : > { %s570_s4 = scalar_lea.vmem %s569_s22, 384  ;;  %p571_p9 = scmp.lt.s32.totalorder %s815_s8, %s569_s22 }
  0x56   : > { %p566_p2 = pnand %p564_p10, %p550_p1  ;;  %p572_p6 = scmp.lt.s32.totalorder %s570_s4, %s563_s27 }
  0x58   : > { %p567_p0 = pneg %p566_p2  ;;  %p573_p12 = por %p572_p6, %p571_p9 }
  0x5a   : > { %p574_p13 = pnand %p573_p12, %p567_p0 }
  0x5c   : > { %577 = shalt.err (!%p574_p13)
}
  0x5d   : > { %s653_s6 = smov 64   ;;  %s654_s29 = smov 4  }
  0x5e   : > { %439 = dma.hbm_to_vmem [thread:$0]  (!%p926_p7), %s813_s7, 192, %s815_s8, %s817_s9, %s653_s6, %s653_s6, %s654_s29  }
  0x5f   : > { %p927_p1 = scmp.ne.s32.totalorder %s922_s26, 0 }
  0x60   : > { %s848_s10 = sand.u32 (!%p927_p1), 1, %s640_s13   ;;  %p928_p11 = scmp.ne.s32.totalorder (!%p927_p1), %s919_s23, 0 }
  0x61   : > { %177 = sbr.rel (%p927_p1) target bundleno = 349 (0x15d), region = 32  ;;  %s180_s11 = scalar_lea.sflag (!%p927_p1), [#allocation3], %s848_s10 }
  0x62   : > { %s416_s5 = smul.u32 (!%p927_p1), 12, %s848_s10 }
  0x64   : > { %s183_s28 = scalar_lea.vmem (!%p927_p1), [#allocation2], %s416_s5 }
  0x68   : > { %623 = dma.done.wait (%p928_p11), %s180_s11, 192  }
  0x69   : > { %625 = vsyncadd (%p928_p11), %s180_s11, 4294967104  ;;  %p929_p3 = scmp.eq.s32.totalorder %s700_s16, 0 }
  0x6b   : > { %627 = dma.done.wait (%p929_p3), [#allocation6], 96   ;;  %p930_p7 = pmov %p929_p3 }
  0x6c   : > { %v655_v0 = vmov 0.0   ;;  %vm656_vm0 = vmmov 0   ;;  %v657_v1 = vmov 0   ;;  %v490_v2 = vld [vmem:[%s183_s28] sm:$0xf8]   ;;  %vm233_vm1 = vcmask 1044480  }
  0x6d   : > { %629 = vsyncadd (%p930_p7), [#allocation6], 4294967200  ;;  %408 = vmatprep.subr.bf16.mxu0 %v655_v0  ;;  %410 = vmatprep.mubr.msk.bf16.mxu0 %vm656_vm0, %v655_v0  ;;  %v491_v3 = vld [vmem:[%s183_s28 + $0x8] ss:$0 sps:$4 sm:$0x11]   ;;  %v234_v5 = vrot.slane %v490_v2, 3 }
  0x6e   : > { %489 = vset.pattern.permute.xlu0 %v657_v1  ;;  %v219_v4 = vld [vmem:[#allocation7] sm:$0xf]  ;;  %v235_v6 = vrot.slane %v491_v3, 3  ;;  %vm237_vm2 = vcmask 261120   ;;  %v218_v9 = vld [vmem:[#allocation5] sm:$0x3] }
  0x6f   : > { %222 = vperm.xlu0 %489, %v219_v4   ;;  %s398_s23 = sshll.u32 %s848_s10, 2  ;;  %s403_s26 = sshll.u32 %s700_s16, 6  ;;  %vm284_vm3 = vcmask 84992  }
  0x70   : > { %v236_v7 = vsel %vm233_vm1, %v234_v5, %v235_v6  ;;  %s213_s30 = scalar_lea.vmem [#allocation8], %s398_s23  ;;  %s865_s17 = scalar_lea.hbm %s912_s3, %s403_s26 }
  0x71   : > { %v242_v8 = vsel %vm237_vm2, %v236_v7, 0  ;;  %s300_s7 = sshll.u32 %s213_s30, 4  ;;  %s287_s16 = scalar_lea.sflag [#allocation4], %s848_s10  ;;  %s867_s7 = int_to_ptr.vmem [resolvable:$true] %s300_s7 }
  0x72   : > { %409 = vmatpush3.bf16.xpose.msra.mxu0 %v242_v8  ;;  %s578_s19 = scalar_lea.vmem %s867_s7, 64  ;;  %p931_p4 = scmp.ne.s32.totalorder %s920_s24, 0 }
  0x73   : > { %p579_p8 = scmp.ne.s32.totalorder %s867_s7, %s578_s19  ;;  %s658_s27 = smov [#allocation8]  }
  0x74   : > { %s582_s20 = sshll.u32 %s658_s27, 4  ;;  %s583_s20 = int_to_ptr.vmem [resolvable:$false] %s582_s20 }
  0x75   : > { %p580_p5 = pnand %p579_p8, %p931_p4  ;;  %s584_s22 = scalar_lea.vmem %s583_s20, 128 }
  0x76   : > { %p585_p2 = scmp.lt.s32.totalorder %s867_s7, %s583_s20  ;;  %p586_p0 = scmp.lt.s32.totalorder %s584_s22, %s578_s19 }
  0x77   : > { %p581_p10 = pneg %p580_p5 }
  0x78   : > { %p587_p9 = por %p586_p0, %p585_p2 }
  0x79   : > { %411 = vmatmul.mubr.msk.bf16.vlgmr.msra.gmra.mrb[0].mxu0 %vm237_vm2, %v218_v9 }
  0x7a   : > { %p588_p6 = pnand %p587_p9, %p581_p10 }
  0xee   : > { %v223_v10 = vpop.permute.xlu0 %222 }
 0x14c   : > { %v278_v11 = vpop.f32.mrb[0].mxu0 }
 0x14d   : > { %v279_v12 = vadd.f32 %v278_v11, %v223_v10  ;;  %v412_v13 = vpop.f32.mrb[1].mxu0 }
 0x14e   : > { %v281_v14 = vpop.f32.mrb[2].mxu0 }
 0x14f   : > { %v413_v15 = vpop.f32.mrb[3].mxu0  ;;  %285 = vst.msk [vmem:[%s213_s30] sm:$0xf] %vm284_vm3, %v279_v12 }
 0x150   : > { %591 = shalt.err (!%p588_p6)
}
 0x151   : > { %s592_s4 = scalar_lea.hbm %s865_s17, 64  ;;  %s596_s10 = scalar_lea.hbm %s912_s3, 128 }
 0x152   : > { %p593_p12 = scmp.ne.s32.totalorder %s865_s17, %s592_s4  ;;  %p597_p11 = scmp.lt.u32.totalorder %s865_s17, %s912_s3 }
 0x153   : > { %p598_p3 = scmp.lt.u32.totalorder %s596_s10, %s592_s4  ;;  %p600_p8 = scmp.lt.u32.totalorder %s592_s4, %s865_s17 }
 0x154   : > { %p594_p13 = pnand %p593_p12, %p931_p4 }
 0x155   : > { %p599_p7 = por %p598_p3, %p597_p11 }
 0x156   : > { %p595_p1 = pneg %p594_p13 }
 0x157   : > { %p601_p5 = por %p600_p8, %p599_p7 }
 0x159   : > { %p602_p10 = pnand %p601_p5, %p595_p1 }
 0x15b   : > { %605 = shalt.err (!%p602_p10)
}
 0x15c   : > { %427 = dma.vmem_to_hbm [thread:$0]  (%p931_p4), %s867_s7, 64, %s865_s17, %s287_s16  }
 0x15d PF: > { %s312_s28 = sand.u32 1, %s636_s12   ;;  %p932_p2 = scmp.ne.s32.totalorder %s921_s25, 0 }
 0x15e   : > { %p933_p0 = scmp.ge.s32.totalorder %s648_s15, 2  ;;  %s313_s23 = scalar_lea.sflag [#allocation4], %s312_s28 }
 0x160   : > { %p441_p9 = pnand %p933_p0, %p932_p2 }
 0x162   : > { %631 = dma.done.wait (!%p441_p9), %s313_s23, 64  }
 0x163   : > { %633 = vsyncadd (!%p441_p9), %s313_s23, 4294967232  ;;  %p17_p6 = scmp.ge.s32.totalorder %s704_s18, 4   ;;  %s934_s12 = smov %s640_s13 }
 0x164   : > { %s935_s13 = smov %s644_s14  ;;  %s936_s14 = smov %s716_s21 }
 0x165   : > { %s937_s15 = smov %s704_s18  ;;  %19 = sbr.rel (!%p17_p6) target bundleno = 6 (0x6), region = 85 }
 0x16c   :  { %318 = vsyncpa [#allocation3], 1 }
 0x16d   :  { %320 = vsyncpa [#allocation3 + $0x1], 1 }
 0x16e   :  { %321 = vsyncpa [#allocation6], 1 }
 0x16f   :  { %322 = vsyncpa [#allocation4], 1 }
 0x170   :  { %324 = vsyncpa [#allocation4 + $0x1], 1 }

</bundles_post_ra>
